<compile_context>
chip_gen: v5e
topology: v5e:2x2
jax: 0.10.0
libtpu: 0.0.40
codegen_flags: <defaults>
</compile_context>

<pallas_src>
import functools

import jax
import jax.numpy as jnp
from jax.experimental import pallas as pl
from jax.experimental.pallas import tpu as pltpu

NEG_SLOPE = 0.01  # torch.nn.LeakyReLU default negative_slope

D_IN, D_H1, D_H2, D_OUT = 1500, 512, 256, 2
N3_PAD = 128          # D_OUT padded up to one full lane tile


def _leaky_relu(v):
    return jnp.where(v >= 0, v, NEG_SLOPE * v)


# ----------------------------------------------------------------------------
# Kernel: one batch tile, all three layers fused.  Matmuls run on the MXU in
# bf16 with f32 accumulation; bias + LeakyReLU run in f32 on the VPU; the
# padded 128-lane output is stored in bf16.
# ----------------------------------------------------------------------------
def mlp_kernel(x_ref, w1_ref, b1_ref, w2_ref, b2_ref, w3_ref, b3_ref, o_ref):
    x = x_ref[...].astype(jnp.bfloat16)                      # (TM, 1500)

    h = jnp.dot(x, w1_ref[...], preferred_element_type=jnp.float32)
    h = _leaky_relu(h + b1_ref[...])                         # (TM, 512) f32

    h = jnp.dot(h.astype(jnp.bfloat16), w2_ref[...],
                preferred_element_type=jnp.float32)
    h = _leaky_relu(h + b2_ref[...])                         # (TM, 256) f32

    h = jnp.dot(h.astype(jnp.bfloat16), w3_ref[...],
                preferred_element_type=jnp.float32)
    o_ref[...] = _leaky_relu(h + b3_ref[...]).astype(o_ref.dtype)  # (TM, 128)


# ----------------------------------------------------------------------------
# One-time parameter prep: weights stored (in, out), last layer zero-padded to
# 128 output lanes, matmul operands cast to bf16, biases kept f32.
# ----------------------------------------------------------------------------
def prepare_params(w1, b1, w2, b2, w3, b3):
    w3p = jnp.zeros((D_H2, N3_PAD), jnp.float32).at[:, :D_OUT].set(w3)
    b3p = jnp.zeros((1, N3_PAD), jnp.float32).at[:, :D_OUT].set(b3)
    return (w1.astype(jnp.bfloat16), b1.astype(jnp.float32),
            w2.astype(jnp.bfloat16), b2.astype(jnp.float32),
            w3p.astype(jnp.bfloat16), b3p)


def _choose_tiling(batch, tm):
    """Balanced batch tiling (static shapes only).

    Avoids padding B to a multiple of tm, rounds tiles to a multiple of 16
    (clean bf16 sublane packing for the intermediates), and gives v7x's two
    TensorCores at least two grid steps when there is enough work.
    """
    n_tiles = max(1, -(-batch // tm))
    if n_tiles == 1 and batch >= 64:
        n_tiles = 2                       # let "parallel" axis use both TCs (v7x)
    if n_tiles == 1:
        return batch, 1                   # full-dim block: any B is legal
    per = -(-batch // n_tiles)
    tile = ((per + 15) // 16) * 16
    return tile, -(-batch // tile)


@functools.partial(jax.jit, static_argnames=("tm",))
def mlp_forward(x, prepared_params, tm=1024):
    """x: (B, 1500) f32.  Returns (B, 2) f32.

    tm: max batch-tile rows.  1024 is safe on every chip generation; v6e/v7x
    may use 2048, keep <= 1024 on v5e (16 MiB default scoped VMEM).
    """
    w1p, b1, w2p, b2, w3p, b3p = prepared_params
    B = x.shape[0]

    tile, n_tiles = _choose_tiling(B, tm)

    flops = 2 * B * (D_IN * D_H1 + D_H1 * D_H2 + D_H2 * N3_PAD)
    bytes_accessed = (B * D_IN * 4
                      + (w1p.size + w2p.size + w3p.size) * 2
                      + (b1.size + b2.size + b3p.size) * 4
                      + B * N3_PAD * 2)

    const = lambda i: (0, 0)   # weights/biases: same block every grid step
    out_full = pl.pallas_call(
        mlp_kernel,
        out_shape=jax.ShapeDtypeStruct((B, N3_PAD), jnp.bfloat16),
        grid=(n_tiles,),
        in_specs=[
            pl.BlockSpec((tile, D_IN), lambda i: (i, 0)),   # x tile (f32)
            pl.BlockSpec((D_IN, D_H1), const),              # w1 (resident)
            pl.BlockSpec((1, D_H1), const),                 # b1
            pl.BlockSpec((D_H1, D_H2), const),              # w2
            pl.BlockSpec((1, D_H2), const),                 # b2
            pl.BlockSpec((D_H2, N3_PAD), const),            # w3 (padded N)
            pl.BlockSpec((1, N3_PAD), const),               # b3 (padded N)
        ],
        out_specs=pl.BlockSpec((tile, N3_PAD), lambda i: (i, 0)),
        compiler_params=pltpu.CompilerParams(
            dimension_semantics=("parallel",),
            vmem_limit_bytes=64 * 1024 * 1024),
        cost_estimate=pl.CostEstimate(
            flops=flops, transcendentals=0, bytes_accessed=bytes_accessed),
    )(x, w1p, b1, w2p, b2, w3p, b3p)

    return out_full[:, :D_OUT].astype(jnp.float32)


# ----------------------------------------------------------------------------
# Deterministic init mimicking torch.nn.Linear (uniform +-1/sqrt(fan_in)).
# Weights stored pre-transposed as (in_features, out_features).
# ----------------------------------------------------------------------------
def init_params(key):
    def linear_init(k, fan_in, fan_out):
        kw, kb = jax.random.split(k)
        bound = 1.0 / jnp.sqrt(fan_in)
        w = jax.random.uniform(kw, (fan_in, fan_out), jnp.float32, -bound, bound)
        b = jax.random.uniform(kb, (1, fan_out), jnp.float32, -bound, bound)
        return w, b

    k1, k2, k3 = jax.random.split(key, 3)
    w1, b1 = linear_init(k1, D_IN, D_H1)
    w2, b2 = linear_init(k2, D_H1, D_H2)
    w3, b3 = linear_init(k3, D_H2, D_OUT)
    return w1, b1, w2, b2, w3, b3


def ref_forward(x, params):
    """Plain-JAX reference using the same bf16-operand / f32-accumulate math
    (and the same final bf16 output rounding) as the kernel."""
    w1, b1, w2, b2, w3, b3 = params
    h = jnp.dot(x.astype(jnp.bfloat16), w1.astype(jnp.bfloat16),
                preferred_element_type=jnp.float32)
    h = _leaky_relu(h + b1)
    h = jnp.dot(h.astype(jnp.bfloat16), w2.astype(jnp.bfloat16),
                preferred_element_type=jnp.float32)
    h = _leaky_relu(h + b2)
    h = jnp.dot(h.astype(jnp.bfloat16), w3.astype(jnp.bfloat16),
                preferred_element_type=jnp.float32)
    h = _leaky_relu(h + b3)
    return h.astype(jnp.bfloat16).astype(jnp.float32)


if __name__ == "__main__":
    key = jax.random.PRNGKey(0)
    k_params, k_x = jax.random.split(key)

    params = init_params(k_params)
    prepared = prepare_params(*params)

    batch = 8
    x = jax.random.normal(k_x, (batch, D_IN), dtype=jnp.float32)

    out = mlp_forward(x, prepared)
    out = jax.block_until_ready(out)

    ref = ref_forward(x, params)
    assert out.shape == (batch, D_OUT)
    assert jnp.allclose(out, ref, atol=1e-2, rtol=1e-2), (
        float(jnp.max(jnp.abs(out - ref))))

    print("KERNEL_OK")
</pallas_src>

<mosaic_0001>
module attributes {stable_mosaic.version = 11 : i64} {
  func.func @mlp_kernel(%arg0: i32, %arg1: memref<8x1500xf32, #tpu.memory_space<vmem>>, %arg2: memref<1500x512xbf16, #tpu.memory_space<vmem>>, %arg3: memref<1x512xf32, #tpu.memory_space<vmem>>, %arg4: memref<512x256xbf16, #tpu.memory_space<vmem>>, %arg5: memref<1x256xf32, #tpu.memory_space<vmem>>, %arg6: memref<256x128xbf16, #tpu.memory_space<vmem>>, %arg7: memref<1x128xf32, #tpu.memory_space<vmem>>, %arg8: memref<8x128xbf16, #tpu.memory_space<vmem>>) attributes {dimension_semantics = [#tpu.dimension_semantics<parallel>], iteration_bounds = array<i64: 1>, scalar_prefetch = 0 : i64, scratch_operands = 0 : i64, tpu.core_type = #tpu.core_type<tc>, window_params = [{transform_indices = @transform_0, window_bounds = array<i64: 8, 1500>}, {pipeline_mode = #tpu.pipeline_mode<synchronous>, transform_indices = @transform_1, window_bounds = array<i64: 1500, 512>}, {pipeline_mode = #tpu.pipeline_mode<synchronous>, transform_indices = @transform_2, window_bounds = array<i64: 1, 512>}, {pipeline_mode = #tpu.pipeline_mode<synchronous>, transform_indices = @transform_3, window_bounds = array<i64: 512, 256>}, {pipeline_mode = #tpu.pipeline_mode<synchronous>, transform_indices = @transform_4, window_bounds = array<i64: 1, 256>}, {pipeline_mode = #tpu.pipeline_mode<synchronous>, transform_indices = @transform_5, window_bounds = array<i64: 256, 128>}, {pipeline_mode = #tpu.pipeline_mode<synchronous>, transform_indices = @transform_6, window_bounds = array<i64: 1, 128>}, {transform_indices = @transform_7, window_bounds = array<i64: 8, 128>}]} {
    %c0 = arith.constant 0 : index
    %c0_0 = arith.constant 0 : index
    %0 = vector.load %arg1[%c0, %c0_0] : memref<8x1500xf32, #tpu.memory_space<vmem>>, vector<8x1500xf32>
    %1 = arith.truncf %0 : vector<8x1500xf32> to vector<8x1500xbf16>
    %c0_1 = arith.constant 0 : index
    %c0_2 = arith.constant 0 : index
    %2 = vector.load %arg2[%c0_1, %c0_2] : memref<1500x512xbf16, #tpu.memory_space<vmem>>, vector<1500x512xbf16>
    %cst = arith.constant dense<0.000000e+00> : vector<8x512xf32>
    %3 = tpu.matmul %1, %2, %cst {dimension_numbers = #tpu.dot_dimension_numbers<[1], [0], [0], [1], [0, 0, 1, 1], [], []>} : vector<8x1500xbf16>, vector<1500x512xbf16>, vector<8x512xf32> -> vector<8x512xf32>
    %c0_3 = arith.constant 0 : index
    %c0_4 = arith.constant 0 : index
    %4 = vector.load %arg3[%c0_3, %c0_4] : memref<1x512xf32, #tpu.memory_space<vmem>>, vector<1x512xf32>
    %5 = vector.broadcast %4 : vector<1x512xf32> to vector<8x512xf32>
    %6 = arith.addf %3, %5 : vector<8x512xf32>
    %cst_5 = arith.constant 0.000000e+00 : f32
    %7 = vector.broadcast %cst_5 : f32 to vector<8x512xf32>
    %8 = arith.cmpf oge, %6, %7 : vector<8x512xf32>
    %cst_6 = arith.constant 0.00999999977 : f32
    %9 = vector.broadcast %cst_6 : f32 to vector<8x512xf32>
    %10 = arith.mulf %9, %6 : vector<8x512xf32>
    %11 = arith.select %8, %6, %10 : vector<8x512xi1>, vector<8x512xf32>
    %12 = arith.truncf %11 : vector<8x512xf32> to vector<8x512xbf16>
    %c0_7 = arith.constant 0 : index
    %c0_8 = arith.constant 0 : index
    %13 = vector.load %arg4[%c0_7, %c0_8] : memref<512x256xbf16, #tpu.memory_space<vmem>>, vector<512x256xbf16>
    %cst_9 = arith.constant dense<0.000000e+00> : vector<8x256xf32>
    %14 = tpu.matmul %12, %13, %cst_9 {dimension_numbers = #tpu.dot_dimension_numbers<[1], [0], [0], [1], [0, 0, 1, 1], [], []>} : vector<8x512xbf16>, vector<512x256xbf16>, vector<8x256xf32> -> vector<8x256xf32>
    %c0_10 = arith.constant 0 : index
    %c0_11 = arith.constant 0 : index
    %15 = vector.load %arg5[%c0_10, %c0_11] : memref<1x256xf32, #tpu.memory_space<vmem>>, vector<1x256xf32>
    %16 = vector.broadcast %15 : vector<1x256xf32> to vector<8x256xf32>
    %17 = arith.addf %14, %16 : vector<8x256xf32>
    %cst_12 = arith.constant 0.000000e+00 : f32
    %18 = vector.broadcast %cst_12 : f32 to vector<8x256xf32>
    %19 = arith.cmpf oge, %17, %18 : vector<8x256xf32>
    %cst_13 = arith.constant 0.00999999977 : f32
    %20 = vector.broadcast %cst_13 : f32 to vector<8x256xf32>
    %21 = arith.mulf %20, %17 : vector<8x256xf32>
    %22 = arith.select %19, %17, %21 : vector<8x256xi1>, vector<8x256xf32>
    %23 = arith.truncf %22 : vector<8x256xf32> to vector<8x256xbf16>
    %c0_14 = arith.constant 0 : index
    %c0_15 = arith.constant 0 : index
    %24 = vector.load %arg6[%c0_14, %c0_15] : memref<256x128xbf16, #tpu.memory_space<vmem>>, vector<256x128xbf16>
    %cst_16 = arith.constant dense<0.000000e+00> : vector<8x128xf32>
    %25 = tpu.matmul %23, %24, %cst_16 {dimension_numbers = #tpu.dot_dimension_numbers<[1], [0], [0], [1], [0, 0, 1, 1], [], []>} : vector<8x256xbf16>, vector<256x128xbf16>, vector<8x128xf32> -> vector<8x128xf32>
    %c0_17 = arith.constant 0 : index
    %c0_18 = arith.constant 0 : index
    %26 = vector.load %arg7[%c0_17, %c0_18] : memref<1x128xf32, #tpu.memory_space<vmem>>, vector<1x128xf32>
    %27 = vector.broadcast %26 : vector<1x128xf32> to vector<8x128xf32>
    %28 = arith.addf %25, %27 : vector<8x128xf32>
    %cst_19 = arith.constant 0.000000e+00 : f32
    %29 = vector.broadcast %cst_19 : f32 to vector<8x128xf32>
    %30 = arith.cmpf oge, %28, %29 : vector<8x128xf32>
    %cst_20 = arith.constant 0.00999999977 : f32
    %31 = vector.broadcast %cst_20 : f32 to vector<8x128xf32>
    %32 = arith.mulf %31, %28 : vector<8x128xf32>
    %33 = arith.select %30, %28, %32 : vector<8x128xi1>, vector<8x128xf32>
    %34 = arith.truncf %33 : vector<8x128xf32> to vector<8x128xbf16>
    %c0_21 = arith.constant 0 : index
    %c0_22 = arith.constant 0 : index
    %35 = vector.load %arg8[%c0_21, %c0_22] : memref<8x128xbf16, #tpu.memory_space<vmem>>, vector<8x128xbf16>
    tpu.vector_store %arg8[%c0_21, %c0_22], %34 {strides = array<i32>} : memref<8x128xbf16, #tpu.memory_space<vmem>>, vector<8x128xbf16>,
    return
  }
  func.func @transform_0(%arg0: i32) -> (i32, i32) {
    %c0_i32 = arith.constant 0 : i32
    %c0_i32_0 = arith.constant 0 : i32
    return %arg0, %c0_i32 : i32, i32
  }
  func.func @transform_1(%arg0: i32) -> (i32, i32) {
    %c0_i32 = arith.constant 0 : i32
    %c0_i32_0 = arith.constant 0 : i32
    %c0_i32_1 = arith.constant 0 : i32
    return %c0_i32, %c0_i32_0 : i32, i32
  }
  func.func @transform_2(%arg0: i32) -> (i32, i32) {
    %c0_i32 = arith.constant 0 : i32
    %c0_i32_0 = arith.constant 0 : i32
    %c0_i32_1 = arith.constant 0 : i32
    return %c0_i32, %c0_i32_0 : i32, i32
  }
  func.func @transform_3(%arg0: i32) -> (i32, i32) {
    %c0_i32 = arith.constant 0 : i32
    %c0_i32_0 = arith.constant 0 : i32
    %c0_i32_1 = arith.constant 0 : i32
    return %c0_i32, %c0_i32_0 : i32, i32
  }
  func.func @transform_4(%arg0: i32) -> (i32, i32) {
    %c0_i32 = arith.constant 0 : i32
    %c0_i32_0 = arith.constant 0 : i32
    %c0_i32_1 = arith.constant 0 : i32
    return %c0_i32, %c0_i32_0 : i32, i32
  }
  func.func @transform_5(%arg0: i32) -> (i32, i32) {
    %c0_i32 = arith.constant 0 : i32
    %c0_i32_0 = arith.constant 0 : i32
    %c0_i32_1 = arith.constant 0 : i32
    return %c0_i32, %c0_i32_0 : i32, i32
  }
  func.func @transform_6(%arg0: i32) -> (i32, i32) {
    %c0_i32 = arith.constant 0 : i32
    %c0_i32_0 = arith.constant 0 : i32
    %c0_i32_1 = arith.constant 0 : i32
    return %c0_i32, %c0_i32_0 : i32, i32
  }
  func.func @transform_7(%arg0: i32) -> (i32, i32) {
    %c0_i32 = arith.constant 0 : i32
    %c0_i32_0 = arith.constant 0 : i32
    return %arg0, %c0_i32 : i32, i32
  }
}

</mosaic_0001>

<bundles_post_ra>
// kernel: mlp_forward.1
= control target key start
LH: loop header
LB: loop body
LE: loop exit
PB: predicated region body
PF: predicated region fallthrough
CT: control target
= control target key end

     0   :  { %12 = vsyncpa [#allocation3], 0  ;;  %s6453_s0 = inlined_call_operand.hbm [shape: f32[8,1500], index: 0, kind: input, shape index: {}]   ;;  %s6454_s1 = inlined_call_operand.hbm [shape: bf16[1500,512], index: 1, kind: input, shape index: {}]   ;;  %s6455_s2 = inlined_call_operand.hbm [shape: f32[1,512], index: 2, kind: input, shape index: {}]   ;;  %s6456_s3 = inlined_call_operand.hbm [shape: bf16[512,256], index: 3, kind: input, shape index: {}]   ;;  %s6457_s4 = inlined_call_operand.hbm [shape: f32[1,256], index: 4, kind: input, shape index: {}]   ;;  %s6458_s5 = inlined_call_operand.hbm [shape: bf16[256,128], index: 5, kind: input, shape index: {}]   ;;  %s6459_s6 = inlined_call_operand.hbm [shape: f32[1,128], index: 6, kind: input, shape index: {}]   ;;  %s6460_s7 = inlined_call_operand.vmem [shape: bf16[8,128], index: 7, kind: output, shape index: {}]  }
   0x1   :  { %13 = vsyncpa [#allocation5], 0 }
   0x2   :  { %14 = vsyncpa [#allocation8], 0  ;;  %s31_s26 = sshll.u32 %s6454_s1, 4  ;;  %s32_s26 = int_to_ptr.hbm [resolvable:$true] %s31_s26 }
   0x3   :  { %15 = vsyncpa [#allocation11], 0  ;;  %s6219_s27 = smov [#allocation4]   ;;  %s55_s8 = sshll.u32 %s6456_s3, 4  ;;  %s56_s8 = int_to_ptr.hbm [resolvable:$true] %s55_s8 }
   0x4   :  { %s33_s28 = sshll.u32 %s6219_s27, 4  ;;  %s6220_s9 = smov 256   ;;  %s34_s28 = int_to_ptr.vmem [resolvable:$true] %s33_s28 }
   0x5   :  { %s6221_s10 = smov 16   ;;  %s6222_s11 = smov [#allocation7]  }
   0x6   :  { %39 = dma.hbm_to_vmem [thread:$0]  %s32_s26, 48128, %s34_s28, [#allocation5], %s6220_s9, %s6220_s9, %s6221_s10  }
   0x7   :  { %s57_s12 = sshll.u32 %s6222_s11, 4  ;;  %s6223_s13 = smov 128   ;;  %s58_s12 = int_to_ptr.vmem [resolvable:$true] %s57_s12 }
   0x8   :  { %s6224_s14 = smov 8   ;;  %s79_s16 = sshll.u32 %s6458_s5, 4  ;;  %s80_s16 = int_to_ptr.hbm [resolvable:$true] %s79_s16 }
   0x9   :  { %63 = dma.hbm_to_vmem [thread:$0]  %s56_s8, 8192, %s58_s12, [#allocation8], %s6223_s13, %s6223_s13, %s6224_s14  }
   0xa   :  { %s6225_s17 = smov [#allocation10]   ;;  %s21_s20 = sshll.u32 %s6453_s0, 4  ;;  %s22_s20 = int_to_ptr.hbm [resolvable:$true] %s21_s20 }
   0xb   :  { %s81_s18 = sshll.u32 %s6225_s17, 4  ;;  %s6226_s21 = smov 64   ;;  %s82_s18 = int_to_ptr.vmem [resolvable:$true] %s81_s18 }
   0xc   :  { %s6227_s22 = smov 4   ;;  %s6228_s23 = smov [#allocation2]  }
   0xd   :  { %87 = dma.hbm_to_vmem [thread:$0]  %s80_s16, 2048, %s82_s18, [#allocation11], %s6226_s21, %s6226_s21, %s6227_s22  }
   0xe   :  { %s23_s24 = sshll.u32 %s6228_s23, 4  ;;  %s45_s27 = sshll.u32 %s6455_s2, 4  ;;  %s24_s24 = int_to_ptr.vmem [resolvable:$true] %s23_s24  ;;  %s46_s27 = int_to_ptr.hbm [resolvable:$true] %s45_s27 }
   0xf   :  { %26 = dma.hbm_to_vmem [thread:$0]  %s22_s20, 1536, %s24_s24, [#allocation3]  }
  0x10   :  { %s69_s29 = sshll.u32 %s6457_s4, 4  ;;  %s6229_s30 = smov [#allocation6]   ;;  %s70_s29 = int_to_ptr.hbm [resolvable:$true] %s69_s29 }
  0x11   :  { %s47_s8 = sshll.u32 %s6229_s30, 4  ;;  %s6230_s0 = smov [#allocation9]   ;;  %s48_s8 = int_to_ptr.vmem [resolvable:$true] %s47_s8 }
  0x12   :  { %50 = dma.hbm_to_vmem [thread:$0]  %s46_s27, 64, %s48_s8, [#allocation5]  }
  0x13   :  { %s71_s9 = sshll.u32 %s6230_s0, 4  ;;  %s93_s12 = sshll.u32 %s6459_s6, 4  ;;  %s72_s9 = int_to_ptr.vmem [resolvable:$true] %s71_s9  ;;  %s94_s12 = int_to_ptr.hbm [resolvable:$true] %s93_s12 }
  0x14   :  { %74 = dma.hbm_to_vmem [thread:$0]  %s70_s29, 32, %s72_s9, [#allocation8]  }
  0x15   :  { %s6231_s2 = smov [#allocation12]  }
  0x16   :  { %s95_s13 = sshll.u32 %s6231_s2, 4  ;;  %s96_s13 = int_to_ptr.vmem [resolvable:$true] %s95_s13 }
  0x17   :  { %98 = dma.hbm_to_vmem [thread:$0]  %s94_s12, 16, %s96_s13, [#allocation11]  }
  0x18   :  { %6211 = dma.done.wait [#allocation3], 1536  }
  0x19   :  { %6212 = vsyncadd [#allocation3], 4294965760 }
  0x1a   :  { %6213 = dma.done.wait [#allocation5], 48192  }
  0x1b   :  { %6214 = vsyncadd [#allocation5], 4294919104 }
  0x1c   :  { %6215 = dma.done.wait [#allocation8], 8224  }
  0x1d   :  { %6216 = vsyncadd [#allocation8], 4294959072 }
  0x1e   :  { %6217 = dma.done.wait [#allocation11], 2064  }
  0x1f   :  { %6218 = vsyncadd [#allocation11], 4294965232  ;;  %v3858_v0 = vld [vmem:[#allocation4 + $0xe0] sm:$0xf]  ;;  %v5602_v1 = vld [vmem:[#allocation4 + $0xec] sm:$0xf0] }
  0x20   :  { %v3986_v2 = vld [vmem:[#allocation4 + $0x1e0] sm:$0xf]  ;;  %v3859_v3 = vor.u32 %v5602_v1, %v3858_v0  ;;  %v5634_v4 = vld [vmem:[#allocation4 + $0x1ec] sm:$0xf0]  ;;  %vm2418_vm0 = vcmask 1045504   ;;  %vm2414_vm1 = vcmask 752640  }
  0x21   :  { %v4114_v5 = vld [vmem:[#allocation4 + $0x2e0] sm:$0xf]  ;;  %v5666_v6 = vld [vmem:[#allocation4 + $0x2ec] sm:$0xf0]  ;;  %v3987_v7 = vor.u32 %v5634_v4, %v3986_v2 }
  0x22   :  { %v4115_v8 = vor.u32 %v5666_v6, %v4114_v5  ;;  %v4242_v9 = vld [vmem:[#allocation4 + $0x3e0] sm:$0xf]  ;;  %v5698_v10 = vld [vmem:[#allocation4 + $0x3ec] sm:$0xf0]  ;;  %2431 = vmatpush.bf16.msra.mxu0 %v3859_v3 }
  0x23   :  { %v3842_v11 = vld [vmem:[#allocation4 + $0xc0] sm:$0xf]  ;;  %v4243_v12 = vor.u32 %v5698_v10, %v4242_v9  ;;  %v5598_v13 = vld [vmem:[#allocation4 + $0xcc] sm:$0xf0]  ;;  %2444 = vmatpush.bf16.msra.mxu1 %v3987_v7 }
  0x24   :  { %v3970_v14 = vld [vmem:[#allocation4 + $0x1c0] sm:$0xf]  ;;  %v5630_v15 = vld [vmem:[#allocation4 + $0x1cc] sm:$0xf0]  ;;  %2457 = vmatpush.bf16.msra.mxu2 %v4115_v8  ;;  %v3843_v16 = vor.u32 %v5598_v13, %v3842_v11 }
  0x25   :  { %v3971_v17 = vor.u32 %v5630_v15, %v3970_v14  ;;  %v4098_v18 = vld [vmem:[#allocation4 + $0x2c0] sm:$0xf]  ;;  %v5662_v19 = vld [vmem:[#allocation4 + $0x2cc] sm:$0xf0]  ;;  %2470 = vmatpush.bf16.msra.mxu3 %v4243_v12 }
  0x26   :  { %v4226_v20 = vld [vmem:[#allocation4 + $0x3c0] sm:$0xf]  ;;  %v4099_v21 = vor.u32 %v5662_v19, %v4098_v18  ;;  %v5694_v22 = vld [vmem:[#allocation4 + $0x3cc] sm:$0xf0]  ;;  %2432 = vmatpush.bf16.msra.mxu0 %v3843_v16 }
  0x27   :  { %v3826_v23 = vld [vmem:[#allocation4 + $0xa0] sm:$0xf]  ;;  %v5594_v24 = vld [vmem:[#allocation4 + $0xac] sm:$0xf0]  ;;  %v4227_v25 = vor.u32 %v5694_v22, %v4226_v20  ;;  %2445 = vmatpush.bf16.msra.mxu1 %v3971_v17 }
  0x28   :  { %v3954_v26 = vld [vmem:[#allocation4 + $0x1a0] sm:$0xf]  ;;  %v5626_v27 = vld [vmem:[#allocation4 + $0x1ac] sm:$0xf0]  ;;  %v3827_v29 = vor.u32 %v5594_v24, %v3826_v23  ;;  %2458 = vmatpush.bf16.msra.mxu2 %v4099_v21 }
  0x29   :  { %v4082_v28 = vld [vmem:[#allocation4 + $0x2a0] sm:$0xf]  ;;  %v5658_v30 = vld [vmem:[#allocation4 + $0x2ac] sm:$0xf0]  ;;  %v3955_v33 = vor.u32 %v5626_v27, %v3954_v26  ;;  %2471 = vmatpush.bf16.msra.mxu3 %v4227_v25 }
  0x2a   :  { %v4210_v31 = vld [vmem:[#allocation4 + $0x3a0] sm:$0xf]  ;;  %v5690_v32 = vld [vmem:[#allocation4 + $0x3ac] sm:$0xf0]  ;;  %v4083_v34 = vor.u32 %v5658_v30, %v4082_v28  ;;  %2433 = vmatpush.bf16.msra.mxu0 %v3827_v29 }
  0x2b   :  { %v3810_v35 = vld [vmem:[#allocation4 + $0x80] sm:$0xf]  ;;  %v5590_v36 = vld [vmem:[#allocation4 + $0x8c] sm:$0xf0]  ;;  %v4211_v38 = vor.u32 %v5690_v32, %v4210_v31  ;;  %2446 = vmatpush.bf16.msra.mxu1 %v3955_v33 }
  0x2c   :  { %v3938_v37 = vld [vmem:[#allocation4 + $0x180] sm:$0xf]  ;;  %v5622_v39 = vld [vmem:[#allocation4 + $0x18c] sm:$0xf0]  ;;  %v3811_v44 = vor.u32 %v5590_v36, %v3810_v35  ;;  %2459 = vmatpush.bf16.msra.mxu2 %v4083_v34 }
  0x2d   :  { %v4066_v40 = vld [vmem:[#allocation4 + $0x280] sm:$0xf]  ;;  %v5654_v41 = vld [vmem:[#allocation4 + $0x28c] sm:$0xf0]  ;;  %v3939_v45 = vor.u32 %v5622_v39, %v3938_v37  ;;  %2472 = vmatpush.bf16.msra.mxu3 %v4211_v38 }
  0x2e   :  { %v4194_v42 = vld [vmem:[#allocation4 + $0x380] sm:$0xf]  ;;  %v5686_v43 = vld [vmem:[#allocation4 + $0x38c] sm:$0xf0]  ;;  %v4067_v46 = vor.u32 %v5654_v41, %v4066_v40  ;;  %2434 = vmatpush.bf16.msra.mxu0 %v3811_v44 }
  0x2f   :  { %v3794_v47 = vld [vmem:[#allocation4 + $0x60] sm:$0xf]  ;;  %v5586_v48 = vld [vmem:[#allocation4 + $0x6c] sm:$0xf0]  ;;  %v4195_v50 = vor.u32 %v5686_v43, %v4194_v42  ;;  %2447 = vmatpush.bf16.msra.mxu1 %v3939_v45 }
  0x30   :  { %v3922_v49 = vld [vmem:[#allocation4 + $0x160] sm:$0xf]  ;;  %v5618_v51 = vld [vmem:[#allocation4 + $0x16c] sm:$0xf0]  ;;  %v3795_v56 = vor.u32 %v5586_v48, %v3794_v47  ;;  %2460 = vmatpush.bf16.msra.mxu2 %v4067_v46 }
  0x31   :  { %v4050_v52 = vld [vmem:[#allocation4 + $0x260] sm:$0xf]  ;;  %v5650_v53 = vld [vmem:[#allocation4 + $0x26c] sm:$0xf0]  ;;  %v3923_v57 = vor.u32 %v5618_v51, %v3922_v49  ;;  %2473 = vmatpush.bf16.msra.mxu3 %v4195_v50 }
  0x32   :  { %v4178_v54 = vld [vmem:[#allocation4 + $0x360] sm:$0xf]  ;;  %v5682_v55 = vld [vmem:[#allocation4 + $0x36c] sm:$0xf0]  ;;  %v4051_v58 = vor.u32 %v5650_v53, %v4050_v52  ;;  %2435 = vmatpush.bf16.msra.mxu0 %v3795_v56 }
  0x33   :  { %v3778_v59 = vld [vmem:[#allocation4 + $0x40] sm:$0xf]  ;;  %v5582_v60 = vld [vmem:[#allocation4 + $0x4c] sm:$0xf0]  ;;  %v4179_v62 = vor.u32 %v5682_v55, %v4178_v54  ;;  %2448 = vmatpush.bf16.msra.mxu1 %v3923_v57 }
  0x34   :  { %v3906_v61 = vld [vmem:[#allocation4 + $0x140] sm:$0xf]  ;;  %v5614_v63 = vld [vmem:[#allocation4 + $0x14c] sm:$0xf0]  ;;  %v3779_v4 = vor.u32 %v5582_v60, %v3778_v59  ;;  %2461 = vmatpush.bf16.msra.mxu2 %v4051_v58 }
  0x35   :  { %v4034_v0 = vld [vmem:[#allocation4 + $0x240] sm:$0xf]  ;;  %v5646_v1 = vld [vmem:[#allocation4 + $0x24c] sm:$0xf0]  ;;  %v3907_v5 = vor.u32 %v5614_v63, %v3906_v61  ;;  %2474 = vmatpush.bf16.msra.mxu3 %v4179_v62 }
  0x36   :  { %v4162_v2 = vld [vmem:[#allocation4 + $0x340] sm:$0xf]  ;;  %v5678_v3 = vld [vmem:[#allocation4 + $0x34c] sm:$0xf0]  ;;  %v4035_v6 = vor.u32 %v5646_v1, %v4034_v0  ;;  %2436 = vmatpush.bf16.msra.mxu0 %v3779_v4 }
  0x37   :  { %v3762_v7 = vld [vmem:[#allocation4 + $0x20] sm:$0xf]  ;;  %v5578_v8 = vld [vmem:[#allocation4 + $0x2c] sm:$0xf0]  ;;  %v4163_v10 = vor.u32 %v5678_v3, %v4162_v2  ;;  %2449 = vmatpush.bf16.msra.mxu1 %v3907_v5 }
  0x38   :  { %v3890_v9 = vld [vmem:[#allocation4 + $0x120] sm:$0xf]  ;;  %v5610_v11 = vld [vmem:[#allocation4 + $0x12c] sm:$0xf0]  ;;  %v3763_v16 = vor.u32 %v5578_v8, %v3762_v7  ;;  %2462 = vmatpush.bf16.msra.mxu2 %v4035_v6 }
  0x39   :  { %v4018_v12 = vld [vmem:[#allocation4 + $0x220] sm:$0xf]  ;;  %v5642_v13 = vld [vmem:[#allocation4 + $0x22c] sm:$0xf0]  ;;  %v3891_v19 = vor.u32 %v5610_v11, %v3890_v9  ;;  %2475 = vmatpush.bf16.msra.mxu3 %v4163_v10  ;;  %v131_v10 = vld [vmem:[#allocation2 + $0x18] sm:$0xff] }
  0x3a   :  { %v4146_v14 = vld [vmem:[#allocation4 + $0x320] sm:$0xf]  ;;  %v5674_v15 = vld [vmem:[#allocation4 + $0x32c] sm:$0xf0]  ;;  %v4019_v20 = vor.u32 %v5642_v13, %v4018_v12  ;;  %2437 = vmatpush.bf16.msra.mxu0 %v3763_v16  ;;  %v129_v11 = vld [vmem:[#allocation2 + $0x8] sm:$0xff]  ;;  %v6298_v16 = vpack.c.bf16 %v131_v10, %v131_v10 }
  0x3b   :  { %v3746_v17 = vld [vmem:[#allocation4] sm:$0xf]  ;;  %v5574_v18 = vld [vmem:[#allocation4 + $0xc] sm:$0xf0]  ;;  %v4147_v24 = vor.u32 %v5674_v15, %v4146_v14  ;;  %2450 = vmatpush.bf16.msra.mxu1 %v3891_v19 }
  0x3c   :  { %v3874_v21 = vld [vmem:[#allocation4 + $0x100] sm:$0xf]  ;;  %v5606_v22 = vld [vmem:[#allocation4 + $0x10c] sm:$0xf0]  ;;  %v3747_v31 = vor.u32 %v5574_v18, %v3746_v17  ;;  %2463 = vmatpush.bf16.msra.mxu2 %v4019_v20  ;;  %v6300_v17 = vpack.c.bf16 %v129_v11, %v129_v11 }
  0x3d   :  { %v4002_v23 = vld [vmem:[#allocation4 + $0x200] sm:$0xf]  ;;  %v5638_v25 = vld [vmem:[#allocation4 + $0x20c] sm:$0xf0]  ;;  %v3875_v35 = vor.u32 %v5606_v22, %v3874_v21  ;;  %2476 = vmatpush.bf16.msra.mxu3 %v4147_v24 }
  0x3e   :  { %v4130_v26 = vld [vmem:[#allocation4 + $0x300] sm:$0xf]  ;;  %v5670_v27 = vld [vmem:[#allocation4 + $0x30c] sm:$0xf0]  ;;  %v4003_v36 = vor.u32 %v5638_v25, %v4002_v23  ;;  %2438 = vmatpush.bf16.msra.mxu0 %v3747_v31 }
  0x3f   :  { %v4370_v28 = vld [vmem:[#allocation4 + $0x4e0] sm:$0xf]  ;;  %v5730_v29 = vld [vmem:[#allocation4 + $0x4ec] sm:$0xf0]  ;;  %v4131_v39 = vor.u32 %v5670_v27, %v4130_v26  ;;  %2451 = vmatpush.bf16.msra.mxu1 %v3875_v35 }
  0x40   :  { %v4498_v30 = vld [vmem:[#allocation4 + $0x5e0] sm:$0xf]  ;;  %v5762_v32 = vld [vmem:[#allocation4 + $0x5ec] sm:$0xf0]  ;;  %v4371_v40 = vor.u32 %v5730_v29, %v4370_v28  ;;  %2464 = vmatpush.bf16.msra.mxu2 %v4003_v36 }
  0x41   :  { %v4626_v33 = vld [vmem:[#allocation4 + $0x6e0] sm:$0xf]  ;;  %v5794_v34 = vld [vmem:[#allocation4 + $0x6ec] sm:$0xf0]  ;;  %v4499_v41 = vor.u32 %v5762_v32, %v4498_v30  ;;  %2477 = vmatpush.bf16.msra.mxu3 %v4131_v39 }
  0x42   :  { %v4754_v37 = vld [vmem:[#allocation4 + $0x7e0] sm:$0xf]  ;;  %v5826_v38 = vld [vmem:[#allocation4 + $0x7ec] sm:$0xf0]  ;;  %v4627_v42 = vor.u32 %v5794_v34, %v4626_v33  ;;  %2483 = vmatpush.bf16.msrb.mxu0 %v4371_v40  ;;  %2452 = vmatmul.bf16.vlgmr.msra.gmra.mxu1 %v6300_v17 }
  0x43   :  { %v4354_v43 = vld [vmem:[#allocation4 + $0x4c0] sm:$0xf]  ;;  %v5726_v44 = vld [vmem:[#allocation4 + $0x4cc] sm:$0xf0]  ;;  %v4755_v46 = vor.u32 %v5826_v38, %v4754_v37  ;;  %2496 = vmatpush.bf16.msrb.mxu1 %v4499_v41 }
  0x44   :  { %v4482_v45 = vld [vmem:[#allocation4 + $0x5c0] sm:$0xf]  ;;  %v5758_v47 = vld [vmem:[#allocation4 + $0x5cc] sm:$0xf0]  ;;  %v4355_v52 = vor.u32 %v5726_v44, %v4354_v43  ;;  %2509 = vmatpush.bf16.msrb.mxu2 %v4627_v42  ;;  %2478 = vmatmul.bf16.vlgmr.msra.gmra.mxu3 %v6298_v16 }
  0x45   :  { %v4610_v48 = vld [vmem:[#allocation4 + $0x6c0] sm:$0xf]  ;;  %v5790_v49 = vld [vmem:[#allocation4 + $0x6cc] sm:$0xf0]  ;;  %v4483_v54 = vor.u32 %v5758_v47, %v4482_v45  ;;  %2522 = vmatpush.bf16.msrb.mxu3 %v4755_v46 }
  0x46   :  { %v4738_v50 = vld [vmem:[#allocation4 + $0x7c0] sm:$0xf]  ;;  %v5822_v51 = vld [vmem:[#allocation4 + $0x7cc] sm:$0xf0]  ;;  %v4611_v55 = vor.u32 %v5790_v49, %v4610_v48  ;;  %2484 = vmatpush.bf16.msrb.mxu0 %v4355_v52 }
  0x47   :  { %v4338_v53 = vld [vmem:[#allocation4 + $0x4a0] sm:$0xf]  ;;  %v5722_v56 = vld [vmem:[#allocation4 + $0x4ac] sm:$0xf0]  ;;  %v4739_v59 = vor.u32 %v5822_v51, %v4738_v50  ;;  %2497 = vmatpush.bf16.msrb.mxu1 %v4483_v54 }
  0x48   :  { %v4466_v57 = vld [vmem:[#allocation4 + $0x5a0] sm:$0xf]  ;;  %v130_v58 = vld [vmem:[#allocation2 + $0x10] sm:$0xff]  ;;  %v4339_v2 = vor.u32 %v5722_v56, %v4338_v53  ;;  %2510 = vmatpush.bf16.msrb.mxu2 %v4611_v55 }
  0x49   :  { %v5754_v60 = vld [vmem:[#allocation4 + $0x5ac] sm:$0xf0]  ;;  %v4594_v61 = vld [vmem:[#allocation4 + $0x6a0] sm:$0xf]  ;;  %v6293_v63 = vpack.c.bf16 %v130_v58, %v130_v58  ;;  %2523 = vmatpush.bf16.msrb.mxu3 %v4739_v59 }
  0x4a   :  { %v5786_v62 = vld [vmem:[#allocation4 + $0x6ac] sm:$0xf0]  ;;  %v4722_v0 = vld [vmem:[#allocation4 + $0x7a0] sm:$0xf]  ;;  %v4467_v6 = vor.u32 %v5754_v60, %v4466_v57  ;;  %2485 = vmatpush.bf16.msrb.mxu0 %v4339_v2 }
  0x4b   :  { %v5818_v1 = vld [vmem:[#allocation4 + $0x7ac] sm:$0xf0]  ;;  %v4322_v3 = vld [vmem:[#allocation4 + $0x480] sm:$0xf]  ;;  %2465 = vmatmul.bf16.vlgmr.msra.gmra.mxu2 %v6293_v63  ;;  %v4595_v7 = vor.u32 %v5786_v62, %v4594_v61 }
  0x4c   :  { %v5718_v4 = vld [vmem:[#allocation4 + $0x48c] sm:$0xf0]  ;;  %v128_v5 = vld [vmem:[#allocation2] sm:$0xff]  ;;  %v4723_v12 = vor.u32 %v5818_v1, %v4722_v0  ;;  %2498 = vmatpush.bf16.msrb.mxu1 %v4467_v6 }
  0x4d   :  { %v4450_v8 = vld [vmem:[#allocation4 + $0x580] sm:$0xf]  ;;  %v6296_v9 = vpack.c.bf16 %v128_v5, %v128_v5  ;;  %v5750_v13 = vld [vmem:[#allocation4 + $0x58c] sm:$0xf0]  ;;  %v4323_v20 = vor.u32 %v5718_v4, %v4322_v3  ;;  %2511 = vmatpush.bf16.msrb.mxu2 %v4595_v7 }
  0x4e   :  { %v4578_v14 = vld [vmem:[#allocation4 + $0x680] sm:$0xf]  ;;  %v5782_v15 = vld [vmem:[#allocation4 + $0x68c] sm:$0xf0]  ;;  %v4451_v21 = vor.u32 %v5750_v13, %v4450_v8  ;;  %2524 = vmatpush.bf16.msrb.mxu3 %v4723_v12 }
  0x4f   :  { %v4706_v18 = vld [vmem:[#allocation4 + $0x780] sm:$0xf]  ;;  %v5814_v19 = vld [vmem:[#allocation4 + $0x78c] sm:$0xf0]  ;;  %2439 = vmatmul.bf16.vlgmr.msra.gmra.mxu0 %v6296_v9  ;;  %v4579_v22 = vor.u32 %v5782_v15, %v4578_v14 }
  0x50   :  { %v4306_v23 = vld [vmem:[#allocation4 + $0x460] sm:$0xf]  ;;  %v5714_v24 = vld [vmem:[#allocation4 + $0x46c] sm:$0xf0]  ;;  %v4707_v26 = vor.u32 %v5814_v19, %v4706_v18  ;;  %2486 = vmatpush.bf16.msrb.mxu0 %v4323_v20  ;;  %2499 = vmatpush.bf16.msrb.mxu1 %v4451_v21 }
  0x51   :  { %v4434_v25 = vld [vmem:[#allocation4 + $0x560] sm:$0xf]  ;;  %v5746_v27 = vld [vmem:[#allocation4 + $0x56c] sm:$0xf0]  ;;  %v4307_v32 = vor.u32 %v5714_v24, %v4306_v23  ;;  %2512 = vmatpush.bf16.msrb.mxu2 %v4579_v22 }
  0x52   :  { %v4562_v28 = vld [vmem:[#allocation4 + $0x660] sm:$0xf]  ;;  %v5778_v29 = vld [vmem:[#allocation4 + $0x66c] sm:$0xf0]  ;;  %v4435_v33 = vor.u32 %v5746_v27, %v4434_v25  ;;  %2525 = vmatpush.bf16.msrb.mxu3 %v4707_v26  ;;  %v135_v25 = vld [vmem:[#allocation2 + $0x38] sm:$0xff] }
  0x53   :  { %v4690_v30 = vld [vmem:[#allocation4 + $0x760] sm:$0xf]  ;;  %v5810_v31 = vld [vmem:[#allocation4 + $0x76c] sm:$0xf0]  ;;  %v4563_v34 = vor.u32 %v5778_v29, %v4562_v28 }
  0x54   :  { %v4290_v35 = vld [vmem:[#allocation4 + $0x440] sm:$0xf]  ;;  %v5710_v36 = vld [vmem:[#allocation4 + $0x44c] sm:$0xf0]  ;;  %v4691_v38 = vor.u32 %v5810_v31, %v4690_v30  ;;  %2487 = vmatpush.bf16.msrb.mxu0 %v4307_v32  ;;  %2500 = vmatpush.bf16.msrb.mxu1 %v4435_v33  ;;  %v133_v30 = vld [vmem:[#allocation2 + $0x28] sm:$0xff] }
  0x55   :  { %v4418_v37 = vld [vmem:[#allocation4 + $0x540] sm:$0xf]  ;;  %v5742_v39 = vld [vmem:[#allocation4 + $0x54c] sm:$0xf0]  ;;  %v4291_v44 = vor.u32 %v5710_v36, %v4290_v35  ;;  %2513 = vmatpush.bf16.msrb.mxu2 %v4563_v34 }
  0x56   :  { %v4546_v40 = vld [vmem:[#allocation4 + $0x640] sm:$0xf]  ;;  %v5774_v41 = vld [vmem:[#allocation4 + $0x64c] sm:$0xf0]  ;;  %v4419_v45 = vor.u32 %v5742_v39, %v4418_v37  ;;  %2526 = vmatpush.bf16.msrb.mxu3 %v4691_v38  ;;  %v6310_v39 = vpack.c.bf16 %v135_v25, %v135_v25 }
  0x57   :  { %v4674_v42 = vld [vmem:[#allocation4 + $0x740] sm:$0xf]  ;;  %v5806_v43 = vld [vmem:[#allocation4 + $0x74c] sm:$0xf0]  ;;  %v4547_v46 = vor.u32 %v5774_v41, %v4546_v40  ;;  %v6312_v41 = vpack.c.bf16 %v133_v30, %v133_v30  ;;  %v5600_v30 = vld [vmem:[#allocation4 + $0xe4] sm:$0xf] }
  0x58   :  { %v4274_v47 = vld [vmem:[#allocation4 + $0x420] sm:$0xf]  ;;  %v5706_v48 = vld [vmem:[#allocation4 + $0x42c] sm:$0xf0]  ;;  %v4675_v50 = vor.u32 %v5806_v43, %v4674_v42  ;;  %2488 = vmatpush.bf16.msrb.mxu0 %v4291_v44  ;;  %2501 = vmatpush.bf16.msrb.mxu1 %v4419_v45 }
  0x59   :  { %v4402_v49 = vld [vmem:[#allocation4 + $0x520] sm:$0xf]  ;;  %v5738_v51 = vld [vmem:[#allocation4 + $0x52c] sm:$0xf0]  ;;  %v4275_v57 = vor.u32 %v5706_v48, %v4274_v47  ;;  %2514 = vmatpush.bf16.msrb.mxu2 %v4547_v46 }
  0x5a   :  { %v4530_v52 = vld [vmem:[#allocation4 + $0x620] sm:$0xf]  ;;  %v5770_v53 = vld [vmem:[#allocation4 + $0x62c] sm:$0xf0]  ;;  %v4403_v61 = vor.u32 %v5738_v51, %v4402_v49  ;;  %2527 = vmatpush.bf16.msrb.mxu3 %v4675_v50 }
  0x5b   :  { %v4658_v54 = vld [vmem:[#allocation4 + $0x720] sm:$0xf]  ;;  %v5802_v55 = vld [vmem:[#allocation4 + $0x72c] sm:$0xf0]  ;;  %v4531_v62 = vor.u32 %v5770_v53, %v4530_v52 }
  0x5c   :  { %v4258_v56 = vld [vmem:[#allocation4 + $0x400] sm:$0xf]  ;;  %v5702_v58 = vld [vmem:[#allocation4 + $0x40c] sm:$0xf0]  ;;  %v4659_v3 = vor.u32 %v5802_v55, %v4658_v54  ;;  %2489 = vmatpush.bf16.msrb.mxu0 %v4275_v57  ;;  %2502 = vmatpush.bf16.msrb.mxu1 %v4403_v61 }
  0x5d   :  { %v4386_v59 = vld [vmem:[#allocation4 + $0x500] sm:$0xf]  ;;  %v5734_v60 = vld [vmem:[#allocation4 + $0x50c] sm:$0xf0]  ;;  %v4259_v11 = vor.u32 %v5702_v58, %v4258_v56  ;;  %2515 = vmatpush.bf16.msrb.mxu2 %v4531_v62 }
  0x5e   :  { %v4514_v0 = vld [vmem:[#allocation4 + $0x600] sm:$0xf]  ;;  %v5766_v1 = vld [vmem:[#allocation4 + $0x60c] sm:$0xf0]  ;;  %v4387_v15 = vor.u32 %v5734_v60, %v4386_v59  ;;  %2528 = vmatpush.bf16.msrb.mxu3 %v4659_v3 }
  0x5f   :  { %v4642_v2 = vld [vmem:[#allocation4 + $0x700] sm:$0xf]  ;;  %v5798_v4 = vld [vmem:[#allocation4 + $0x70c] sm:$0xf0]  ;;  %v4515_v18 = vor.u32 %v5766_v1, %v4514_v0 }
  0x60   :  { %v5234_v5 = vld [vmem:[#allocation4 + $0xba0] sm:$0xf]  ;;  %v5946_v6 = vld [vmem:[#allocation4 + $0xbac] sm:$0x30]  ;;  %v4643_v21 = vor.u32 %v5798_v4, %v4642_v2  ;;  %2490 = vmatpush.bf16.msrb.mxu0 %v4259_v11  ;;  %2503 = vmatpush.bf16.msrb.mxu1 %v4387_v15 }
  0x61   :  { %v4882_v7 = vld [vmem:[#allocation4 + $0x8e0] sm:$0xf]  ;;  %v5858_v8 = vld [vmem:[#allocation4 + $0x8ec] sm:$0xf0]  ;;  %v5235_v19 = vor.u32 %v5946_v6, %v5234_v5  ;;  %2516 = vmatpush.bf16.msrb.mxu2 %v4515_v18 }
  0x62   :  { %v5010_v10 = vld [vmem:[#allocation4 + $0x9e0] sm:$0xf]  ;;  %v5890_v12 = vld [vmem:[#allocation4 + $0x9ec] sm:$0xf0]  ;;  %v4883_v22 = vor.u32 %v5858_v8, %v4882_v7  ;;  %2529 = vmatpush.bf16.msrb.mxu3 %v4643_v21 }
  0x63   :  { %v5138_v13 = vld [vmem:[#allocation4 + $0xae0] sm:$0xf]  ;;  %v5922_v14 = vld [vmem:[#allocation4 + $0xaec] sm:$0xf0]  ;;  %v5011_v26 = vor.u32 %v5890_v12, %v5010_v10  ;;  %v2420_v35 = vsel %vm2418_vm0, %v5235_v19, 0  ;;  %2504 = vmatmul.bf16.vlgmr.msrb.gmra.mxu1 %v6312_v41 }
  0x64   :  { %v134_v20 = vld [vmem:[#allocation2 + $0x30] sm:$0xff]  ;;  %v4866_v23 = vld [vmem:[#allocation4 + $0x8c0] sm:$0xf]  ;;  %v5139_v27 = vor.u32 %v5922_v14, %v5138_v13  ;;  %2535 = vmatpush.bf16.msra.mxu0 %v4883_v22 }
  0x65   :  { %v132_v24 = vld [vmem:[#allocation2 + $0x20] sm:$0xff]  ;;  %v5854_v28 = vld [vmem:[#allocation4 + $0x8cc] sm:$0xf0]  ;;  %v6305_v34 = vpack.c.bf16 %v134_v20, %v134_v20  ;;  %2548 = vmatpush.bf16.msra.mxu1 %v5011_v26  ;;  %2530 = vmatmul.bf16.vlgmr.msrb.gmra.mxu3 %v6310_v39 }
  0x66   :  { %v4994_v29 = vld [vmem:[#allocation4 + $0x9c0] sm:$0xf]  ;;  %v5886_v31 = vld [vmem:[#allocation4 + $0x9cc] sm:$0xf0]  ;;  %v6308_v38 = vpack.c.bf16 %v132_v24, %v132_v24  ;;  %v4867_v40 = vor.u32 %v5854_v28, %v4866_v23  ;;  %2561 = vmatpush.bf16.msra.mxu2 %v5139_v27  ;;  %2576 = vmatpush.bf16.msra.mxu3 %v2420_v35 }
  0x67   :  { %v5122_v32 = vld [vmem:[#allocation4 + $0xac0] sm:$0xf]  ;;  %v5918_v33 = vld [vmem:[#allocation4 + $0xacc] sm:$0xf0]  ;;  %v4995_v42 = vor.u32 %v5886_v31, %v4994_v29  ;;  %2517 = vmatmul.bf16.vlgmr.msrb.gmra.mxu2 %v6305_v34  ;;  %v3860_v31 = vld [vmem:[#allocation4 + $0xf0] sm:$0xf0] }
  0x68   :  { %v5218_v36 = vld [vmem:[#allocation4 + $0xb80] sm:$0xf]  ;;  %v5942_v37 = vld [vmem:[#allocation4 + $0xb8c] sm:$0xf0]  ;;  %v5123_v43 = vor.u32 %v5918_v33, %v5122_v32  ;;  %2491 = vmatmul.bf16.vlgmr.msrb.gmra.mxu0 %v6308_v38 }
  0x69   :  { %v4850_v44 = vld [vmem:[#allocation4 + $0x8a0] sm:$0xf]  ;;  %v5850_v45 = vld [vmem:[#allocation4 + $0x8ac] sm:$0xf0]  ;;  %v5219_v47 = vor.u32 %v5942_v37, %v5218_v36  ;;  %2536 = vmatpush.bf16.msra.mxu0 %v4867_v40  ;;  %2549 = vmatpush.bf16.msra.mxu1 %v4995_v42 }
  0x6a   :  { %v4978_v46 = vld [vmem:[#allocation4 + $0x9a0] sm:$0xf]  ;;  %v5882_v48 = vld [vmem:[#allocation4 + $0x9ac] sm:$0xf0]  ;;  %v4851_v53 = vor.u32 %v5850_v45, %v4850_v44  ;;  %2562 = vmatpush.bf16.msra.mxu2 %v5123_v43  ;;  %v3863_v45 = vor.u32 %v5600_v30, %v3860_v31  ;;  %v5584_v31 = vld [vmem:[#allocation4 + $0x64] sm:$0xf] }
  0x6b   :  { %v5106_v49 = vld [vmem:[#allocation4 + $0xaa0] sm:$0xf]  ;;  %v5914_v50 = vld [vmem:[#allocation4 + $0xaac] sm:$0xf0]  ;;  %v4979_v54 = vor.u32 %v5882_v48, %v4978_v46  ;;  %2577 = vmatpush.bf16.msra.mxu3 %v5219_v47  ;;  %v5596_v46 = vld [vmem:[#allocation4 + $0xc4] sm:$0xf] }
  0x6c   :  { %v5202_v51 = vld [vmem:[#allocation4 + $0xb60] sm:$0xf]  ;;  %v5938_v52 = vld [vmem:[#allocation4 + $0xb6c] sm:$0xf0]  ;;  %v5107_v55 = vor.u32 %v5914_v50, %v5106_v49  ;;  %v3844_v47 = vld [vmem:[#allocation4 + $0xd0] sm:$0xf0] }
  0x6d   :  { %v4834_v56 = vld [vmem:[#allocation4 + $0x880] sm:$0xf]  ;;  %v5846_v57 = vld [vmem:[#allocation4 + $0x88c] sm:$0xf0]  ;;  %v5203_v59 = vor.u32 %v5938_v52, %v5202_v51  ;;  %2537 = vmatpush.bf16.msra.mxu0 %v4851_v53  ;;  %2550 = vmatpush.bf16.msra.mxu1 %v4979_v54  ;;  %v139_v48 = vld [vmem:[#allocation2 + $0x58] sm:$0xff] }
  0x6e   :  { %v4962_v58 = vld [vmem:[#allocation4 + $0x980] sm:$0xf]  ;;  %v5878_v60 = vld [vmem:[#allocation4 + $0x98c] sm:$0xf0]  ;;  %v4835_v2 = vor.u32 %v5846_v57, %v4834_v56  ;;  %2563 = vmatpush.bf16.msra.mxu2 %v5107_v55 }
  0x6f   :  { %v5090_v61 = vld [vmem:[#allocation4 + $0xa80] sm:$0xf]  ;;  %v5910_v62 = vld [vmem:[#allocation4 + $0xa8c] sm:$0xf0]  ;;  %v4963_v3 = vor.u32 %v5878_v60, %v4962_v58  ;;  %2578 = vmatpush.bf16.msra.mxu3 %v5203_v59  ;;  %v5592_v58 = vld [vmem:[#allocation4 + $0xa4] sm:$0xf] }
  0x70   :  { %v5186_v0 = vld [vmem:[#allocation4 + $0xb40] sm:$0xf]  ;;  %v5934_v1 = vld [vmem:[#allocation4 + $0xb4c] sm:$0xf0]  ;;  %v5091_v4 = vor.u32 %v5910_v62, %v5090_v61  ;;  %v5632_v59 = vld [vmem:[#allocation4 + $0x1e4] sm:$0xf]  ;;  %v6318_v61 = vpack.c.bf16 %v139_v48, %v139_v48  ;;  %v3847_v62 = vor.u32 %v5596_v46, %v3844_v47 }
  0x71   :  { %v4818_v5 = vld [vmem:[#allocation4 + $0x860] sm:$0xf]  ;;  %v5842_v6 = vld [vmem:[#allocation4 + $0x86c] sm:$0xf0]  ;;  %v5187_v8 = vor.u32 %v5934_v1, %v5186_v0  ;;  %2538 = vmatpush.bf16.msra.mxu0 %v4835_v2  ;;  %2551 = vmatpush.bf16.msra.mxu1 %v4963_v3  ;;  %v3988_v60 = vld [vmem:[#allocation4 + $0x1f0] sm:$0xf0] }
  0x72   :  { %v4946_v7 = vld [vmem:[#allocation4 + $0x960] sm:$0xf]  ;;  %v5874_v10 = vld [vmem:[#allocation4 + $0x96c] sm:$0xf0]  ;;  %v4819_v15 = vor.u32 %v5842_v6, %v4818_v5  ;;  %2564 = vmatpush.bf16.msra.mxu2 %v5091_v4  ;;  %v5664_v0 = vld [vmem:[#allocation4 + $0x2e4] sm:$0xf] }
  0x73   :  { %v5074_v11 = vld [vmem:[#allocation4 + $0xa60] sm:$0xf]  ;;  %v5906_v12 = vld [vmem:[#allocation4 + $0xa6c] sm:$0xf0]  ;;  %v4947_v18 = vor.u32 %v5874_v10, %v4946_v7  ;;  %2579 = vmatpush.bf16.msra.mxu3 %v5187_v8  ;;  %v4116_v1 = vld [vmem:[#allocation4 + $0x2f0] sm:$0xf0] }
  0x74   :  { %v5170_v13 = vld [vmem:[#allocation4 + $0xb20] sm:$0xf]  ;;  %v5930_v14 = vld [vmem:[#allocation4 + $0xb2c] sm:$0xf0]  ;;  %v5075_v19 = vor.u32 %v5906_v12, %v5074_v11  ;;  %v3828_v3 = vld [vmem:[#allocation4 + $0xb0] sm:$0xf0]  ;;  %v3991_v11 = vor.u32 %v5632_v59, %v3988_v60  ;;  %v4119_v12 = vor.u32 %v5664_v0, %v4116_v1 }
  0x75   :  { %v4802_v20 = vld [vmem:[#allocation4 + $0x840] sm:$0xf]  ;;  %v5838_v21 = vld [vmem:[#allocation4 + $0x84c] sm:$0xf0]  ;;  %v5171_v23 = vor.u32 %v5930_v14, %v5170_v13  ;;  %2539 = vmatpush.bf16.msra.mxu0 %v4819_v15  ;;  %2552 = vmatpush.bf16.msra.mxu1 %v4947_v18  ;;  %v5696_v4 = vld [vmem:[#allocation4 + $0x3e4] sm:$0xf]  ;;  %v3831_v18 = vor.u32 %v5592_v58, %v3828_v3 }
  0x76   :  { %v4930_v22 = vld [vmem:[#allocation4 + $0x940] sm:$0xf]  ;;  %v5870_v24 = vld [vmem:[#allocation4 + $0x94c] sm:$0xf0]  ;;  %v4803_v29 = vor.u32 %v5838_v21, %v4802_v20  ;;  %2565 = vmatpush.bf16.msra.mxu2 %v5075_v19  ;;  %v4244_v5 = vld [vmem:[#allocation4 + $0x3f0] sm:$0xf0] }
  0x77   :  { %v5058_v25 = vld [vmem:[#allocation4 + $0xa40] sm:$0xf]  ;;  %v5902_v26 = vld [vmem:[#allocation4 + $0xa4c] sm:$0xf0]  ;;  %v4931_v32 = vor.u32 %v5870_v24, %v4930_v22  ;;  %2580 = vmatpush.bf16.msra.mxu3 %v5171_v23  ;;  %v137_v13 = vld [vmem:[#allocation2 + $0x48] sm:$0xff]  ;;  %v4247_v19 = vor.u32 %v5696_v4, %v4244_v5 }
  0x78   :  { %v5154_v27 = vld [vmem:[#allocation4 + $0xb00] sm:$0xf]  ;;  %v5926_v28 = vld [vmem:[#allocation4 + $0xb0c] sm:$0xf0]  ;;  %v5059_v33 = vor.u32 %v5902_v26, %v5058_v25  ;;  %v5588_v14 = vld [vmem:[#allocation4 + $0x84] sm:$0xf] }
  0x79   :  { %v4786_v35 = vld [vmem:[#allocation4 + $0x820] sm:$0xf]  ;;  %v5834_v36 = vld [vmem:[#allocation4 + $0x82c] sm:$0xf0]  ;;  %v5155_v40 = vor.u32 %v5926_v28, %v5154_v27  ;;  %2540 = vmatpush.bf16.msra.mxu0 %v4803_v29  ;;  %2553 = vmatpush.bf16.msra.mxu1 %v4931_v32  ;;  %v5628_v15 = vld [vmem:[#allocation4 + $0x1c4] sm:$0xf]  ;;  %v6326_v28 = vpack.c.bf16 %v137_v13, %v137_v13 }
  0x7a   :  { %v4914_v37 = vld [vmem:[#allocation4 + $0x920] sm:$0xf]  ;;  %v5866_v42 = vld [vmem:[#allocation4 + $0x92c] sm:$0xf0]  ;;  %v4787_v49 = vor.u32 %v5834_v36, %v4786_v35  ;;  %2566 = vmatpush.bf16.msra.mxu2 %v5059_v33  ;;  %v3972_v20 = vld [vmem:[#allocation4 + $0x1d0] sm:$0xf0] }
  0x7b   :  { %v5042_v43 = vld [vmem:[#allocation4 + $0xa20] sm:$0xf]  ;;  %v5898_v44 = vld [vmem:[#allocation4 + $0xa2c] sm:$0xf0]  ;;  %v4915_v53 = vor.u32 %v5866_v42, %v4914_v37  ;;  %2581 = vmatpush.bf16.msra.mxu3 %v5155_v40  ;;  %v5660_v21 = vld [vmem:[#allocation4 + $0x2c4] sm:$0xf]  ;;  %v3975_v29 = vor.u32 %v5628_v15, %v3972_v20 }
  0x7c   :  { %v4770_v50 = vld [vmem:[#allocation4 + $0x800] sm:$0xf]  ;;  %v5830_v51 = vld [vmem:[#allocation4 + $0x80c] sm:$0xf0]  ;;  %v5043_v54 = vor.u32 %v5898_v44, %v5042_v43  ;;  %v4100_v22 = vld [vmem:[#allocation4 + $0x2d0] sm:$0xf0] }
  0x7d   :  { %v4898_v52 = vld [vmem:[#allocation4 + $0x900] sm:$0xf]  ;;  %v5862_v55 = vld [vmem:[#allocation4 + $0x90c] sm:$0xf0]  ;;  %2541 = vmatpush.bf16.msra.mxu0 %v4787_v49  ;;  %v4771_v2 = vor.u32 %v5830_v51, %v4770_v50  ;;  %2554 = vmatpush.bf16.msra.mxu1 %v4915_v53  ;;  %v3812_v25 = vld [vmem:[#allocation4 + $0x90] sm:$0xf0]  ;;  %v4103_v30 = vor.u32 %v5660_v21, %v4100_v22 }
  0x7e   :  { %v5026_v56 = vld [vmem:[#allocation4 + $0xa00] sm:$0xf]  ;;  %v5894_v57 = vld [vmem:[#allocation4 + $0xa0c] sm:$0xf0]  ;;  %2567 = vmatpush.bf16.msra.mxu2 %v5043_v54  ;;  %v4899_v6 = vor.u32 %v5862_v55, %v4898_v52  ;;  %5248 = vmatmul.msk.bf16.vlgmr.msra.gmra.mxu3 %vm2414_vm1, %v6318_v61  ;;  %v5692_v26 = vld [vmem:[#allocation4 + $0x3c4] sm:$0xf]  ;;  %v3815_v33 = vor.u32 %v5588_v14, %v3812_v25 }
  0x7f   :  { %2587 = vmatpush.bf16.msrb.mxu3 %v3863_v45  ;;  %v5027_v7 = vor.u32 %v5894_v57, %v5026_v56  ;;  %v136_v8 = vld [vmem:[#allocation2 + $0x40] sm:$0xff]  ;;  %v138_v10 = vld [vmem:[#allocation2 + $0x50] sm:$0xff] }
  0x80   :  { %v6322_v23 = vpack.c.bf16 %v136_v8, %v136_v8  ;;  %v6324_v24 = vpack.c.bf16 %v138_v10, %v138_v10  ;;  %v4228_v27 = vld [vmem:[#allocation4 + $0x3d0] sm:$0xf0]  ;;  %v5624_v32 = vld [vmem:[#allocation4 + $0x1a4] sm:$0xf] }
  0x81   :  { %2542 = vmatpush.bf16.msra.mxu0 %v4771_v2  ;;  %2555 = vmatpush.bf16.msra.mxu1 %v4899_v6  ;;  %v4231_v35 = vor.u32 %v5692_v26, %v4228_v27  ;;  %v3956_v36 = vld [vmem:[#allocation4 + $0x1b0] sm:$0xf0]  ;;  %v5656_v37 = vld [vmem:[#allocation4 + $0x2a4] sm:$0xf] }
  0x82   :  { %2568 = vmatpush.bf16.msra.mxu2 %v5027_v7  ;;  %v4084_v40 = vld [vmem:[#allocation4 + $0x2b0] sm:$0xf0]  ;;  %v5688_v43 = vld [vmem:[#allocation4 + $0x3a4] sm:$0xf]  ;;  %v3959_v45 = vor.u32 %v5624_v32, %v3956_v36 }
  0x83   :  { %2588 = vmatpush.bf16.msrb.mxu3 %v3847_v62  ;;  %v3796_v42 = vld [vmem:[#allocation4 + $0x70] sm:$0xf0]  ;;  %v4087_v46 = vor.u32 %v5656_v37, %v4084_v40  ;;  %v5580_v47 = vld [vmem:[#allocation4 + $0x44] sm:$0xf] }
  0x84   :  { %2543 = vmatmul.bf16.vlgmr.msra.gmra.mxu0 %v6322_v23  ;;  %v4212_v44 = vld [vmem:[#allocation4 + $0x3b0] sm:$0xf0]  ;;  %2556 = vmatmul.bf16.vlgmr.msra.gmra.mxu1 %v6326_v28  ;;  %v5620_v48 = vld [vmem:[#allocation4 + $0x184] sm:$0xf]  ;;  %v3799_v49 = vor.u32 %v5584_v31, %v3796_v42 }
  0x85   :  { %2600 = vmatpush.bf16.msrb.mxu0 %v3991_v11  ;;  %2613 = vmatpush.bf16.msrb.mxu1 %v4119_v12  ;;  %v4215_v50 = vor.u32 %v5688_v43, %v4212_v44  ;;  %v3940_v51 = vld [vmem:[#allocation4 + $0x190] sm:$0xf0]  ;;  %v5652_v52 = vld [vmem:[#allocation4 + $0x284] sm:$0xf] }
  0x86   :  { %2626 = vmatpush.bf16.msrb.mxu2 %v4247_v19  ;;  %v4068_v53 = vld [vmem:[#allocation4 + $0x290] sm:$0xf0]  ;;  %v5684_v55 = vld [vmem:[#allocation4 + $0x384] sm:$0xf]  ;;  %v3943_v57 = vor.u32 %v5620_v48, %v3940_v51 }
  0x87   :  { %2589 = vmatpush.bf16.msrb.mxu3 %v3831_v18  ;;  %2569 = vmatmul.bf16.vlgmr.msra.gmra.mxu2 %v6324_v24  ;;  %v3780_v54 = vld [vmem:[#allocation4 + $0x50] sm:$0xf0]  ;;  %v4071_v58 = vor.u32 %v5652_v52, %v4068_v53  ;;  %v5576_v59 = vld [vmem:[#allocation4 + $0x24] sm:$0xf] }
  0x88   :  { %v4196_v56 = vld [vmem:[#allocation4 + $0x390] sm:$0xf0]  ;;  %v5616_v60 = vld [vmem:[#allocation4 + $0x164] sm:$0xf]  ;;  %v3783_v62 = vor.u32 %v5580_v47, %v3780_v54 }
  0x89   :  { %2601 = vmatpush.bf16.msrb.mxu0 %v3975_v29  ;;  %2614 = vmatpush.bf16.msrb.mxu1 %v4103_v30  ;;  %v4199_v0 = vor.u32 %v5684_v55, %v4196_v56  ;;  %v3924_v1 = vld [vmem:[#allocation4 + $0x170] sm:$0xf0]  ;;  %v5648_v2 = vld [vmem:[#allocation4 + $0x264] sm:$0xf] }
  0x8a   :  { %2627 = vmatpush.bf16.msrb.mxu2 %v4231_v35  ;;  %v4052_v3 = vld [vmem:[#allocation4 + $0x270] sm:$0xf0]  ;;  %v5680_v5 = vld [vmem:[#allocation4 + $0x364] sm:$0xf]  ;;  %v3927_v7 = vor.u32 %v5616_v60, %v3924_v1 }
  0x8b   :  { %2590 = vmatpush.bf16.msrb.mxu3 %v3815_v33  ;;  %v3764_v4 = vld [vmem:[#allocation4 + $0x30] sm:$0xf0]  ;;  %v4055_v8 = vor.u32 %v5648_v2, %v4052_v3  ;;  %v5572_v10 = vld [vmem:[#allocation4 + $0x4] sm:$0xf] }
  0x8c   :  { %v4180_v6 = vld [vmem:[#allocation4 + $0x370] sm:$0xf0]  ;;  %v5612_v11 = vld [vmem:[#allocation4 + $0x144] sm:$0xf]  ;;  %v3767_v12 = vor.u32 %v5576_v59, %v3764_v4 }
  0x8d   :  { %2602 = vmatpush.bf16.msrb.mxu0 %v3959_v45  ;;  %2615 = vmatpush.bf16.msrb.mxu1 %v4087_v46  ;;  %v4183_v13 = vor.u32 %v5680_v5, %v4180_v6  ;;  %v3908_v14 = vld [vmem:[#allocation4 + $0x150] sm:$0xf0]  ;;  %v5644_v15 = vld [vmem:[#allocation4 + $0x244] sm:$0xf] }
  0x8e   :  { %2628 = vmatpush.bf16.msrb.mxu2 %v4215_v50  ;;  %v4036_v18 = vld [vmem:[#allocation4 + $0x250] sm:$0xf0]  ;;  %v5676_v20 = vld [vmem:[#allocation4 + $0x344] sm:$0xf]  ;;  %v3911_v26 = vor.u32 %v5612_v11, %v3908_v14 }
  0x8f   :  { %2591 = vmatpush.bf16.msrb.mxu3 %v3799_v49  ;;  %v3748_v19 = vld [vmem:[#allocation4 + $0x10] sm:$0xf0]  ;;  %v5728_v22 = vld [vmem:[#allocation4 + $0x4e4] sm:$0xf]  ;;  %v4039_v27 = vor.u32 %v5644_v15, %v4036_v18 }
  0x90   :  { %v4164_v21 = vld [vmem:[#allocation4 + $0x350] sm:$0xf0]  ;;  %v5608_v29 = vld [vmem:[#allocation4 + $0x124] sm:$0xf]  ;;  %v3751_v30 = vor.u32 %v5572_v10, %v3748_v19 }
  0x91   :  { %2603 = vmatpush.bf16.msrb.mxu0 %v3943_v57  ;;  %2616 = vmatpush.bf16.msrb.mxu1 %v4071_v58  ;;  %v4372_v25 = vld [vmem:[#allocation4 + $0x4f0] sm:$0xf0]  ;;  %v4167_v31 = vor.u32 %v5676_v20, %v4164_v21  ;;  %v5640_v33 = vld [vmem:[#allocation4 + $0x224] sm:$0xf] }
  0x92   :  { %2629 = vmatpush.bf16.msrb.mxu2 %v4199_v0  ;;  %v3892_v32 = vld [vmem:[#allocation4 + $0x130] sm:$0xf0]  ;;  %v4375_v36 = vor.u32 %v5728_v22, %v4372_v25  ;;  %v5672_v37 = vld [vmem:[#allocation4 + $0x324] sm:$0xf] }
  0x93   :  { %2592 = vmatpush.bf16.msrb.mxu3 %v3783_v62  ;;  %v4020_v35 = vld [vmem:[#allocation4 + $0x230] sm:$0xf0]  ;;  %v5724_v42 = vld [vmem:[#allocation4 + $0x4c4] sm:$0xf]  ;;  %v3895_v44 = vor.u32 %v5608_v29, %v3892_v32 }
  0x94   :  { %v4148_v40 = vld [vmem:[#allocation4 + $0x330] sm:$0xf0]  ;;  %v4023_v45 = vor.u32 %v5640_v33, %v4020_v35  ;;  %v5604_v46 = vld [vmem:[#allocation4 + $0x104] sm:$0xf] }
  0x95   :  { %2604 = vmatpush.bf16.msrb.mxu0 %v3927_v7  ;;  %2617 = vmatpush.bf16.msrb.mxu1 %v4055_v8  ;;  %v4356_v43 = vld [vmem:[#allocation4 + $0x4d0] sm:$0xf0]  ;;  %v5636_v48 = vld [vmem:[#allocation4 + $0x204] sm:$0xf]  ;;  %v4151_v49 = vor.u32 %v5672_v37, %v4148_v40 }
  0x96   :  { %2630 = vmatpush.bf16.msrb.mxu2 %v4183_v13  ;;  %v3876_v47 = vld [vmem:[#allocation4 + $0x110] sm:$0xf0]  ;;  %v5668_v51 = vld [vmem:[#allocation4 + $0x304] sm:$0xf]  ;;  %v4359_v53 = vor.u32 %v5724_v42, %v4356_v43 }
  0x97   :  { %2593 = vmatpush.bf16.msrb.mxu3 %v3767_v12  ;;  %v4004_v50 = vld [vmem:[#allocation4 + $0x210] sm:$0xf0]  ;;  %v5720_v54 = vld [vmem:[#allocation4 + $0x4a4] sm:$0xf]  ;;  %v3879_v60 = vor.u32 %v5604_v46, %v3876_v47 }
  0x98   :  { %v4132_v52 = vld [vmem:[#allocation4 + $0x310] sm:$0xf0]  ;;  %v5760_v55 = vld [vmem:[#allocation4 + $0x5e4] sm:$0xf]  ;;  %v4007_v62 = vor.u32 %v5636_v48, %v4004_v50 }
  0x99   :  { %2605 = vmatpush.bf16.msrb.mxu0 %v3911_v26  ;;  %2618 = vmatpush.bf16.msrb.mxu1 %v4039_v27  ;;  %v4500_v56 = vld [vmem:[#allocation4 + $0x5f0] sm:$0xf0]  ;;  %v5792_v58 = vld [vmem:[#allocation4 + $0x6e4] sm:$0xf]  ;;  %v4135_v2 = vor.u32 %v5668_v51, %v4132_v52 }
  0x9a   :  { %2631 = vmatpush.bf16.msrb.mxu2 %v4167_v31  ;;  %v4340_v57 = vld [vmem:[#allocation4 + $0x4b0] sm:$0xf0]  ;;  %v5824_v0 = vld [vmem:[#allocation4 + $0x7e4] sm:$0xf]  ;;  %v4503_v3 = vor.u32 %v5760_v55, %v4500_v56 }
  0x9b   :  { %2594 = vmatpush.bf16.msrb.mxu3 %v3751_v30  ;;  %v4628_v59 = vld [vmem:[#allocation4 + $0x6f0] sm:$0xf0]  ;;  %v4343_v4 = vor.u32 %v5720_v54, %v4340_v57  ;;  %v5716_v6 = vld [vmem:[#allocation4 + $0x484] sm:$0xf] }
  0x9c   :  { %v4756_v1 = vld [vmem:[#allocation4 + $0x7f0] sm:$0xf0]  ;;  %v4631_v5 = vor.u32 %v5792_v58, %v4628_v59  ;;  %v5756_v7 = vld [vmem:[#allocation4 + $0x5c4] sm:$0xf] }
  0x9d   :  { %2606 = vmatpush.bf16.msrb.mxu0 %v3895_v44  ;;  %2619 = vmatpush.bf16.msrb.mxu1 %v4023_v45  ;;  %v4484_v8 = vld [vmem:[#allocation4 + $0x5d0] sm:$0xf0]  ;;  %v4759_v10 = vor.u32 %v5824_v0, %v4756_v1  ;;  %v5788_v12 = vld [vmem:[#allocation4 + $0x6c4] sm:$0xf] }
  0x9e   :  { %2632 = vmatpush.bf16.msrb.mxu2 %v4151_v49  ;;  %2595 = vmatmul.bf16.vlgmr.msrb.gmra.mxu3 %v6296_v9  ;;  %v4324_v11 = vld [vmem:[#allocation4 + $0x490] sm:$0xf0]  ;;  %v5820_v14 = vld [vmem:[#allocation4 + $0x7c4] sm:$0xf]  ;;  %v4487_v18 = vor.u32 %v5756_v7, %v4484_v8 }
  0x9f   :  { %2639 = vmatpush.bf16.msra.mxu3 %v4375_v36  ;;  %v4612_v13 = vld [vmem:[#allocation4 + $0x6d0] sm:$0xf0]  ;;  %v4327_v19 = vor.u32 %v5716_v6, %v4324_v11  ;;  %v5712_v21 = vld [vmem:[#allocation4 + $0x464] sm:$0xf] }
  0xa0   :  { %v4740_v15 = vld [vmem:[#allocation4 + $0x7d0] sm:$0xf0]  ;;  %v4615_v20 = vor.u32 %v5788_v12, %v4612_v13  ;;  %v5752_v22 = vld [vmem:[#allocation4 + $0x5a4] sm:$0xf] }
  0xa1   :  { %2607 = vmatpush.bf16.msrb.mxu0 %v3879_v60  ;;  %2620 = vmatpush.bf16.msrb.mxu1 %v4007_v62  ;;  %v4468_v25 = vld [vmem:[#allocation4 + $0x5b0] sm:$0xf0]  ;;  %v4743_v26 = vor.u32 %v5820_v14, %v4740_v15  ;;  %v5784_v29 = vld [vmem:[#allocation4 + $0x6a4] sm:$0xf] }
  0xa2   :  { %2633 = vmatpush.bf16.msrb.mxu2 %v4135_v2  ;;  %v4308_v27 = vld [vmem:[#allocation4 + $0x470] sm:$0xf0]  ;;  %v5816_v31 = vld [vmem:[#allocation4 + $0x7a4] sm:$0xf]  ;;  %v4471_v33 = vor.u32 %v5752_v22, %v4468_v25 }
  0xa3   :  { %2640 = vmatpush.bf16.msra.mxu3 %v4359_v53  ;;  %v4596_v30 = vld [vmem:[#allocation4 + $0x6b0] sm:$0xf0]  ;;  %v4311_v35 = vor.u32 %v5712_v21, %v4308_v27  ;;  %v5708_v37 = vld [vmem:[#allocation4 + $0x444] sm:$0xf] }
  0xa4   :  { %2608 = vmatmul.bf16.vlgmr.msrb.gmra.mxu0 %v6300_v17  ;;  %v4724_v32 = vld [vmem:[#allocation4 + $0x7b0] sm:$0xf0]  ;;  %2621 = vmatmul.bf16.vlgmr.msrb.gmra.mxu1 %v6293_v63  ;;  %v4599_v36 = vor.u32 %v5784_v29, %v4596_v30  ;;  %v5748_v40 = vld [vmem:[#allocation4 + $0x584] sm:$0xf] }
  0xa5   :  { %2652 = vmatpush.bf16.msra.mxu0 %v4503_v3  ;;  %2665 = vmatpush.bf16.msra.mxu1 %v4631_v5  ;;  %v4452_v42 = vld [vmem:[#allocation4 + $0x590] sm:$0xf0]  ;;  %v4727_v43 = vor.u32 %v5816_v31, %v4724_v32  ;;  %v5780_v45 = vld [vmem:[#allocation4 + $0x684] sm:$0xf] }
  0xa6   :  { %2678 = vmatpush.bf16.msra.mxu2 %v4759_v10  ;;  %v4292_v44 = vld [vmem:[#allocation4 + $0x450] sm:$0xf0]  ;;  %v5812_v47 = vld [vmem:[#allocation4 + $0x784] sm:$0xf]  ;;  %v4455_v49 = vor.u32 %v5748_v40, %v4452_v42 }
  0xa7   :  { %2641 = vmatpush.bf16.msra.mxu3 %v4343_v4  ;;  %2634 = vmatmul.bf16.vlgmr.msrb.gmra.mxu2 %v6298_v16  ;;  %v4580_v46 = vld [vmem:[#allocation4 + $0x690] sm:$0xf0]  ;;  %v4295_v50 = vor.u32 %v5708_v37, %v4292_v44  ;;  %v5704_v52 = vld [vmem:[#allocation4 + $0x424] sm:$0xf] }
  0xa8   :  { %v4708_v48 = vld [vmem:[#allocation4 + $0x790] sm:$0xf0]  ;;  %v4583_v51 = vor.u32 %v5780_v45, %v4580_v46  ;;  %v5744_v53 = vld [vmem:[#allocation4 + $0x564] sm:$0xf] }
  0xa9   :  { %2653 = vmatpush.bf16.msra.mxu0 %v4487_v18  ;;  %2666 = vmatpush.bf16.msra.mxu1 %v4615_v20  ;;  %v4436_v54 = vld [vmem:[#allocation4 + $0x570] sm:$0xf0]  ;;  %v4711_v55 = vor.u32 %v5812_v47, %v4708_v48  ;;  %v5776_v57 = vld [vmem:[#allocation4 + $0x664] sm:$0xf] }
  0xaa   :  { %2679 = vmatpush.bf16.msra.mxu2 %v4743_v26  ;;  %v4276_v56 = vld [vmem:[#allocation4 + $0x430] sm:$0xf0]  ;;  %v5808_v59 = vld [vmem:[#allocation4 + $0x764] sm:$0xf]  ;;  %v4439_v62 = vor.u32 %v5744_v53, %v4436_v54 }
  0xab   :  { %2642 = vmatpush.bf16.msra.mxu3 %v4327_v19  ;;  %v4564_v58 = vld [vmem:[#allocation4 + $0x670] sm:$0xf0]  ;;  %v5700_v0 = vld [vmem:[#allocation4 + $0x404] sm:$0xf]  ;;  %v4279_v1 = vor.u32 %v5704_v52, %v4276_v56 }
  0xac   :  { %v4692_v60 = vld [vmem:[#allocation4 + $0x770] sm:$0xf0]  ;;  %v4567_v2 = vor.u32 %v5776_v57, %v4564_v58  ;;  %v5740_v4 = vld [vmem:[#allocation4 + $0x544] sm:$0xf] }
  0xad   :  { %2654 = vmatpush.bf16.msra.mxu0 %v4471_v33  ;;  %2667 = vmatpush.bf16.msra.mxu1 %v4599_v36  ;;  %v4260_v3 = vld [vmem:[#allocation4 + $0x410] sm:$0xf0]  ;;  %v4695_v6 = vor.u32 %v5808_v59, %v4692_v60  ;;  %v5772_v7 = vld [vmem:[#allocation4 + $0x644] sm:$0xf] }
  0xae   :  { %2680 = vmatpush.bf16.msra.mxu2 %v4727_v43  ;;  %v4420_v5 = vld [vmem:[#allocation4 + $0x550] sm:$0xf0]  ;;  %v5804_v10 = vld [vmem:[#allocation4 + $0x744] sm:$0xf]  ;;  %v4263_v15 = vor.u32 %v5700_v0, %v4260_v3 }
  0xaf   :  { %2643 = vmatpush.bf16.msra.mxu3 %v4311_v35  ;;  %v4548_v8 = vld [vmem:[#allocation4 + $0x650] sm:$0xf0]  ;;  %v5856_v12 = vld [vmem:[#allocation4 + $0x8e4] sm:$0xf]  ;;  %v4423_v14 = vor.u32 %v5740_v4, %v4420_v5 }
  0xb0   :  { %v4676_v11 = vld [vmem:[#allocation4 + $0x750] sm:$0xf0]  ;;  %v4551_v18 = vor.u32 %v5772_v7, %v4548_v8  ;;  %v5736_v19 = vld [vmem:[#allocation4 + $0x524] sm:$0xf] }
  0xb1   :  { %2655 = vmatpush.bf16.msra.mxu0 %v4455_v49  ;;  %2668 = vmatpush.bf16.msra.mxu1 %v4583_v51  ;;  %v4884_v13 = vld [vmem:[#allocation4 + $0x8f0] sm:$0xf0]  ;;  %v4679_v21 = vor.u32 %v5804_v10, %v4676_v11  ;;  %v5768_v25 = vld [vmem:[#allocation4 + $0x624] sm:$0xf] }
  0xb2   :  { %2681 = vmatpush.bf16.msra.mxu2 %v4711_v55  ;;  %v4404_v20 = vld [vmem:[#allocation4 + $0x530] sm:$0xf0]  ;;  %v4887_v22 = vor.u32 %v5856_v12, %v4884_v13  ;;  %v5800_v27 = vld [vmem:[#allocation4 + $0x724] sm:$0xf] }
  0xb3   :  { %2644 = vmatpush.bf16.msra.mxu3 %v4295_v50  ;;  %v4532_v26 = vld [vmem:[#allocation4 + $0x630] sm:$0xf0]  ;;  %v5852_v30 = vld [vmem:[#allocation4 + $0x8c4] sm:$0xf]  ;;  %v4407_v32 = vor.u32 %v5736_v19, %v4404_v20 }
  0xb4   :  { %v4660_v29 = vld [vmem:[#allocation4 + $0x730] sm:$0xf0]  ;;  %v5732_v33 = vld [vmem:[#allocation4 + $0x504] sm:$0xf]  ;;  %v4535_v37 = vor.u32 %v5768_v25, %v4532_v26 }
  0xb5   :  { %2656 = vmatpush.bf16.msra.mxu0 %v4439_v62  ;;  %2669 = vmatpush.bf16.msra.mxu1 %v4567_v2  ;;  %v4868_v31 = vld [vmem:[#allocation4 + $0x8d0] sm:$0xf0]  ;;  %v5944_v35 = vld [vmem:[#allocation4 + $0xba4] sm:$0xf]  ;;  %v4663_v44 = vor.u32 %v5800_v27, %v4660_v29 }
  0xb6   :  { %2682 = vmatpush.bf16.msra.mxu2 %v4695_v6  ;;  %v5236_v36 = vld [vmem:[#allocation4 + $0xbb0] sm:$0x30]  ;;  %v5764_v42 = vld [vmem:[#allocation4 + $0x604] sm:$0xf]  ;;  %v4871_v45 = vor.u32 %v5852_v30, %v4868_v31 }
  0xb7   :  { %2645 = vmatpush.bf16.msra.mxu3 %v4279_v1  ;;  %v4388_v40 = vld [vmem:[#allocation4 + $0x510] sm:$0xf0]  ;;  %v5796_v46 = vld [vmem:[#allocation4 + $0x704] sm:$0xf]  ;;  %v5239_v52 = vor.u32 %v5944_v35, %v5236_v36 }
  0xb8   :  { %v4516_v43 = vld [vmem:[#allocation4 + $0x610] sm:$0xf0]  ;;  %v5888_v47 = vld [vmem:[#allocation4 + $0x9e4] sm:$0xf]  ;;  %v4391_v53 = vor.u32 %v5732_v33, %v4388_v40 }
  0xb9   :  { %2657 = vmatpush.bf16.msra.mxu0 %v4423_v14  ;;  %2670 = vmatpush.bf16.msra.mxu1 %v4551_v18  ;;  %v5012_v48 = vld [vmem:[#allocation4 + $0x9f0] sm:$0xf0]  ;;  %v5848_v50 = vld [vmem:[#allocation4 + $0x8a4] sm:$0xf]  ;;  %v4519_v56 = vor.u32 %v5764_v42, %v4516_v43  ;;  %v2423_v2 = vsel %vm2418_vm0, %v5239_v52, 0 }
  0xba   :  { %2683 = vmatpush.bf16.msra.mxu2 %v4679_v21  ;;  %v4644_v49 = vld [vmem:[#allocation4 + $0x710] sm:$0xf0]  ;;  %v5920_v54 = vld [vmem:[#allocation4 + $0xae4] sm:$0xf]  ;;  %v5015_v57 = vor.u32 %v5888_v47, %v5012_v48  ;;  %v6340_v43 = vld [vmem:[#allocation6] sm:$0xf] }
  0xbb   :  { %2646 = vmatpush.bf16.msra.mxu3 %v4263_v15  ;;  %v4852_v51 = vld [vmem:[#allocation4 + $0x8b0] sm:$0xf0]  ;;  %v4647_v58 = vor.u32 %v5796_v46, %v4644_v49  ;;  %v5844_v60 = vld [vmem:[#allocation4 + $0x884] sm:$0xf] }
  0xbc   :  { %v5140_v55 = vld [vmem:[#allocation4 + $0xaf0] sm:$0xf0]  ;;  %v4855_v59 = vor.u32 %v5848_v50, %v4852_v51  ;;  %v5884_v62 = vld [vmem:[#allocation4 + $0x9c4] sm:$0xf] }
  0xbd   :  { %2658 = vmatpush.bf16.msra.mxu0 %v4407_v32  ;;  %2671 = vmatpush.bf16.msra.mxu1 %v4535_v37  ;;  %v4996_v0 = vld [vmem:[#allocation4 + $0x9d0] sm:$0xf0]  ;;  %v5143_v1 = vor.u32 %v5920_v54, %v5140_v55  ;;  %v5916_v4 = vld [vmem:[#allocation4 + $0xac4] sm:$0xf]  ;;  %v530_v55 = vperm.slane %v6340_v43, 0 }
  0xbe   :  { %2647 = vmatmul.bf16.vlgmr.msra.gmra.mxu3 %v6308_v38  ;;  %2684 = vmatpush.bf16.msra.mxu2 %v4663_v44  ;;  %v4836_v3 = vld [vmem:[#allocation4 + $0x890] sm:$0xf0]  ;;  %v5940_v6 = vld [vmem:[#allocation4 + $0xb84] sm:$0xf]  ;;  %v4999_v8 = vor.u32 %v5884_v62, %v4996_v0 }
  0xbf   :  { %2691 = vmatpush.bf16.msrb.mxu3 %v4887_v22  ;;  %v5124_v5 = vld [vmem:[#allocation4 + $0xad0] sm:$0xf0]  ;;  %v4839_v10 = vor.u32 %v5844_v60, %v4836_v3  ;;  %v5880_v11 = vld [vmem:[#allocation4 + $0x9a4] sm:$0xf] }
  0xc0   :  { %v5220_v7 = vld [vmem:[#allocation4 + $0xb90] sm:$0xf0]  ;;  %v5127_v13 = vor.u32 %v5916_v4, %v5124_v5  ;;  %v5840_v15 = vld [vmem:[#allocation4 + $0x864] sm:$0xf] }
  0xc1   :  { %2659 = vmatpush.bf16.msra.mxu0 %v4391_v53  ;;  %2672 = vmatpush.bf16.msra.mxu1 %v4519_v56  ;;  %v4980_v12 = vld [vmem:[#allocation4 + $0x9b0] sm:$0xf0]  ;;  %v5223_v14 = vor.u32 %v5940_v6, %v5220_v7  ;;  %v5912_v19 = vld [vmem:[#allocation4 + $0xaa4] sm:$0xf]  ;;  %v3866_v7 = vld [vmem:[#allocation4 + $0xe8] sm:$0xf] }
  0xc2   :  { %2685 = vmatpush.bf16.msra.mxu2 %v4647_v58  ;;  %v4820_v18 = vld [vmem:[#allocation4 + $0x870] sm:$0xf0]  ;;  %v5936_v21 = vld [vmem:[#allocation4 + $0xb64] sm:$0xf]  ;;  %v4983_v25 = vor.u32 %v5880_v11, %v4980_v12  ;;  %v5603_v11 = vld [vmem:[#allocation4 + $0xf4] sm:$0xf0] }
  0xc3   :  { %2692 = vmatpush.bf16.msrb.mxu3 %v4871_v45  ;;  %v5108_v20 = vld [vmem:[#allocation4 + $0xab0] sm:$0xf0]  ;;  %v4823_v26 = vor.u32 %v5840_v15, %v4820_v18  ;;  %v5876_v27 = vld [vmem:[#allocation4 + $0x984] sm:$0xf]  ;;  %v3994_v12 = vld [vmem:[#allocation4 + $0x1e8] sm:$0xf] }
  0xc4   :  { %2660 = vmatmul.bf16.vlgmr.msra.gmra.mxu0 %v6312_v41  ;;  %v5204_v22 = vld [vmem:[#allocation4 + $0xb70] sm:$0xf0]  ;;  %2673 = vmatmul.bf16.vlgmr.msra.gmra.mxu1 %v6305_v34  ;;  %v5111_v30 = vor.u32 %v5912_v19, %v5108_v20  ;;  %v5836_v32 = vld [vmem:[#allocation4 + $0x844] sm:$0xf]  ;;  %v2453_v19 = vpop.f32.mrf.mxu1 }
  0xc5   :  { %2704 = vmatpush.bf16.msrb.mxu0 %v5015_v57  ;;  %2717 = vmatpush.bf16.msrb.mxu1 %v5143_v1  ;;  %v4964_v29 = vld [vmem:[#allocation4 + $0x990] sm:$0xf0]  ;;  %v5207_v31 = vor.u32 %v5936_v21, %v5204_v22  ;;  %v5908_v35 = vld [vmem:[#allocation4 + $0xa84] sm:$0xf] }
  0xc6   :  { %2732 = vmatpush.bf16.msrb.mxu2 %v2423_v2  ;;  %v4804_v33 = vld [vmem:[#allocation4 + $0x850] sm:$0xf0]  ;;  %v5932_v37 = vld [vmem:[#allocation4 + $0xb44] sm:$0xf]  ;;  %v4967_v42 = vor.u32 %v5876_v27, %v4964_v29 }
  0xc7   :  { %2693 = vmatpush.bf16.msrb.mxu3 %v4855_v59  ;;  %2686 = vmatmul.bf16.vlgmr.msra.gmra.mxu2 %v6310_v39  ;;  %v5092_v36 = vld [vmem:[#allocation4 + $0xa90] sm:$0xf0]  ;;  %v4807_v44 = vor.u32 %v5836_v32, %v4804_v33  ;;  %v5832_v45 = vld [vmem:[#allocation4 + $0x824] sm:$0xf]  ;;  %v5599_v33 = vld [vmem:[#allocation4 + $0xd4] sm:$0xf0] }
  0xc8   :  { %v5188_v40 = vld [vmem:[#allocation4 + $0xb50] sm:$0xf0]  ;;  %v5872_v46 = vld [vmem:[#allocation4 + $0x964] sm:$0xf]  ;;  %v5095_v48 = vor.u32 %v5908_v35, %v5092_v36  ;;  %v3978_v35 = vld [vmem:[#allocation4 + $0x1c8] sm:$0xf] }
  0xc9   :  { %2705 = vmatpush.bf16.msrb.mxu0 %v4999_v8  ;;  %2718 = vmatpush.bf16.msrb.mxu1 %v5127_v13  ;;  %v4948_v47 = vld [vmem:[#allocation4 + $0x970] sm:$0xf0]  ;;  %v5191_v49 = vor.u32 %v5932_v37, %v5188_v40  ;;  %v5904_v51 = vld [vmem:[#allocation4 + $0xa64] sm:$0xf]  ;;  %v5635_v13 = vld [vmem:[#allocation4 + $0x1f4] sm:$0xf0] }
  0xca   :  { %2733 = vmatpush.bf16.msrb.mxu2 %v5223_v14  ;;  %v4788_v50 = vld [vmem:[#allocation4 + $0x830] sm:$0xf0]  ;;  %v5928_v53 = vld [vmem:[#allocation4 + $0xb24] sm:$0xf]  ;;  %v4951_v56 = vor.u32 %v5872_v46, %v4948_v47  ;;  %v3995_v27 = vor.u32 %v5635_v13, %v3994_v12  ;;  %v5631_v36 = vld [vmem:[#allocation4 + $0x1d4] sm:$0xf0] }
  0xcb   :  { %2694 = vmatpush.bf16.msrb.mxu3 %v4839_v10  ;;  %v5076_v52 = vld [vmem:[#allocation4 + $0xa70] sm:$0xf0]  ;;  %v4791_v57 = vor.u32 %v5832_v45, %v4788_v50  ;;  %v5828_v58 = vld [vmem:[#allocation4 + $0x804] sm:$0xf]  ;;  %v4122_v46 = vld [vmem:[#allocation4 + $0x2e8] sm:$0xf] }
  0xcc   :  { %v5172_v54 = vld [vmem:[#allocation4 + $0xb30] sm:$0xf0]  ;;  %v5868_v59 = vld [vmem:[#allocation4 + $0x944] sm:$0xf]  ;;  %v5079_v62 = vor.u32 %v5904_v51, %v5076_v52  ;;  %v2440_v4 = vpop.f32.mrf.mxu0  ;;  %v5667_v47 = vld [vmem:[#allocation4 + $0x2f4] sm:$0xf0]  ;;  %v3979_v51 = vor.u32 %v5631_v36, %v3978_v35 }
  0xcd   :  { %2706 = vmatpush.bf16.msrb.mxu0 %v4983_v25  ;;  %2719 = vmatpush.bf16.msrb.mxu1 %v5111_v30  ;;  %v4932_v60 = vld [vmem:[#allocation4 + $0x950] sm:$0xf0]  ;;  %v5175_v0 = vor.u32 %v5928_v53, %v5172_v54  ;;  %v5900_v2 = vld [vmem:[#allocation4 + $0xa44] sm:$0xf]  ;;  %v2441_v8 = vadd.f32 %v2440_v4, %v530_v55  ;;  %v3834_v54 = vld [vmem:[#allocation4 + $0xa8] sm:$0xf] }
  0xce   :  { %2734 = vmatpush.bf16.msrb.mxu2 %v5207_v31  ;;  %v4772_v1 = vld [vmem:[#allocation4 + $0x810] sm:$0xf0]  ;;  %v5924_v5 = vld [vmem:[#allocation4 + $0xb04] sm:$0xf]  ;;  %v4935_v10 = vor.u32 %v5868_v59, %v4932_v60  ;;  %v2466_v20 = vpop.f32.mrf.mxu2  ;;  %v3850_v31 = vld [vmem:[#allocation4 + $0xc8] sm:$0xf]  ;;  %v4123_v59 = vor.u32 %v5667_v47, %v4122_v46 }
  0xcf   :  { %2695 = vmatpush.bf16.msrb.mxu3 %v4823_v26  ;;  %v5060_v3 = vld [vmem:[#allocation4 + $0xa50] sm:$0xf0]  ;;  %v4775_v14 = vor.u32 %v5828_v58, %v4772_v1  ;;  %v5864_v15 = vld [vmem:[#allocation4 + $0x924] sm:$0xf]  ;;  %v2454_v25 = vadd.f32 %v2453_v19, %v2441_v8  ;;  %v3867_v26 = vor.u32 %v5603_v11, %v3866_v7  ;;  %v3851_v50 = vor.u32 %v5599_v33, %v3850_v31  ;;  %v5627_v58 = vld [vmem:[#allocation4 + $0x1b4] sm:$0xf0] }
  0xd0   :  { %v5156_v6 = vld [vmem:[#allocation4 + $0xb10] sm:$0xf0]  ;;  %v5063_v21 = vor.u32 %v5900_v2, %v5060_v3  ;;  %v5896_v29 = vld [vmem:[#allocation4 + $0xa24] sm:$0xf]  ;;  %v4250_v60 = vld [vmem:[#allocation4 + $0x3e8] sm:$0xf] }
  0xd1   :  { %2707 = vmatpush.bf16.msrb.mxu0 %v4967_v42  ;;  %2720 = vmatpush.bf16.msrb.mxu1 %v5095_v48  ;;  %v4916_v18 = vld [vmem:[#allocation4 + $0x930] sm:$0xf0]  ;;  %v5159_v22 = vor.u32 %v5924_v5, %v5156_v6  ;;  %v2467_v37 = vadd.f32 %v2466_v20, %v2454_v25  ;;  %v5860_v40 = vld [vmem:[#allocation4 + $0x904] sm:$0xf]  ;;  %v4106_v3 = vld [vmem:[#allocation4 + $0x2c8] sm:$0xf] }
  0xd2   :  { %2735 = vmatpush.bf16.msrb.mxu2 %v5191_v49  ;;  %v5044_v30 = vld [vmem:[#allocation4 + $0xa30] sm:$0xf0]  ;;  %v4919_v32 = vor.u32 %v5864_v15, %v4916_v18  ;;  %v5892_v52 = vld [vmem:[#allocation4 + $0xa04] sm:$0xf]  ;;  %v5663_v4 = vld [vmem:[#allocation4 + $0x2d4] sm:$0xf0] }
  0xd3   :  { %2696 = vmatpush.bf16.msrb.mxu3 %v4807_v44  ;;  %v4900_v42 = vld [vmem:[#allocation4 + $0x910] sm:$0xf0]  ;;  %v2479_v44 = vpop.f32.mrf.mxu3  ;;  %v5047_v45 = vor.u32 %v5896_v29, %v5044_v30  ;;  %v3818_v7 = vld [vmem:[#allocation4 + $0x88] sm:$0xf]  ;;  %v5623_v12 = vld [vmem:[#allocation4 + $0x194] sm:$0xf0]  ;;  %v4107_v13 = vor.u32 %v5663_v4, %v4106_v3 }
  0xd4   :  { %v6343_v48 = vadd.f32 %v2479_v44, %v2467_v37  ;;  %v2442_v49 = vpop.f32.mrf.mxu0  ;;  %v5028_v53 = vld [vmem:[#allocation4 + $0xa10] sm:$0xf0]  ;;  %v4903_v55 = vor.u32 %v5860_v40, %v4900_v42  ;;  %v3946_v11 = vld [vmem:[#allocation4 + $0x188] sm:$0xf]  ;;  %v5695_v15 = vld [vmem:[#allocation4 + $0x3d4] sm:$0xf0] }
  0xd5   :  { %2708 = vmatpush.bf16.msrb.mxu0 %v4951_v56  ;;  %2721 = vmatpush.bf16.msrb.mxu1 %v5079_v62  ;;  %v5595_v56 = vld [vmem:[#allocation4 + $0xb4] sm:$0xf0]  ;;  %v5031_v2 = vor.u32 %v5892_v52, %v5028_v53  ;;  %v4090_v19 = vld [vmem:[#allocation4 + $0x2a8] sm:$0xf] }
  0xd6   :  { %2736 = vmatpush.bf16.msrb.mxu2 %v5175_v0  ;;  %v5699_v62 = vld [vmem:[#allocation4 + $0x3f4] sm:$0xf0]  ;;  %v2455_v0 = vpop.f32.mrf.mxu1  ;;  %v2468_v1 = vpop.f32.mrf.mxu2  ;;  %v3835_v5 = vor.u32 %v5595_v56, %v3834_v54  ;;  %v3802_v25 = vld [vmem:[#allocation4 + $0x68] sm:$0xf] }
  0xd7   :  { %2697 = vmatpush.bf16.msrb.mxu3 %v4791_v57  ;;  %v3962_v57 = vld [vmem:[#allocation4 + $0x1a8] sm:$0xf]  ;;  %v4251_v8 = vor.u32 %v5699_v62, %v4250_v60  ;;  %v5659_v20 = vld [vmem:[#allocation4 + $0x2b4] sm:$0xf0] }
  0xd8   :  { %v3963_v6 = vor.u32 %v5627_v58, %v3962_v57  ;;  %v3930_v29 = vld [vmem:[#allocation4 + $0x168] sm:$0xf]  ;;  %v5619_v30 = vld [vmem:[#allocation4 + $0x174] sm:$0xf0]  ;;  %v4091_v31 = vor.u32 %v5659_v20, %v4090_v19 }
  0xd9   :  { %2709 = vmatpush.bf16.msrb.mxu0 %v4935_v10  ;;  %2722 = vmatpush.bf16.msrb.mxu1 %v5063_v21  ;;  %v5591_v10 = vld [vmem:[#allocation4 + $0x94] sm:$0xf0]  ;;  %v4074_v35 = vld [vmem:[#allocation4 + $0x288] sm:$0xf]  ;;  %v3931_v40 = vor.u32 %v5619_v30, %v3930_v29 }
  0xda   :  { %2737 = vmatpush.bf16.msrb.mxu2 %v5159_v22  ;;  %v3819_v21 = vor.u32 %v5591_v10, %v3818_v7  ;;  %v3947_v22 = vor.u32 %v5623_v12, %v3946_v11  ;;  %v5691_v33 = vld [vmem:[#allocation4 + $0x3b4] sm:$0xf0]  ;;  %v3786_v42 = vld [vmem:[#allocation4 + $0x48] sm:$0xf] }
  0xdb   :  { %2698 = vmatpush.bf16.msrb.mxu3 %v4775_v14  ;;  %v4234_v14 = vld [vmem:[#allocation4 + $0x3c8] sm:$0xf]  ;;  %v2481_v18 = vpop.f32.mrf.mxu3  ;;  %v5655_v36 = vld [vmem:[#allocation4 + $0x294] sm:$0xf0] }
  0xdc   :  { %v3914_v46 = vld [vmem:[#allocation4 + $0x148] sm:$0xf]  ;;  %v5615_v47 = vld [vmem:[#allocation4 + $0x154] sm:$0xf0]  ;;  %v4075_v49 = vor.u32 %v5655_v36, %v4074_v35 }
  0xdd   :  { %2710 = vmatpush.bf16.msrb.mxu0 %v4919_v32  ;;  %5249 = vmatmul.msk.bf16.vlgmr.msrb.gmra.mxu2 %vm2414_vm1, %v6318_v61  ;;  %v4218_v32 = vld [vmem:[#allocation4 + $0x3a8] sm:$0xf]  ;;  %v5651_v53 = vld [vmem:[#allocation4 + $0x274] sm:$0xf0] }
  0xde   :  { %2743 = vmatpush.bf16.msra.mxu2 %v3867_v26  ;;  %2699 = vmatmul.bf16.vlgmr.msrb.gmra.mxu3 %v6322_v23  ;;  %v4235_v26 = vor.u32 %v5695_v15, %v4234_v14  ;;  %v4219_v44 = vor.u32 %v5691_v33, %v4218_v32  ;;  %v4058_v52 = vld [vmem:[#allocation4 + $0x268] sm:$0xf]  ;;  %v5579_v58 = vld [vmem:[#allocation4 + $0x34] sm:$0xf0] }
  0xdf   :  { %2756 = vmatpush.bf16.msra.mxu3 %v3995_v27  ;;  %2723 = vmatpush.bf16.msrb.mxu1 %v5047_v45  ;;  %v5587_v27 = vld [vmem:[#allocation4 + $0x74] sm:$0xf0]  ;;  %v3770_v56 = vld [vmem:[#allocation4 + $0x28] sm:$0xf]  ;;  %v4059_v0 = vor.u32 %v5651_v53, %v4058_v52 }
  0xe0   :  { %v3803_v37 = vor.u32 %v5587_v27, %v3802_v25  ;;  %v5583_v45 = vld [vmem:[#allocation4 + $0x54] sm:$0xf0]  ;;  %v4186_v1 = vld [vmem:[#allocation4 + $0x368] sm:$0xf]  ;;  %v2505_v4 = vpop.f32.mrf.mxu1  ;;  %v3771_v7 = vor.u32 %v5579_v58, %v3770_v56 }
  0xe1   :  { %2711 = vmatpush.bf16.msrb.mxu0 %v4903_v55  ;;  %v3787_v54 = vor.u32 %v5583_v45, %v3786_v42  ;;  %v3915_v55 = vor.u32 %v5615_v47, %v3914_v46  ;;  %v5611_v60 = vld [vmem:[#allocation4 + $0x134] sm:$0xf0]  ;;  %v3754_v11 = vld [vmem:[#allocation4 + $0x8] sm:$0xf] }
  0xe2   :  { %2744 = vmatpush.bf16.msra.mxu2 %v3851_v50  ;;  %v4202_v50 = vld [vmem:[#allocation4 + $0x388] sm:$0xf]  ;;  %v5575_v12 = vld [vmem:[#allocation4 + $0x14] sm:$0xf0] }
  0xe3   :  { %2757 = vmatpush.bf16.msra.mxu3 %v3979_v51  ;;  %2724 = vmatpush.bf16.msrb.mxu1 %v5031_v2  ;;  %v5687_v51 = vld [vmem:[#allocation4 + $0x394] sm:$0xf0]  ;;  %v4170_v18 = vld [vmem:[#allocation4 + $0x348] sm:$0xf]  ;;  %v3755_v32 = vor.u32 %v5575_v12, %v3754_v11 }
  0xe4   :  { %2712 = vmatmul.bf16.vlgmr.msrb.gmra.mxu0 %v6326_v28  ;;  %v4203_v57 = vor.u32 %v5687_v51, %v4202_v50  ;;  %v5683_v2 = vld [vmem:[#allocation4 + $0x374] sm:$0xf0]  ;;  %v4506_v25 = vld [vmem:[#allocation4 + $0x5e8] sm:$0xf] }
  0xe5   :  { %2769 = vmatpush.bf16.msra.mxu0 %v4123_v59  ;;  %v3898_v59 = vld [vmem:[#allocation4 + $0x128] sm:$0xf]  ;;  %v2492_v62 = vpop.f32.mrf.mxu0  ;;  %v4187_v14 = vor.u32 %v5683_v2, %v4186_v1  ;;  %v5607_v15 = vld [vmem:[#allocation4 + $0x114] sm:$0xf0] }
  0xe6   :  { %2745 = vmatpush.bf16.msra.mxu2 %v3835_v5  ;;  %2725 = vmatmul.bf16.vlgmr.msrb.gmra.mxu1 %v6324_v24  ;;  %v2493_v3 = vadd.f32 %v2492_v62, %v6343_v48  ;;  %v4042_v5 = vld [vmem:[#allocation4 + $0x248] sm:$0xf]  ;;  %v5679_v19 = vld [vmem:[#allocation4 + $0x354] sm:$0xf0] }
  0xe7   :  { %2758 = vmatpush.bf16.msra.mxu3 %v3963_v6  ;;  %2782 = vmatpush.bf16.msra.mxu1 %v4251_v8  ;;  %v5647_v6 = vld [vmem:[#allocation4 + $0x254] sm:$0xf0]  ;;  %v3899_v8 = vor.u32 %v5611_v60, %v3898_v59  ;;  %v4378_v48 = vld [vmem:[#allocation4 + $0x4e8] sm:$0xf]  ;;  %v4171_v35 = vor.u32 %v5679_v19, %v4170_v18 }
  0xe8   :  { %v2506_v10 = vadd.f32 %v2505_v4, %v2493_v3  ;;  %v4043_v20 = vor.u32 %v5647_v6, %v4042_v5  ;;  %v5763_v27 = vld [vmem:[#allocation4 + $0x5f4] sm:$0xf0]  ;;  %v2531_v29 = vpop.f32.mrf.mxu3  ;;  %v4026_v30 = vld [vmem:[#allocation4 + $0x228] sm:$0xf]  ;;  %v2507_v51 = vpop.f32.mrf.mxu1 }
  0xe9   :  { %2770 = vmatpush.bf16.msra.mxu0 %v4107_v13  ;;  %v3882_v13 = vld [vmem:[#allocation4 + $0x108] sm:$0xf]  ;;  %v5675_v42 = vld [vmem:[#allocation4 + $0x334] sm:$0xf0]  ;;  %v4507_v45 = vor.u32 %v5763_v27, %v4506_v25 }
  0xea   :  { %2746 = vmatpush.bf16.msra.mxu2 %v3819_v21  ;;  %v2518_v21 = vpop.f32.mrf.mxu2  ;;  %v3883_v33 = vor.u32 %v5607_v15, %v3882_v13  ;;  %v4362_v47 = vld [vmem:[#allocation4 + $0x4c8] sm:$0xf]  ;;  %v5759_v52 = vld [vmem:[#allocation4 + $0x5d4] sm:$0xf0] }
  0xeb   :  { %2759 = vmatpush.bf16.msra.mxu3 %v3947_v22  ;;  %2783 = vmatpush.bf16.msra.mxu1 %v4235_v26  ;;  %v5731_v22 = vld [vmem:[#allocation4 + $0x4f4] sm:$0xf0]  ;;  %v2519_v26 = vadd.f32 %v2518_v21, %v2506_v10  ;;  %v4490_v50 = vld [vmem:[#allocation4 + $0x5c8] sm:$0xf] }
  0xec   :  { %v4379_v36 = vor.u32 %v5731_v22, %v4378_v48  ;;  %v4010_v53 = vld [vmem:[#allocation4 + $0x208] sm:$0xf]  ;;  %v5795_v56 = vld [vmem:[#allocation4 + $0x6f4] sm:$0xf0]  ;;  %v4491_v62 = vor.u32 %v5759_v52, %v4490_v50 }
  0xed   :  { %2771 = vmatpush.bf16.msra.mxu0 %v4091_v31  ;;  %v5643_v31 = vld [vmem:[#allocation4 + $0x234] sm:$0xf0]  ;;  %v4138_v59 = vld [vmem:[#allocation4 + $0x308] sm:$0xf] }
  0xee   :  { %2747 = vmatpush.bf16.msra.mxu2 %v3803_v37  ;;  %v6351_v37 = vadd.f32 %v2531_v29, %v2519_v26  ;;  %v4027_v46 = vor.u32 %v5643_v31, %v4026_v30  ;;  %v5671_v60 = vld [vmem:[#allocation4 + $0x314] sm:$0xf0]  ;;  %v4346_v1 = vld [vmem:[#allocation4 + $0x4a8] sm:$0xf] }
  0xef   :  { %2760 = vmatpush.bf16.msra.mxu3 %v3931_v40  ;;  %2784 = vmatpush.bf16.msra.mxu1 %v4219_v44  ;;  %v4154_v40 = vld [vmem:[#allocation4 + $0x328] sm:$0xf]  ;;  %v2494_v44 = vpop.f32.mrf.mxu0  ;;  %v5723_v2 = vld [vmem:[#allocation4 + $0x4b4] sm:$0xf0]  ;;  %v4139_v13 = vor.u32 %v5671_v60, %v4138_v59 }
  0xf0   :  { %v4474_v3 = vld [vmem:[#allocation4 + $0x5a8] sm:$0xf]  ;;  %v5755_v5 = vld [vmem:[#allocation4 + $0x5b4] sm:$0xf0]  ;;  %v2533_v10 = vpop.f32.mrf.mxu3 }
  0xf1   :  { %2772 = vmatpush.bf16.msra.mxu0 %v4075_v49  ;;  %v5727_v49 = vld [vmem:[#allocation4 + $0x4d4] sm:$0xf0]  ;;  %v4618_v11 = vld [vmem:[#allocation4 + $0x6c8] sm:$0xf]  ;;  %v4475_v15 = vor.u32 %v5755_v5, %v4474_v3 }
  0xf2   :  { %2748 = vmatpush.bf16.msra.mxu2 %v3787_v54  ;;  %v5639_v54 = vld [vmem:[#allocation4 + $0x214] sm:$0xf0]  ;;  %v4363_v58 = vor.u32 %v5727_v49, %v4362_v47  ;;  %v2520_v4 = vpop.f32.mrf.mxu2  ;;  %v4330_v19 = vld [vmem:[#allocation4 + $0x488] sm:$0xf] }
  0xf3   :  { %2761 = vmatpush.bf16.msra.mxu3 %v3915_v55  ;;  %2785 = vmatpush.bf16.msra.mxu1 %v4203_v57  ;;  %v4634_v55 = vld [vmem:[#allocation4 + $0x6e8] sm:$0xf]  ;;  %v4155_v57 = vor.u32 %v5675_v42, %v4154_v40  ;;  %v5791_v12 = vld [vmem:[#allocation4 + $0x6d4] sm:$0xf0] }
  0xf4   :  { %v4635_v6 = vor.u32 %v5795_v56, %v4634_v55  ;;  %v4458_v21 = vld [vmem:[#allocation4 + $0x588] sm:$0xf]  ;;  %v5751_v48 = vld [vmem:[#allocation4 + $0x594] sm:$0xf0]  ;;  %v4619_v22 = vor.u32 %v5791_v12, %v4618_v11 }
  0xf5   :  { %2773 = vmatpush.bf16.msra.mxu0 %v4059_v0  ;;  %v4011_v0 = vor.u32 %v5639_v54, %v4010_v53  ;;  %v4746_v25 = vld [vmem:[#allocation4 + $0x7c8] sm:$0xf]  ;;  %v5823_v26 = vld [vmem:[#allocation4 + $0x7d4] sm:$0xf0]  ;;  %v4459_v31 = vor.u32 %v5751_v48, %v4458_v21 }
  0xf6   :  { %2749 = vmatpush.bf16.msra.mxu2 %v3771_v7  ;;  %v4762_v7 = vld [vmem:[#allocation4 + $0x7e8] sm:$0xf]  ;;  %v5787_v29 = vld [vmem:[#allocation4 + $0x6b4] sm:$0xf0] }
  0xf7   :  { %2762 = vmatpush.bf16.msra.mxu3 %v3899_v8  ;;  %2786 = vmatpush.bf16.msra.mxu1 %v4187_v14  ;;  %v5827_v8 = vld [vmem:[#allocation4 + $0x7f4] sm:$0xf0]  ;;  %v4347_v14 = vor.u32 %v5723_v2, %v4346_v1  ;;  %v4602_v27 = vld [vmem:[#allocation4 + $0x6a8] sm:$0xf] }
  0xf8   :  { %v4763_v18 = vor.u32 %v5827_v8, %v4762_v7  ;;  %v5747_v40 = vld [vmem:[#allocation4 + $0x574] sm:$0xf0]  ;;  %v4603_v42 = vor.u32 %v5787_v29, %v4602_v27  ;;  %v4730_v44 = vld [vmem:[#allocation4 + $0x7a8] sm:$0xf] }
  0xf9   :  { %2774 = vmatpush.bf16.msra.mxu0 %v4043_v20  ;;  %v5719_v20 = vld [vmem:[#allocation4 + $0x494] sm:$0xf0]  ;;  %v4298_v52 = vld [vmem:[#allocation4 + $0x448] sm:$0xf] }
  0xfa   :  { %2750 = vmatpush.bf16.msra.mxu2 %v3755_v32  ;;  %v4331_v30 = vor.u32 %v5719_v20, %v4330_v19  ;;  %v4747_v32 = vor.u32 %v5823_v26, %v4746_v25  ;;  %v5783_v47 = vld [vmem:[#allocation4 + $0x694] sm:$0xf0]  ;;  %v4426_v54 = vld [vmem:[#allocation4 + $0x548] sm:$0xf] }
  0xfb   :  { %2763 = vmatpush.bf16.msra.mxu3 %v3883_v33  ;;  %2787 = vmatpush.bf16.msra.mxu1 %v4171_v35  ;;  %v4314_v33 = vld [vmem:[#allocation4 + $0x468] sm:$0xf]  ;;  %v5715_v35 = vld [vmem:[#allocation4 + $0x474] sm:$0xf0] }
  0xfc   :  { %v4315_v49 = vor.u32 %v5715_v35, %v4314_v33  ;;  %v5711_v53 = vld [vmem:[#allocation4 + $0x454] sm:$0xf0]  ;;  %v4570_v59 = vld [vmem:[#allocation4 + $0x668] sm:$0xf] }
  0xfd   :  { %2775 = vmatpush.bf16.msra.mxu0 %v4027_v46  ;;  %2751 = vmatmul.bf16.vlgmr.msra.gmra.mxu2 %v6296_v9  ;;  %v4586_v46 = vld [vmem:[#allocation4 + $0x688] sm:$0xf]  ;;  %v5743_v55 = vld [vmem:[#allocation4 + $0x554] sm:$0xf0] }
  0xfe   :  { %2795 = vmatpush.bf16.msrb.mxu2 %v4379_v36  ;;  %2764 = vmatmul.bf16.vlgmr.msra.gmra.mxu3 %v6300_v17  ;;  %v4442_v36 = vld [vmem:[#allocation4 + $0x568] sm:$0xf]  ;;  %v4587_v56 = vor.u32 %v5783_v47, %v4586_v46  ;;  %v5779_v60 = vld [vmem:[#allocation4 + $0x674] sm:$0xf0]  ;;  %v4427_v1 = vor.u32 %v5743_v55, %v4426_v54 }
  0xff   :  { %2808 = vmatpush.bf16.msrb.mxu3 %v4507_v45  ;;  %2788 = vmatpush.bf16.msra.mxu1 %v4155_v57  ;;  %v5819_v45 = vld [vmem:[#allocation4 + $0x7b4] sm:$0xf0]  ;;  %v4443_v50 = vor.u32 %v5747_v40, %v4442_v36  ;;  %v4714_v57 = vld [vmem:[#allocation4 + $0x788] sm:$0xf]  ;;  %v4571_v11 = vor.u32 %v5779_v60, %v4570_v59 }
 0x100   :  { %v4731_v51 = vor.u32 %v5819_v45, %v4730_v44  ;;  %v4282_v3 = vld [vmem:[#allocation4 + $0x428] sm:$0xf]  ;;  %v5707_v4 = vld [vmem:[#allocation4 + $0x434] sm:$0xf0] }
 0x101   :  { %2776 = vmatpush.bf16.msra.mxu0 %v4011_v0  ;;  %v2544_v0 = vpop.f32.mrf.mxu0  ;;  %v4410_v5 = vld [vmem:[#allocation4 + $0x528] sm:$0xf]  ;;  %v2557_v8 = vpop.f32.mrf.mxu1  ;;  %v5739_v10 = vld [vmem:[#allocation4 + $0x534] sm:$0xf0]  ;;  %v4283_v19 = vor.u32 %v5707_v4, %v4282_v3 }
 0x102   :  { %2796 = vmatpush.bf16.msrb.mxu2 %v4363_v58  ;;  %v5815_v58 = vld [vmem:[#allocation4 + $0x794] sm:$0xf0]  ;;  %v2545_v7 = vadd.f32 %v2544_v0, %v6351_v37  ;;  %v4698_v12 = vld [vmem:[#allocation4 + $0x768] sm:$0xf]  ;;  %v4411_v21 = vor.u32 %v5739_v10, %v4410_v5 }
 0x103   :  { %2809 = vmatpush.bf16.msrb.mxu3 %v4491_v62  ;;  %2789 = vmatpush.bf16.msra.mxu1 %v4139_v13  ;;  %v4299_v62 = vor.u32 %v5711_v53, %v4298_v52  ;;  %v4715_v2 = vor.u32 %v5815_v58, %v4714_v57  ;;  %v5811_v13 = vld [vmem:[#allocation4 + $0x774] sm:$0xf0]  ;;  %v4266_v20 = vld [vmem:[#allocation4 + $0x408] sm:$0xf] }
 0x104   :  { %2777 = vmatmul.bf16.vlgmr.msra.gmra.mxu0 %v6293_v63  ;;  %v4699_v48 = vor.u32 %v5811_v13, %v4698_v12  ;;  %v4394_v25 = vld [vmem:[#allocation4 + $0x508] sm:$0xf]  ;;  %v5735_v26 = vld [vmem:[#allocation4 + $0x514] sm:$0xf0] }
 0x105   :  { %2821 = vmatpush.bf16.msrb.mxu0 %v4635_v6  ;;  %v2583_v6 = vpop.f32.mrf.mxu3  ;;  %v4682_v27 = vld [vmem:[#allocation4 + $0x748] sm:$0xf]  ;;  %v5807_v29 = vld [vmem:[#allocation4 + $0x754] sm:$0xf0]  ;;  %v4395_v45 = vor.u32 %v5735_v26, %v4394_v25 }
 0x106   :  { %2797 = vmatpush.bf16.msrb.mxu2 %v4347_v14  ;;  %2790 = vmatmul.bf16.vlgmr.msra.gmra.mxu1 %v6298_v16  ;;  %v4554_v14 = vld [vmem:[#allocation4 + $0x648] sm:$0xf]  ;;  %v5891_v35 = vld [vmem:[#allocation4 + $0x9f4] sm:$0xf0]  ;;  %v4683_v46 = vor.u32 %v5807_v29, %v4682_v27 }
 0x107   :  { %2810 = vmatpush.bf16.msrb.mxu3 %v4475_v15  ;;  %2834 = vmatpush.bf16.msrb.mxu1 %v4763_v18  ;;  %v5775_v15 = vld [vmem:[#allocation4 + $0x654] sm:$0xf0]  ;;  %v2558_v18 = vadd.f32 %v2557_v8, %v2545_v7  ;;  %v5018_v33 = vld [vmem:[#allocation4 + $0x9e8] sm:$0xf] }
 0x108   :  { %v4555_v37 = vor.u32 %v5775_v15, %v4554_v14  ;;  %v5771_v44 = vld [vmem:[#allocation4 + $0x634] sm:$0xf0]  ;;  %v5019_v52 = vor.u32 %v5891_v35, %v5018_v33  ;;  %v4666_v53 = vld [vmem:[#allocation4 + $0x728] sm:$0xf]  ;;  %v3852_v33 = vld [vmem:[#allocation4 + $0xd8] sm:$0xf0] }
 0x109   :  { %2822 = vmatpush.bf16.msrb.mxu0 %v4619_v22  ;;  %v5703_v22 = vld [vmem:[#allocation4 + $0x414] sm:$0xf0]  ;;  %v4874_v55 = vld [vmem:[#allocation4 + $0x8c8] sm:$0xf] }
 0x10a   :  { %2798 = vmatpush.bf16.msrb.mxu2 %v4331_v30  ;;  %v4890_v30 = vld [vmem:[#allocation4 + $0x8e8] sm:$0xf]  ;;  %v4267_v40 = vor.u32 %v5703_v22, %v4266_v20  ;;  %v5803_v54 = vld [vmem:[#allocation4 + $0x734] sm:$0xf0] }
 0x10b   :  { %2811 = vmatpush.bf16.msrb.mxu3 %v4459_v31  ;;  %2835 = vmatpush.bf16.msrb.mxu1 %v4747_v32  ;;  %v2570_v31 = vpop.f32.mrf.mxu2  ;;  %v5859_v32 = vld [vmem:[#allocation4 + $0x8f4] sm:$0xf0]  ;;  %v5002_v59 = vld [vmem:[#allocation4 + $0x9c8] sm:$0xf] }
 0x10c   :  { %v2571_v36 = vadd.f32 %v2570_v31, %v2558_v18  ;;  %v5855_v58 = vld [vmem:[#allocation4 + $0x8d4] sm:$0xf0]  ;;  %v4858_v8 = vld [vmem:[#allocation4 + $0x8a8] sm:$0xf]  ;;  %v5601_v18 = vld [vmem:[#allocation4 + $0xec] sm:$0xf] }
 0x10d   :  { %2823 = vmatpush.bf16.msrb.mxu0 %v4603_v42  ;;  %v4538_v42 = vld [vmem:[#allocation4 + $0x628] sm:$0xf]  ;;  %v2585_v47 = vpop.f32.mrf.mxu3  ;;  %v5887_v60 = vld [vmem:[#allocation4 + $0x9d4] sm:$0xf0]  ;;  %v4875_v4 = vor.u32 %v5855_v58, %v4874_v55 }
 0x10e   :  { %2799 = vmatpush.bf16.msrb.mxu2 %v4315_v49  ;;  %v2546_v49 = vpop.f32.mrf.mxu0  ;;  %v4539_v57 = vor.u32 %v5771_v44, %v4538_v42  ;;  %v5767_v0 = vld [vmem:[#allocation4 + $0x614] sm:$0xf0]  ;;  %v5003_v5 = vor.u32 %v5887_v60, %v5002_v59  ;;  %v4986_v12 = vld [vmem:[#allocation4 + $0x9a8] sm:$0xf] }
 0x10f   :  { %2812 = vmatpush.bf16.msrb.mxu3 %v4443_v50  ;;  %2836 = vmatpush.bf16.msrb.mxu1 %v4731_v51  ;;  %v6358_v50 = vadd.f32 %v2583_v6, %v2571_v36  ;;  %v4891_v51 = vor.u32 %v5859_v32, %v4890_v30  ;;  %v5923_v3 = vld [vmem:[#allocation4 + $0xaf4] sm:$0xf0]  ;;  %v4650_v6 = vld [vmem:[#allocation4 + $0x708] sm:$0xf]  ;;  %v5597_v32 = vld [vmem:[#allocation4 + $0xcc] sm:$0xf] }
 0x110   :  { %v5799_v7 = vld [vmem:[#allocation4 + $0x714] sm:$0xf0]  ;;  %v4842_v26 = vld [vmem:[#allocation4 + $0x888] sm:$0xf] }
 0x111   :  { %2824 = vmatpush.bf16.msrb.mxu0 %v4587_v56  ;;  %v2559_v56 = vpop.f32.mrf.mxu1  ;;  %v5883_v13 = vld [vmem:[#allocation4 + $0x9b4] sm:$0xf0]  ;;  %v4651_v20 = vor.u32 %v5799_v7, %v4650_v6  ;;  %v4970_v29 = vld [vmem:[#allocation4 + $0x988] sm:$0xf]  ;;  %vm3055_vm2 = vcmp.ge.f32.partialorder %v6358_v50, 0.0 }
 0x112   :  { %2800 = vmatpush.bf16.msrb.mxu2 %v4299_v62  ;;  %v4522_v62 = vld [vmem:[#allocation4 + $0x608] sm:$0xf]  ;;  %v4987_v25 = vor.u32 %v5883_v13, %v4986_v12  ;;  %v5847_v27 = vld [vmem:[#allocation4 + $0x894] sm:$0xf0] }
 0x113   :  { %2813 = vmatpush.bf16.msrb.mxu3 %v4427_v1  ;;  %2837 = vmatpush.bf16.msrb.mxu1 %v4715_v2  ;;  %v4667_v1 = vor.u32 %v5803_v54, %v4666_v53  ;;  %v5146_v2 = vld [vmem:[#allocation4 + $0xae8] sm:$0xf]  ;;  %v4523_v10 = vor.u32 %v5767_v0, %v4522_v62  ;;  %v2572_v14 = vpop.f32.mrf.mxu2  ;;  %v5879_v30 = vld [vmem:[#allocation4 + $0x994] sm:$0xf0]  ;;  %v3836_v53 = vld [vmem:[#allocation4 + $0xb8] sm:$0xf0] }
 0x114   :  { %v5147_v15 = vor.u32 %v5923_v3, %v5146_v2  ;;  %v5114_v35 = vld [vmem:[#allocation4 + $0xaa8] sm:$0xf]  ;;  %v5915_v36 = vld [vmem:[#allocation4 + $0xab4] sm:$0xf0]  ;;  %v4971_v42 = vor.u32 %v5879_v30, %v4970_v29  ;;  %v5589_v3 = vld [vmem:[#allocation4 + $0x8c] sm:$0xf] }
 0x115   :  { %2825 = vmatpush.bf16.msrb.mxu0 %v4571_v11  ;;  %v5851_v11 = vld [vmem:[#allocation4 + $0x8b4] sm:$0xf0]  ;;  %v4826_v44 = vld [vmem:[#allocation4 + $0x868] sm:$0xf] }
 0x116   :  { %2801 = vmatpush.bf16.msrb.mxu2 %v4283_v19  ;;  %v3868_v19 = vld [vmem:[#allocation4 + $0xf8] sm:$0xf0]  ;;  %v4859_v22 = vor.u32 %v5851_v11, %v4858_v8  ;;  %v4954_v47 = vld [vmem:[#allocation4 + $0x968] sm:$0xf]  ;;  %v5875_v49 = vld [vmem:[#allocation4 + $0x974] sm:$0xf0] }
 0x117   :  { %2814 = vmatpush.bf16.msrb.mxu3 %v4411_v21  ;;  %2838 = vmatpush.bf16.msrb.mxu1 %v4699_v48  ;;  %v5130_v21 = vld [vmem:[#allocation4 + $0xac8] sm:$0xf]  ;;  %v5919_v48 = vld [vmem:[#allocation4 + $0xad4] sm:$0xf0] }
 0x118   :  { %v5131_v31 = vor.u32 %v5919_v48, %v5130_v21  ;;  %v5098_v54 = vld [vmem:[#allocation4 + $0xa88] sm:$0xf]  ;;  %v5911_v55 = vld [vmem:[#allocation4 + $0xa94] sm:$0xf0]  ;;  %v3804_v48 = vld [vmem:[#allocation4 + $0x78] sm:$0xf0] }
 0x119   :  { %2826 = vmatpush.bf16.msrb.mxu0 %v4555_v37  ;;  %v3871_v37 = vor.u32 %v5601_v18, %v3868_v19  ;;  %v4810_v58 = vld [vmem:[#allocation4 + $0x848] sm:$0xf]  ;;  %v5839_v59 = vld [vmem:[#allocation4 + $0x854] sm:$0xf0]  ;;  %v5099_v2 = vor.u32 %v5911_v55, %v5098_v54  ;;  %v5585_v19 = vld [vmem:[#allocation4 + $0x6c] sm:$0xf] }
 0x11a   :  { %2802 = vmatpush.bf16.msrb.mxu2 %v4267_v40  ;;  %v4843_v40 = vor.u32 %v5847_v27, %v4842_v26  ;;  %v4938_v62 = vld [vmem:[#allocation4 + $0x948] sm:$0xf]  ;;  %v5871_v0 = vld [vmem:[#allocation4 + $0x954] sm:$0xf0]  ;;  %v4811_v7 = vor.u32 %v5839_v59, %v4810_v58 }
 0x11b   :  { %2815 = vmatpush.bf16.msrb.mxu3 %v4395_v45  ;;  %2839 = vmatpush.bf16.msrb.mxu1 %v4683_v46  ;;  %v3855_v45 = vor.u32 %v5597_v32, %v3852_v33  ;;  %v5843_v46 = vld [vmem:[#allocation4 + $0x874] sm:$0xf0]  ;;  %v4939_v8 = vor.u32 %v5871_v0, %v4938_v62  ;;  %v5066_v26 = vld [vmem:[#allocation4 + $0xa48] sm:$0xf]  ;;  %v3807_v32 = vor.u32 %v5585_v19, %v3804_v48  ;;  %v5577_v62 = vld [vmem:[#allocation4 + $0x2c] sm:$0xf] }
 0x11c   :  { %v4827_v56 = vor.u32 %v5843_v46, %v4826_v44  ;;  %v5907_v6 = vld [vmem:[#allocation4 + $0xa74] sm:$0xf0]  ;;  %v3788_v46 = vld [vmem:[#allocation4 + $0x58] sm:$0xf0]  ;;  %v5625_v48 = vld [vmem:[#allocation4 + $0x1ac] sm:$0xf] }
 0x11d   :  { %2827 = vmatpush.bf16.msrb.mxu0 %v4539_v57  ;;  %2803 = vmatmul.bf16.vlgmr.msrb.gmra.mxu2 %v6308_v38  ;;  %v4955_v57 = vor.u32 %v5875_v49, %v4954_v47  ;;  %v5835_v11 = vld [vmem:[#allocation4 + $0x834] sm:$0xf0]  ;;  %v5633_v47 = vld [vmem:[#allocation4 + $0x1ec] sm:$0xf]  ;;  %v3996_v49 = vld [vmem:[#allocation4 + $0x1f8] sm:$0xf0] }
 0x11e   :  { %2847 = vmatpush.bf16.msra.mxu2 %v4891_v51  ;;  %2816 = vmatmul.bf16.vlgmr.msrb.gmra.mxu3 %v6312_v41  ;;  %v5115_v51 = vor.u32 %v5915_v36, %v5114_v35  ;;  %v5867_v18 = vld [vmem:[#allocation4 + $0x934] sm:$0xf0]  ;;  %v4906_v35 = vld [vmem:[#allocation4 + $0x908] sm:$0xf]  ;;  %v3772_v0 = vld [vmem:[#allocation4 + $0x38] sm:$0xf0] }
 0x11f   :  { %2860 = vmatpush.bf16.msra.mxu3 %v5019_v52  ;;  %2840 = vmatpush.bf16.msrb.mxu1 %v4667_v1  ;;  %v5593_v52 = vld [vmem:[#allocation4 + $0xac] sm:$0xf]  ;;  %v531_v1 = vperm.slane %v6340_v43, 1  ;;  %v5831_v33 = vld [vmem:[#allocation4 + $0x814] sm:$0xf0] }
 0x120   :  { %v3839_v60 = vor.u32 %v5593_v52, %v3836_v53  ;;  %v5863_v36 = vld [vmem:[#allocation4 + $0x914] sm:$0xf0] }
 0x121   :  { %2828 = vmatpush.bf16.msrb.mxu0 %v4523_v10  ;;  %v4794_v10 = vld [vmem:[#allocation4 + $0x828] sm:$0xf]  ;;  %v2596_v12 = vpop.f32.mrf.mxu3  ;;  %v2609_v13 = vpop.f32.mrf.mxu0  ;;  %v5899_v52 = vld [vmem:[#allocation4 + $0xa34] sm:$0xf0]  ;;  %v4907_v55 = vor.u32 %v5863_v36, %v4906_v35 }
 0x122   :  { %2848 = vmatpush.bf16.msra.mxu2 %v4875_v4  ;;  %v3820_v4 = vld [vmem:[#allocation4 + $0x98] sm:$0xf0]  ;;  %v2597_v43 = vadd.f32 %v2596_v12, %v531_v1  ;;  %v4795_v29 = vor.u32 %v5835_v11, %v4794_v10  ;;  %v5895_v10 = vld [vmem:[#allocation4 + $0xa14] sm:$0xf0]  ;;  %v5697_v11 = vld [vmem:[#allocation4 + $0x3ec] sm:$0xf] }
 0x123   :  { %2861 = vmatpush.bf16.msra.mxu3 %v5003_v5  ;;  %2841 = vmatpush.bf16.msrb.mxu1 %v4651_v20  ;;  %v5082_v5 = vld [vmem:[#allocation4 + $0xa68] sm:$0xf]  ;;  %v3823_v14 = vor.u32 %v5589_v3, %v3820_v4  ;;  %v2622_v20 = vpop.f32.mrf.mxu1  ;;  %v4252_v12 = vld [vmem:[#allocation4 + $0x3f8] sm:$0xf0] }
 0x124   :  { %2829 = vmatmul.bf16.vlgmr.msrb.gmra.mxu0 %v6305_v34  ;;  %v5083_v21 = vor.u32 %v5907_v6, %v5082_v5  ;;  %v2610_v27 = vadd.f32 %v2609_v13, %v2597_v43  ;;  %v5226_v4 = vld [vmem:[#allocation4 + $0xb88] sm:$0xf]  ;;  %v5943_v5 = vld [vmem:[#allocation4 + $0xb94] sm:$0xf0]  ;;  %v5629_v6 = vld [vmem:[#allocation4 + $0x1cc] sm:$0xf]  ;;  %v3775_v13 = vor.u32 %v5577_v62, %v3772_v0 }
 0x125   :  { %2873 = vmatpush.bf16.msra.mxu0 %v5147_v15  ;;  %v4922_v15 = vld [vmem:[#allocation4 + $0x928] sm:$0xf]  ;;  %v4348_v62 = vld [vmem:[#allocation4 + $0x4b8] sm:$0xf0] }
 0x126   :  { %2849 = vmatpush.bf16.msra.mxu2 %v4859_v22  ;;  %2842 = vmatmul.bf16.vlgmr.msrb.gmra.mxu1 %v6310_v39  ;;  %v5242_v22 = vld [vmem:[#allocation4 + $0xba8] sm:$0xf]  ;;  %v4923_v30 = vor.u32 %v5867_v18, %v4922_v15  ;;  %v5573_v15 = vld [vmem:[#allocation4 + $0xc] sm:$0xf]  ;;  %v3756_v18 = vld [vmem:[#allocation4 + $0x18] sm:$0xf0] }
 0x127   :  { %2862 = vmatpush.bf16.msra.mxu3 %v4987_v25  ;;  %2899 = vmatpush.bf16.msra.mxu1 %v3871_v37  ;;  %v5947_v25 = vld [vmem:[#allocation4 + $0xbb4] sm:$0x30]  ;;  %v5194_v36 = vld [vmem:[#allocation4 + $0xb48] sm:$0xf] }
 0x128   :  { %v5903_v37 = vld [vmem:[#allocation4 + $0xa54] sm:$0xf0] }
 0x129   :  { %2874 = vmatpush.bf16.msra.mxu0 %v5131_v31  ;;  %v4778_v31 = vld [vmem:[#allocation4 + $0x808] sm:$0xf]  ;;  %v5067_v44 = vor.u32 %v5903_v37, %v5066_v26  ;;  %v2611_v58 = vpop.f32.mrf.mxu0  ;;  %v5729_v26 = vld [vmem:[#allocation4 + $0x4ec] sm:$0xf]  ;;  %v4380_v37 = vld [vmem:[#allocation4 + $0x4f8] sm:$0xf0] }
 0x12a   :  { %2850 = vmatpush.bf16.msra.mxu2 %v4843_v40  ;;  %v5243_v40 = vor.u32 %v5947_v25, %v5242_v22  ;;  %v2635_v53 = vpop.f32.mrf.mxu2  ;;  %v4779_v54 = vor.u32 %v5831_v33, %v4778_v31  ;;  %v3964_v22 = vld [vmem:[#allocation4 + $0x1b8] sm:$0xf0]  ;;  %v4255_v25 = vor.u32 %v5697_v11, %v4252_v12  ;;  %v5693_v31 = vld [vmem:[#allocation4 + $0x3cc] sm:$0xf]  ;;  %v4383_v35 = vor.u32 %v5729_v26, %v4380_v37 }
 0x12b   :  { %2863 = vmatpush.bf16.msra.mxu3 %v4971_v42  ;;  %2900 = vmatpush.bf16.msra.mxu1 %v3855_v45  ;;  %v2623_v42 = vadd.f32 %v2622_v20, %v2610_v27  ;;  %v5581_v45 = vld [vmem:[#allocation4 + $0x4c] sm:$0xf]  ;;  %v2624_v1 = vpop.f32.mrf.mxu1  ;;  %v5210_v20 = vld [vmem:[#allocation4 + $0xb68] sm:$0xf]  ;;  %v3967_v33 = vor.u32 %v5625_v48, %v3964_v22  ;;  %v4332_v12 = vld [vmem:[#allocation4 + $0x498] sm:$0xf0] }
 0x12c   :  { %v3791_v59 = vor.u32 %v5581_v45, %v3788_v46  ;;  %v5725_v45 = vld [vmem:[#allocation4 + $0x4cc] sm:$0xf]  ;;  %v4364_v46 = vld [vmem:[#allocation4 + $0x4d8] sm:$0xf0] }
 0x12d   :  { %2875 = vmatpush.bf16.msra.mxu0 %v5115_v51  ;;  %v5050_v51 = vld [vmem:[#allocation4 + $0xa28] sm:$0xf]  ;;  %v5617_v58 = vld [vmem:[#allocation4 + $0x16c] sm:$0xf] }
 0x12e   :  { %2851 = vmatpush.bf16.msra.mxu2 %v4827_v56  ;;  %v6365_v56 = vadd.f32 %v2635_v53, %v2623_v42  ;;  %v5051_v3 = vor.u32 %v5899_v52, %v5050_v51  ;;  %v5621_v42 = vld [vmem:[#allocation4 + $0x18c] sm:$0xf]  ;;  %v4220_v52 = vld [vmem:[#allocation4 + $0x3b8] sm:$0xf0] }
 0x12f   :  { %2864 = vmatpush.bf16.msra.mxu3 %v4955_v57  ;;  %2901 = vmatpush.bf16.msra.mxu1 %v3839_v60  ;;  %v2598_v57 = vpop.f32.mrf.mxu3  ;;  %v2426_v60 = vsel %vm2418_vm0, %v5243_v40, 0  ;;  %v5935_v40 = vld [vmem:[#allocation4 + $0xb54] sm:$0xf0]  ;;  %v5689_v51 = vld [vmem:[#allocation4 + $0x3ac] sm:$0xf] }
 0x130   :  { %v5931_v57 = vld [vmem:[#allocation4 + $0xb34] sm:$0xf0]  ;;  %v4223_v0 = vor.u32 %v5689_v51, %v4220_v52  ;;  %v5717_v11 = vld [vmem:[#allocation4 + $0x48c] sm:$0xf]  ;;  %v4300_v51 = vld [vmem:[#allocation4 + $0x458] sm:$0xf0] }
 0x131   :  { %2876 = vmatpush.bf16.msra.mxu0 %v5099_v2  ;;  %v3999_v2 = vor.u32 %v5633_v47, %v3996_v49  ;;  %v5195_v49 = vor.u32 %v5935_v40, %v5194_v36  ;;  %v4335_v48 = vor.u32 %v5717_v11, %v4332_v12  ;;  %v5609_v22 = vld [vmem:[#allocation4 + $0x12c] sm:$0xf]  ;;  %v4172_v40 = vld [vmem:[#allocation4 + $0x358] sm:$0xf0] }
 0x132   :  { %2852 = vmatpush.bf16.msra.mxu2 %v4811_v7  ;;  %v3980_v7 = vld [vmem:[#allocation4 + $0x1d8] sm:$0xf0]  ;;  %v2637_v27 = vpop.f32.mrf.mxu2  ;;  %v5677_v36 = vld [vmem:[#allocation4 + $0x34c] sm:$0xf] }
 0x133   :  { %2865 = vmatpush.bf16.msra.mxu3 %v4939_v8  ;;  %2902 = vmatpush.bf16.msra.mxu1 %v3823_v14  ;;  %v5034_v8 = vld [vmem:[#allocation4 + $0xa08] sm:$0xf]  ;;  %v5227_v14 = vor.u32 %v5943_v5, %v5226_v4  ;;  %v3983_v19 = vor.u32 %v5629_v6, %v3980_v7  ;;  %v5927_v7 = vld [vmem:[#allocation4 + $0xb14] sm:$0xf0]  ;;  %v3900_v27 = vld [vmem:[#allocation4 + $0x138] sm:$0xf0] }
 0x134   :  { %v5035_v43 = vor.u32 %v5895_v10, %v5034_v8  ;;  %v5162_v6 = vld [vmem:[#allocation4 + $0xb08] sm:$0xf]  ;;  %v5613_v8 = vld [vmem:[#allocation4 + $0x14c] sm:$0xf]  ;;  %v3916_v10 = vld [vmem:[#allocation4 + $0x158] sm:$0xf0] }
 0x135   :  { %2877 = vmatpush.bf16.msra.mxu0 %v5083_v21  ;;  %v5939_v21 = vld [vmem:[#allocation4 + $0xb74] sm:$0xf0]  ;;  %v5657_v52 = vld [vmem:[#allocation4 + $0x2ac] sm:$0xf]  ;;  %v4076_v11 = vld [vmem:[#allocation4 + $0x298] sm:$0xf0] }
 0x136   :  { %2853 = vmatpush.bf16.msra.mxu2 %v4795_v29  ;;  %v3759_v29 = vor.u32 %v5573_v15, %v3756_v18  ;;  %v4124_v15 = vld [vmem:[#allocation4 + $0x2f8] sm:$0xf0]  ;;  %v5757_v12 = vld [vmem:[#allocation4 + $0x5cc] sm:$0xf] }
 0x137   :  { %2866 = vmatpush.bf16.msra.mxu3 %v4923_v30  ;;  %2903 = vmatpush.bf16.msra.mxu1 %v3807_v32  ;;  %v5211_v30 = vor.u32 %v5939_v21, %v5210_v20  ;;  %v4236_v32 = vld [vmem:[#allocation4 + $0x3d8] sm:$0xf0]  ;;  %v3919_v21 = vor.u32 %v5613_v8, %v3916_v10  ;;  %v5653_v8 = vld [vmem:[#allocation4 + $0x28c] sm:$0xf] }
 0x138   :  { %v4239_v47 = vor.u32 %v5693_v31, %v4236_v32  ;;  %v4188_v20 = vld [vmem:[#allocation4 + $0x378] sm:$0xf0] }
 0x139   :  { %2878 = vmatpush.bf16.msra.mxu0 %v5067_v44  ;;  %v3948_v44 = vld [vmem:[#allocation4 + $0x198] sm:$0xf0] }
 0x13a   :  { %2854 = vmatpush.bf16.msra.mxu2 %v4779_v54  ;;  %v3951_v53 = vor.u32 %v5621_v42, %v3948_v44  ;;  %v4367_v54 = vor.u32 %v5725_v45, %v4364_v46  ;;  %v3903_v42 = vor.u32 %v5609_v22, %v3900_v27  ;;  %v5605_v45 = vld [vmem:[#allocation4 + $0x10c] sm:$0xf]  ;;  %v3884_v46 = vld [vmem:[#allocation4 + $0x118] sm:$0xf0] }
 0x13b   :  { %2867 = vmatpush.bf16.msra.mxu3 %v4907_v55  ;;  %2904 = vmatpush.bf16.msra.mxu1 %v3791_v59  ;;  %v5178_v55 = vld [vmem:[#allocation4 + $0xb28] sm:$0xf]  ;;  %v3932_v59 = vld [vmem:[#allocation4 + $0x178] sm:$0xf0]  ;;  %v5649_v22 = vld [vmem:[#allocation4 + $0x26c] sm:$0xf] }
 0x13c   :  { %v5179_v1 = vor.u32 %v5931_v57, %v5178_v55  ;;  %v3935_v4 = vor.u32 %v5617_v58, %v3932_v59  ;;  %v5761_v55 = vld [vmem:[#allocation4 + $0x5ec] sm:$0xf]  ;;  %v4508_v57 = vld [vmem:[#allocation4 + $0x5f8] sm:$0xf0] }
 0x13d   :  { %2879 = vmatpush.bf16.msra.mxu0 %v5051_v3  ;;  %2855 = vmatmul.bf16.vlgmr.msra.gmra.mxu2 %v6322_v23  ;;  %v4204_v3 = vld [vmem:[#allocation4 + $0x398] sm:$0xf0] }
 0x13e   :  { %2912 = vmatpush.bf16.msrb.mxu2 %v3999_v2  ;;  %2868 = vmatmul.bf16.vlgmr.msra.gmra.mxu3 %v6326_v28  ;;  %v5685_v2 = vld [vmem:[#allocation4 + $0x38c] sm:$0xf]  ;;  %v4476_v27 = vld [vmem:[#allocation4 + $0x5b8] sm:$0xf0] }
 0x13f   :  { %2888 = vmatpush.bf16.msrb.mxu3 %v2426_v60  ;;  %2905 = vmatpush.bf16.msra.mxu1 %v3775_v13  ;;  %v5721_v60 = vld [vmem:[#allocation4 + $0x4ac] sm:$0xf]  ;;  %v4207_v13 = vor.u32 %v5685_v2, %v4204_v3 }
 0x140   :  { %v4351_v5 = vor.u32 %v5721_v60, %v4348_v62  ;;  %v5673_v60 = vld [vmem:[#allocation4 + $0x32c] sm:$0xf]  ;;  %v4156_v62 = vld [vmem:[#allocation4 + $0x338] sm:$0xf0] }
 0x141   :  { %2880 = vmatpush.bf16.msra.mxu0 %v5035_v43  ;;  %v2648_v18 = vpop.f32.mrf.mxu3  ;;  %v5681_v43 = vld [vmem:[#allocation4 + $0x36c] sm:$0xf]  ;;  %v2674_v26 = vpop.f32.mrf.mxu1  ;;  %v4159_v10 = vor.u32 %v5673_v60, %v4156_v62  ;;  %v4028_v62 = vld [vmem:[#allocation4 + $0x238] sm:$0xf0] }
 0x142   :  { %2913 = vmatpush.bf16.msrb.mxu2 %v3983_v19  ;;  %v2649_v19 = vadd.f32 %v2648_v18, %v6365_v56  ;;  %v4191_v32 = vor.u32 %v5681_v43, %v4188_v20  ;;  %v4079_v43 = vor.u32 %v5653_v8, %v4076_v11  ;;  %v4012_v11 = vld [vmem:[#allocation4 + $0x218] sm:$0xf0] }
 0x143   :  { %2889 = vmatpush.bf16.msrb.mxu3 %v5227_v14  ;;  %2906 = vmatpush.bf16.msra.mxu1 %v3759_v29  ;;  %v5665_v14 = vld [vmem:[#allocation4 + $0x2ec] sm:$0xf] }
 0x144   :  { %2881 = vmatmul.bf16.vlgmr.msra.gmra.mxu0 %v6324_v24  ;;  %v4127_v37 = vor.u32 %v5665_v14, %v4124_v15  ;;  %v5713_v29 = vld [vmem:[#allocation4 + $0x46c] sm:$0xf]  ;;  %v4140_v15 = vld [vmem:[#allocation4 + $0x318] sm:$0xf0] }
 0x145   :  { %2938 = vmatpush.bf16.msrb.mxu0 %v4255_v25  ;;  %v2661_v25 = vpop.f32.mrf.mxu0  ;;  %v5669_v14 = vld [vmem:[#allocation4 + $0x30c] sm:$0xf] }
 0x146   :  { %2914 = vmatpush.bf16.msrb.mxu2 %v3967_v33  ;;  %2907 = vmatmul.bf16.vlgmr.msra.gmra.mxu1 %v6296_v9  ;;  %v5163_v9 = vor.u32 %v5927_v7, %v5162_v6  ;;  %v2662_v31 = vadd.f32 %v2661_v25, %v2649_v19  ;;  %v5661_v33 = vld [vmem:[#allocation4 + $0x2cc] sm:$0xf]  ;;  %v4284_v7 = vld [vmem:[#allocation4 + $0x438] sm:$0xf0]  ;;  %v4143_v25 = vor.u32 %v5669_v14, %v4140_v15 }
 0x147   :  { %2890 = vmatpush.bf16.msrb.mxu3 %v5211_v30  ;;  %2951 = vmatpush.bf16.msrb.mxu1 %v4383_v35  ;;  %v4316_v30 = vld [vmem:[#allocation4 + $0x478] sm:$0xf0]  ;;  %v5705_v6 = vld [vmem:[#allocation4 + $0x42c] sm:$0xf] }
 0x148   :  { %v4108_v35 = vld [vmem:[#allocation4 + $0x2d8] sm:$0xf0]  ;;  %v6373_v56 = vadd.f32 %v2674_v26, %v2662_v31  ;;  %v4319_v44 = vor.u32 %v5713_v29, %v4316_v30  ;;  %v4287_v18 = vor.u32 %v5705_v6, %v4284_v7  ;;  %v5857_v30 = vld [vmem:[#allocation4 + $0x8ec] sm:$0xf] }
 0x149   :  { %2939 = vmatpush.bf16.msrb.mxu0 %v4239_v47  ;;  %v4111_v47 = vor.u32 %v5661_v33, %v4108_v35  ;;  %v2650_v58 = vpop.f32.mrf.mxu3  ;;  %v2676_v3 = vpop.f32.mrf.mxu1  ;;  %v4764_v19 = vld [vmem:[#allocation4 + $0x7f8] sm:$0xf0]  ;;  %v5821_v35 = vld [vmem:[#allocation4 + $0x7cc] sm:$0xf] }
 0x14a   :  { %2915 = vmatpush.bf16.msrb.mxu2 %v3951_v53  ;;  %v4175_v53 = vor.u32 %v5677_v36, %v4172_v40  ;;  %v6377_v59 = vpop.f32.mrf.mxu2  ;;  %v4060_v26 = vld [vmem:[#allocation4 + $0x278] sm:$0xf0]  ;;  %v5641_v58 = vld [vmem:[#allocation4 + $0x22c] sm:$0xf] }
 0x14b   :  { %2891 = vmatpush.bf16.msrb.mxu3 %v5195_v49  ;;  %2952 = vmatpush.bf16.msrb.mxu1 %v4367_v54  ;;  %v5709_v49 = vld [vmem:[#allocation4 + $0x44c] sm:$0xf]  ;;  %v4092_v54 = vld [vmem:[#allocation4 + $0x2b8] sm:$0xf0]  ;;  %v4063_v40 = vor.u32 %v5649_v22, %v4060_v26  ;;  %v4031_v7 = vor.u32 %v5641_v58, %v4028_v62 }
 0x14c   :  { %v4892_v31 = vld [vmem:[#allocation4 + $0x8f8] sm:$0xf0]  ;;  %v5849_v3 = vld [vmem:[#allocation4 + $0x8ac] sm:$0xf] }
 0x14d   :  { %2940 = vmatpush.bf16.msrb.mxu0 %v4223_v0  ;;  %v3887_v0 = vor.u32 %v5605_v45, %v3884_v46  ;;  %v2663_v2 = vpop.f32.mrf.mxu0  ;;  %v4748_v36 = vld [vmem:[#allocation4 + $0x7d8] sm:$0xf0]  ;;  %v4895_v45 = vor.u32 %v5857_v30, %v4892_v31  ;;  %v5845_v15 = vld [vmem:[#allocation4 + $0x88c] sm:$0xf] }
 0x14e   :  { %2916 = vmatpush.bf16.msrb.mxu2 %v3935_v4  ;;  %v4095_v4 = vor.u32 %v5657_v52, %v4092_v54  ;;  %v4044_v46 = vld [vmem:[#allocation4 + $0x258] sm:$0xf0]  ;;  %v5853_v52 = vld [vmem:[#allocation4 + $0x8cc] sm:$0xf] }
 0x14f   :  { %2892 = vmatpush.bf16.msrb.mxu3 %v5179_v1  ;;  %2953 = vmatpush.bf16.msrb.mxu1 %v4351_v5  ;;  %v4303_v1 = vor.u32 %v5709_v49, %v4300_v51  ;;  %v4511_v5 = vor.u32 %v5761_v55, %v4508_v57  ;;  %v4460_v49 = vld [vmem:[#allocation4 + $0x598] sm:$0xf0]  ;;  %v4751_v51 = vor.u32 %v5821_v35, %v4748_v36  ;;  %v5841_v31 = vld [vmem:[#allocation4 + $0x86c] sm:$0xf] }
 0x150   :  { %v4732_v54 = vld [vmem:[#allocation4 + $0x7b8] sm:$0xf0]  ;;  %v5789_v35 = vld [vmem:[#allocation4 + $0x6cc] sm:$0xf] }
 0x151   :  { %2941 = vmatpush.bf16.msrb.mxu0 %v4207_v13  ;;  %v4492_v13 = vld [vmem:[#allocation4 + $0x5d8] sm:$0xf0] }
 0x152   :  { %2917 = vmatpush.bf16.msrb.mxu2 %v3919_v21  ;;  %v4495_v20 = vor.u32 %v5757_v12, %v4492_v13  ;;  %v5701_v21 = vld [vmem:[#allocation4 + $0x40c] sm:$0xf]  ;;  %v4716_v6 = vld [vmem:[#allocation4 + $0x798] sm:$0xf0] }
 0x153   :  { %2893 = vmatpush.bf16.msrb.mxu3 %v5163_v9  ;;  %2954 = vmatpush.bf16.msrb.mxu1 %v4335_v48  ;;  %v5825_v9 = vld [vmem:[#allocation4 + $0x7ec] sm:$0xf]  ;;  %v4268_v48 = vld [vmem:[#allocation4 + $0x418] sm:$0xf0] }
 0x154   :  { %v4767_v29 = vor.u32 %v5825_v9, %v4764_v19  ;;  %v4271_v33 = vor.u32 %v5701_v21, %v4268_v48  ;;  %v5741_v13 = vld [vmem:[#allocation4 + $0x54c] sm:$0xf]  ;;  %v4428_v14 = vld [vmem:[#allocation4 + $0x558] sm:$0xf0] }
 0x155   :  { %2942 = vmatpush.bf16.msrb.mxu0 %v4191_v32  ;;  %v2689_v32 = vpop.f32.mrf.mxu2  ;;  %v4844_v9 = vld [vmem:[#allocation4 + $0x898] sm:$0xf0]  ;;  %v5793_v19 = vld [vmem:[#allocation4 + $0x6ec] sm:$0xf] }
 0x156   :  { %5250 = vmatmul.msk.bf16.vlgmr.msrb.gmra.mxu3 %vm2414_vm1, %v6318_v61  ;;  %2918 = vmatpush.bf16.msrb.mxu2 %v3903_v42  ;;  %v4700_v21 = vld [vmem:[#allocation4 + $0x778] sm:$0xf0]  ;;  %v4847_v26 = vor.u32 %v5845_v15, %v4844_v9  ;;  %v5797_v15 = vld [vmem:[#allocation4 + $0x70c] sm:$0xf] }
 0x157   :  { %2925 = vmatpush.bf16.msra.mxu3 %v4127_v37  ;;  %2955 = vmatpush.bf16.msrb.mxu1 %v4319_v44  ;;  %v5753_v37 = vld [vmem:[#allocation4 + $0x5ac] sm:$0xf]  ;;  %v4412_v30 = vld [vmem:[#allocation4 + $0x538] sm:$0xf0] }
 0x158   :  { %v4479_v42 = vor.u32 %v5753_v37, %v4476_v27  ;;  %v5645_v44 = vld [vmem:[#allocation4 + $0x24c] sm:$0xf]  ;;  %v4620_v36 = vld [vmem:[#allocation4 + $0x6d8] sm:$0xf0] }
 0x159   :  { %2943 = vmatpush.bf16.msrb.mxu0 %v4175_v53  ;;  %v4876_v53 = vld [vmem:[#allocation4 + $0x8d8] sm:$0xf0]  ;;  %v4047_v55 = vor.u32 %v5645_v44, %v4044_v46 }
 0x15a   :  { %2919 = vmatpush.bf16.msrb.mxu2 %v3887_v0  ;;  %v4879_v60 = vor.u32 %v5853_v52, %v4876_v53  ;;  %v5745_v0 = vld [vmem:[#allocation4 + $0x56c] sm:$0xf]  ;;  %v4812_v52 = vld [vmem:[#allocation4 + $0x858] sm:$0xf0] }
 0x15b   :  { %2926 = vmatpush.bf16.msra.mxu3 %v4111_v47  ;;  %2956 = vmatpush.bf16.msrb.mxu1 %v4303_v1  ;;  %v5749_v47 = vld [vmem:[#allocation4 + $0x58c] sm:$0xf]  ;;  %v4444_v1 = vld [vmem:[#allocation4 + $0x578] sm:$0xf0] }
 0x15c   :  { %v4463_v57 = vor.u32 %v5749_v47, %v4460_v49  ;;  %v4447_v8 = vor.u32 %v5745_v0, %v4444_v1  ;;  %v4623_v47 = vor.u32 %v5789_v35, %v4620_v36  ;;  %v4396_v49 = vld [vmem:[#allocation4 + $0x518] sm:$0xf0]  ;;  %v5302_v35 = vld [vmem:[#allocation7 + $0x60] sm:$0xf]  ;;  %v5961_v36 = vld [vmem:[#allocation7 + $0x64] sm:$0xf0] }
 0x15d   :  { %2944 = vmatpush.bf16.msrb.mxu0 %v4159_v10  ;;  %2920 = vmatmul.bf16.vlgmr.msrb.gmra.mxu2 %v6300_v17  ;;  %v5817_v17 = vld [vmem:[#allocation4 + $0x7ac] sm:$0xf]  ;;  %v5020_v58 = vld [vmem:[#allocation4 + $0x9f8] sm:$0xf0] }
 0x15e   :  { %2964 = vmatpush.bf16.msra.mxu2 %v4511_v5  ;;  %v4735_v2 = vor.u32 %v5817_v17, %v4732_v54  ;;  %v5813_v5 = vld [vmem:[#allocation4 + $0x78c] sm:$0xf]  ;;  %v4604_v54 = vld [vmem:[#allocation4 + $0x6b8] sm:$0xf0] }
 0x15f   :  { %2927 = vmatpush.bf16.msra.mxu3 %v4095_v4  ;;  %2957 = vmatpush.bf16.msrb.mxu1 %v4287_v18  ;;  %v4860_v4 = vld [vmem:[#allocation4 + $0x8b8] sm:$0xf0]  ;;  %v5637_v10 = vld [vmem:[#allocation4 + $0x20c] sm:$0xf]  ;;  %v4719_v18 = vor.u32 %v5813_v5, %v4716_v6 }
 0x160   :  { %v4863_v12 = vor.u32 %v5849_v3, %v4860_v4  ;;  %v4015_v22 = vor.u32 %v5637_v10, %v4012_v11  ;;  %v5785_v17 = vld [vmem:[#allocation4 + $0x6ac] sm:$0xf]  ;;  %v4668_v62 = vld [vmem:[#allocation4 + $0x738] sm:$0xf0] }
 0x161   :  { %2945 = vmatpush.bf16.msrb.mxu0 %v4143_v25  ;;  %v6386_v48 = vpop.f32.mrf.mxu0  ;;  %v4431_v25 = vor.u32 %v5741_v13, %v4428_v14  ;;  %v4607_v4 = vor.u32 %v5785_v17, %v4604_v54  ;;  %v5833_v5 = vld [vmem:[#allocation4 + $0x82c] sm:$0xf]  ;;  %v4796_v6 = vld [vmem:[#allocation4 + $0x838] sm:$0xf0]  ;;  %v5294_v54 = vld [vmem:[#allocation7 + $0x50] sm:$0xf] }
 0x162   :  { %2965 = vmatpush.bf16.msra.mxu2 %v4495_v20  ;;  %v5809_v20 = vld [vmem:[#allocation4 + $0x76c] sm:$0xf]  ;;  %v5004_v14 = vld [vmem:[#allocation4 + $0x9d8] sm:$0xf0] }
 0x163   :  { %2928 = vmatpush.bf16.msra.mxu3 %v4079_v43  ;;  %2958 = vmatpush.bf16.msrb.mxu1 %v4271_v33  ;;  %v6384_v43 = vpop.f32.mrf.mxu2  ;;  %v6388_v37 = vpop.f32.mrf.mxu1  ;;  %v4703_v32 = vor.u32 %v5809_v20, %v4700_v21  ;;  %v4828_v33 = vld [vmem:[#allocation4 + $0x878] sm:$0xf0]  ;;  %v5781_v11 = vld [vmem:[#allocation4 + $0x68c] sm:$0xf] }
 0x164   :  { %2946 = vmatmul.bf16.vlgmr.msrb.gmra.mxu0 %v6298_v16  ;;  %v6382_v16 = vpop.f32.mrf.mxu3  ;;  %v4831_v46 = vor.u32 %v5841_v31, %v4828_v33  ;;  %v5885_v13 = vld [vmem:[#allocation4 + $0x9cc] sm:$0xf]  ;;  %v5963_v9 = vld [vmem:[#allocation7 + $0x74] sm:$0xf0] }
 0x165   :  { %2990 = vmatpush.bf16.msra.mxu0 %v4767_v29  ;;  %v5737_v29 = vld [vmem:[#allocation4 + $0x52c] sm:$0xf]  ;;  %v4780_v21 = vld [vmem:[#allocation4 + $0x818] sm:$0xf0] }
 0x166   :  { %2966 = vmatpush.bf16.msra.mxu2 %v4479_v42  ;;  %2959 = vmatmul.bf16.vlgmr.msrb.gmra.mxu1 %v6308_v38  ;;  %v4636_v38 = vld [vmem:[#allocation4 + $0x6f8] sm:$0xf0]  ;;  %v4415_v44 = vor.u32 %v5737_v29, %v4412_v30  ;;  %v5829_v20 = vld [vmem:[#allocation4 + $0x80c] sm:$0xf] }
 0x167   :  { %2929 = vmatpush.bf16.msra.mxu3 %v4063_v40  ;;  %3003 = vmatpush.bf16.msra.mxu1 %v4895_v45  ;;  %v4639_v27 = vor.u32 %v5793_v19, %v4636_v38  ;;  %v5805_v40 = vld [vmem:[#allocation4 + $0x74c] sm:$0xf]  ;;  %v4684_v42 = vld [vmem:[#allocation4 + $0x758] sm:$0xf0]  ;;  %v4799_v19 = vor.u32 %v5833_v5, %v4796_v6  ;;  %v2688_v5 = vadd.f32 %v6377_v59, %v6373_v56  ;;  %v5286_v6 = vld [vmem:[#allocation7 + $0x40] sm:$0xf] }
 0x168   :  { %v5733_v45 = vld [vmem:[#allocation4 + $0x50c] sm:$0xf]  ;;  %v4687_v53 = vor.u32 %v5805_v40, %v4684_v42  ;;  %v4988_v30 = vld [vmem:[#allocation4 + $0x9b8] sm:$0xf0]  ;;  %v4783_v40 = vor.u32 %v5829_v20, %v4780_v21  ;;  %v5350_v59 = vld [vmem:[#allocation7 + $0xc0] sm:$0xf] }
 0x169   :  { %2991 = vmatpush.bf16.msra.mxu0 %v4751_v51  ;;  %v5837_v51 = vld [vmem:[#allocation4 + $0x84c] sm:$0xf]  ;;  %v4399_v1 = vor.u32 %v5733_v45, %v4396_v49  ;;  %v5979_v33 = vld [vmem:[#allocation7 + $0xf4] sm:$0xf0] }
 0x16a   :  { %2967 = vmatpush.bf16.msra.mxu2 %v4463_v57  ;;  %v4815_v3 = vor.u32 %v5837_v51, %v4812_v52  ;;  %v5881_v29 = vld [vmem:[#allocation4 + $0x9ac] sm:$0xf]  ;;  %v4972_v51 = vld [vmem:[#allocation4 + $0x998] sm:$0xf0]  ;;  %v5303_v52 = vor.u32 %v5961_v36, %v5302_v35 }
 0x16b   :  { %2930 = vmatpush.bf16.msra.mxu3 %v4047_v55  ;;  %3004 = vmatpush.bf16.msra.mxu1 %v4879_v60  ;;  %v5889_v55 = vld [vmem:[#allocation4 + $0x9ec] sm:$0xf]  ;;  %v2741_v0 = vpop.f32.mrf.mxu2 }
 0x16c   :  { %v2702_v57 = vpop.f32.mrf.mxu3  ;;  %v5801_v60 = vld [vmem:[#allocation4 + $0x72c] sm:$0xf] }
 0x16d   :  { %2992 = vmatpush.bf16.msra.mxu0 %v4735_v2  ;;  %v2715_v2 = vpop.f32.mrf.mxu0  ;;  %v4671_v10 = vor.u32 %v5801_v60, %v4668_v62  ;;  %v5877_v49 = vld [vmem:[#allocation4 + $0x98c] sm:$0xf]  ;;  %v4540_v62 = vld [vmem:[#allocation4 + $0x638] sm:$0xf0] }
 0x16e   :  { %2968 = vmatpush.bf16.msra.mxu2 %v4447_v8  ;;  %v5023_v8 = vor.u32 %v5889_v55, %v5020_v58  ;;  %v5977_v17 = vld [vmem:[#allocation7 + $0xe4] sm:$0xf0]  ;;  %v4975_v57 = vor.u32 %v5877_v49, %v4972_v51 }
 0x16f   :  { %2931 = vmatpush.bf16.msra.mxu3 %v4031_v7  ;;  %3005 = vmatpush.bf16.msra.mxu1 %v4863_v12  ;;  %v2728_v7 = vpop.f32.mrf.mxu1  ;;  %v4588_v12 = vld [vmem:[#allocation4 + $0x698] sm:$0xf0]  ;;  %v5769_v60 = vld [vmem:[#allocation4 + $0x62c] sm:$0xf] }
 0x170   :  { %v4591_v38 = vor.u32 %v5781_v11, %v4588_v12  ;;  %v5873_v0 = vld [vmem:[#allocation4 + $0x96c] sm:$0xf]  ;;  %v2701_v11 = vadd.f32 %v6382_v16, %v2688_v5 }
 0x171   :  { %2993 = vmatpush.bf16.msra.mxu0 %v4719_v18  ;;  %v5310_v18 = vld [vmem:[#allocation7 + $0x70] sm:$0xf]  ;;  %v5957_v7 = vld [vmem:[#allocation7 + $0x44] sm:$0xf0] }
 0x172   :  { %2969 = vmatpush.bf16.msra.mxu2 %v4431_v25  ;;  %v5311_v31 = vor.u32 %v5963_v9, %v5310_v18  ;;  %v5287_v56 = vor.u32 %v5957_v7, %v5286_v6  ;;  %v5973_v18 = vld [vmem:[#allocation7 + $0xc4] sm:$0xf0]  ;;  %v2714_v21 = vadd.f32 %v6386_v48, %v2701_v11  ;;  %v5967_v6 = vld [vmem:[#allocation7 + $0x94] sm:$0xf0] }
 0x173   :  { %2932 = vmatpush.bf16.msra.mxu3 %v4015_v22  ;;  %3006 = vmatpush.bf16.msra.mxu1 %v4847_v26  ;;  %v5007_v22 = vor.u32 %v5885_v13, %v5004_v14  ;;  %v5777_v26 = vld [vmem:[#allocation4 + $0x66c] sm:$0xf]  ;;  %v4524_v14 = vld [vmem:[#allocation4 + $0x618] sm:$0xf0] }
 0x174   :  { %v5921_v9 = vld [vmem:[#allocation4 + $0xaec] sm:$0xf] }
 0x175   :  { %2994 = vmatpush.bf16.msra.mxu0 %v4703_v32  ;;  %v5374_v32 = vld [vmem:[#allocation7 + $0xf0] sm:$0xf]  ;;  %v5945_v48 = vld [vmem:[#allocation4 + $0xbac] sm:$0xf] }
 0x176   :  { %2933 = vmatmul.bf16.vlgmr.msra.gmra.mxu3 %v6293_v63  ;;  %2970 = vmatpush.bf16.msra.mxu2 %v4415_v44  ;;  %v4652_v63 = vld [vmem:[#allocation4 + $0x718] sm:$0xf0]  ;;  %v4991_v44 = vor.u32 %v5881_v29, %v4988_v30  ;;  %v5375_v45 = vor.u32 %v5979_v33, %v5374_v32  ;;  %v5917_v33 = vld [vmem:[#allocation4 + $0xacc] sm:$0xf] }
 0x177   :  { %2977 = vmatpush.bf16.msrb.mxu3 %v4639_v27  ;;  %3007 = vmatpush.bf16.msra.mxu1 %v4831_v46  ;;  %v4655_v25 = vor.u32 %v5797_v15, %v4652_v63  ;;  %v4572_v27 = vld [vmem:[#allocation4 + $0x678] sm:$0xf0]  ;;  %v5773_v46 = vld [vmem:[#allocation4 + $0x64c] sm:$0xf] }
 0x178   :  { %v4575_v42 = vor.u32 %v5777_v26, %v4572_v27  ;;  %v5869_v15 = vld [vmem:[#allocation4 + $0x94c] sm:$0xf]  ;;  %v4940_v63 = vld [vmem:[#allocation4 + $0x958] sm:$0xf0] }
 0x179   :  { %2995 = vmatpush.bf16.msra.mxu0 %v4687_v53  ;;  %v5366_v53 = vld [vmem:[#allocation7 + $0xe0] sm:$0xf]  ;;  %v5865_v26 = vld [vmem:[#allocation4 + $0x92c] sm:$0xf]  ;;  %v4924_v27 = vld [vmem:[#allocation4 + $0x938] sm:$0xf0] }
 0x17a   :  { %2971 = vmatpush.bf16.msra.mxu2 %v4399_v1  ;;  %v5367_v58 = vor.u32 %v5977_v17, %v5366_v53  ;;  %v4956_v1 = vld [vmem:[#allocation4 + $0x978] sm:$0xf0]  ;;  %v5861_v51 = vld [vmem:[#allocation4 + $0x90c] sm:$0xf] }
 0x17b   :  { %2978 = vmatpush.bf16.msrb.mxu3 %v4623_v47  ;;  %3008 = vmatpush.bf16.msra.mxu1 %v4815_v3  ;;  %v4556_v47 = vld [vmem:[#allocation4 + $0x658] sm:$0xf0]  ;;  %v5358_v3 = vld [vmem:[#allocation7 + $0xd0] sm:$0xf]  ;;  %v4959_v12 = vor.u32 %v5873_v0, %v4956_v1  ;;  %v5909_v7 = vld [vmem:[#allocation4 + $0xa8c] sm:$0xf] }
 0x17c   :  { %v4559_v55 = vor.u32 %v5773_v46, %v4556_v47  ;;  %v5971_v32 = vld [vmem:[#allocation7 + $0xb4] sm:$0xf0]  ;;  %v2727_v46 = vadd.f32 %v6388_v37, %v2714_v21  ;;  %v4927_v47 = vor.u32 %v5865_v26, %v4924_v27  ;;  %v5262_v37 = vld [vmem:[#allocation7 + $0x10] sm:$0xf]  ;;  %v5905_v21 = vld [vmem:[#allocation4 + $0xa6c] sm:$0xf] }
 0x17d   :  { %2996 = vmatpush.bf16.msra.mxu0 %v4671_v10  ;;  %2972 = vmatmul.bf16.vlgmr.msra.gmra.mxu2 %v6312_v41  ;;  %v5959_v41 = vld [vmem:[#allocation7 + $0x54] sm:$0xf0]  ;;  %v5765_v10 = vld [vmem:[#allocation4 + $0x60c] sm:$0xf] }
 0x17e   :  { %3016 = vmatpush.bf16.msrb.mxu2 %v5023_v8  ;;  %v5295_v2 = vor.u32 %v5959_v41, %v5294_v54  ;;  %v4543_v8 = vor.u32 %v5769_v60, %v4540_v62  ;;  %v4527_v16 = vor.u32 %v5765_v10, %v4524_v14  ;;  %v4908_v53 = vld [vmem:[#allocation4 + $0x918] sm:$0xf0]  ;;  %v5334_v54 = vld [vmem:[#allocation7 + $0xa0] sm:$0xf]  ;;  %v5969_v41 = vld [vmem:[#allocation7 + $0xa4] sm:$0xf0]  ;;  %v2740_v1 = vadd.f32 %v6384_v43, %v2727_v46 }
 0x17f   :  { %2979 = vmatpush.bf16.msrb.mxu3 %v4607_v4  ;;  %3009 = vmatpush.bf16.msra.mxu1 %v4799_v19  ;;  %v5975_v4 = vld [vmem:[#allocation7 + $0xd4] sm:$0xf0]  ;;  %v5278_v19 = vld [vmem:[#allocation7 + $0x30] sm:$0xf]  ;;  %v3059_v14 = vmul.f32 0.01, %v6358_v50 }
 0x180   :  { %v5359_v13 = vor.u32 %v5975_v4, %v5358_v3  ;;  %v5951_v0 = vld [vmem:[#allocation7 + $0x14] sm:$0xf0]  ;;  %v5335_v3 = vor.u32 %v5969_v41, %v5334_v54  ;;  %v5326_v4 = vld [vmem:[#allocation7 + $0x90] sm:$0xf]  ;;  %v5937_v26 = vld [vmem:[#allocation4 + $0xb6c] sm:$0xf] }
 0x181   :  { %2997 = vmatpush.bf16.msra.mxu0 %v4655_v25  ;;  %v6399_v20 = vpop.f32.mrf.mxu3  ;;  %v5351_v25 = vor.u32 %v5973_v18, %v5350_v59  ;;  %v6402_v35 = vpop.f32.mrf.mxu0  ;;  %v5228_v43 = vld [vmem:[#allocation4 + $0xb98] sm:$0xf0]  ;;  %v5327_v59 = vor.u32 %v5967_v6, %v5326_v4  ;;  %v5962_v18 = vld [vmem:[#allocation7 + $0x74] sm:$0xf]  ;;  %vm3056_vm3 = vcmp.ge.f32.partialorder %v2740_v1, 0.0 }
 0x182   :  { %3017 = vmatpush.bf16.msrb.mxu2 %v5007_v22  ;;  %v4943_v22 = vor.u32 %v5869_v15, %v4940_v63  ;;  %v5254_v15 = vld [vmem:[#allocation7] sm:$0xf]  ;;  %v5949_v63 = vld [vmem:[#allocation7 + $0x4] sm:$0xf0]  ;;  %v5212_v27 = vld [vmem:[#allocation4 + $0xb78] sm:$0xf0] }
 0x183   :  { %2980 = vmatpush.bf16.msrb.mxu3 %v4591_v38  ;;  %3010 = vmatpush.bf16.msra.mxu1 %v4783_v40  ;;  %v6397_v38 = vpop.f32.mrf.mxu2  ;;  %v6404_v36 = vpop.f32.mrf.mxu1  ;;  %v5132_v40 = vld [vmem:[#allocation4 + $0xad8] sm:$0xf0]  ;;  %v5958_v41 = vld [vmem:[#allocation7 + $0x54] sm:$0xf]  ;;  %v5360_v4 = vld [vmem:[#allocation7 + $0xd8] sm:$0xf0] }
 0x184   :  { %2998 = vmatmul.bf16.vlgmr.msra.gmra.mxu0 %v6310_v39  ;;  %v5148_v39 = vld [vmem:[#allocation4 + $0xaf8] sm:$0xf0]  ;;  %v5288_v6 = vld [vmem:[#allocation7 + $0x48] sm:$0xf0] }
 0x185   :  { %3461 = vmatpush.bf16.msrb.mxu0 %v5311_v31  ;;  %v5151_v29 = vor.u32 %v5921_v9, %v5148_v39  ;;  %v5342_v31 = vld [vmem:[#allocation7 + $0xb0] sm:$0xf]  ;;  %v5312_v9 = vld [vmem:[#allocation7 + $0x78] sm:$0xf0] }
 0x186   :  { %3018 = vmatpush.bf16.msrb.mxu2 %v4991_v44  ;;  %3011 = vmatmul.bf16.vlgmr.msra.gmra.mxu1 %v6322_v23  ;;  %v5955_v23 = vld [vmem:[#allocation7 + $0x34] sm:$0xf0]  ;;  %v5953_v44 = vld [vmem:[#allocation7 + $0x24] sm:$0xf0]  ;;  %v5343_v49 = vor.u32 %v5971_v32, %v5342_v31  ;;  %v5376_v31 = vld [vmem:[#allocation7 + $0xf8] sm:$0xf0] }
 0x187   :  { %2981 = vmatpush.bf16.msrb.mxu3 %v4575_v42  ;;  %3474 = vmatpush.bf16.msrb.mxu1 %v5375_v45  ;;  %v5279_v30 = vor.u32 %v5955_v23, %v5278_v19  ;;  %v5270_v42 = vld [vmem:[#allocation7 + $0x20] sm:$0xf]  ;;  %v5244_v45 = vld [vmem:[#allocation4 + $0xbb8] sm:$0x30] }
 0x188   :  { %v5271_v17 = vor.u32 %v5953_v44, %v5270_v42  ;;  %v5318_v23 = vld [vmem:[#allocation7 + $0x80] sm:$0xf]  ;;  %v3063_v42 = vsel %vm3055_vm2, %v6358_v50, %v3059_v14  ;;  %v5296_v50 = vld [vmem:[#allocation7 + $0x58] sm:$0xf0] }
 0x189   :  { %3462 = vmatpush.bf16.msrb.mxu0 %v5303_v52  ;;  %v5135_v52 = vor.u32 %v5917_v33, %v5132_v40  ;;  %v2767_v62 = vpop.f32.mrf.mxu3  ;;  %v5960_v33 = vld [vmem:[#allocation7 + $0x64] sm:$0xf]  ;;  %v5304_v40 = vld [vmem:[#allocation7 + $0x68] sm:$0xf0]  ;;  %v6416_v54 = vpack.c.bf16 %v3063_v42, %v3063_v42 }
 0x18a   :  { %3019 = vmatpush.bf16.msrb.mxu2 %v4975_v57  ;;  %v5116_v57 = vld [vmem:[#allocation4 + $0xab8] sm:$0xf0] }
 0x18b   :  { %2982 = vmatpush.bf16.msrb.mxu3 %v4559_v55  ;;  %3475 = vmatpush.bf16.msrb.mxu1 %v5367_v58  ;;  %v5913_v55 = vld [vmem:[#allocation4 + $0xaac] sm:$0xf]  ;;  %v5247_v58 = vor.u32 %v5945_v48, %v5244_v45  ;;  %v2754_v60 = vpop.f32.mrf.mxu2  ;;  %v2793_v10 = vpop.f32.mrf.mxu1  ;;  %v5215_v48 = vor.u32 %v5937_v26, %v5212_v27 }
 0x18c   :  { %v5119_v5 = vor.u32 %v5913_v55, %v5116_v57  ;;  %v5901_v45 = vld [vmem:[#allocation4 + $0xa4c] sm:$0xf]  ;;  %v5036_v10 = vld [vmem:[#allocation4 + $0xa18] sm:$0xf0] }
 0x18d   :  { %3463 = vmatpush.bf16.msrb.mxu0 %v5295_v2  ;;  %v4911_v2 = vor.u32 %v5861_v51, %v4908_v53  ;;  %v2429_v11 = vsel %vm2418_vm0, %v5247_v58, 0  ;;  %v5196_v51 = vld [vmem:[#allocation4 + $0xb58] sm:$0xf0]  ;;  %v5976_v53 = vld [vmem:[#allocation7 + $0xe4] sm:$0xf] }
 0x18e   :  { %3020 = vmatpush.bf16.msrb.mxu2 %v4959_v12  ;;  %v5263_v12 = vor.u32 %v5951_v0, %v5262_v37  ;;  %v5897_v60 = vld [vmem:[#allocation4 + $0xa2c] sm:$0xf]  ;;  %v5052_v37 = vld [vmem:[#allocation4 + $0xa38] sm:$0xf0] }
 0x18f   :  { %2983 = vmatpush.bf16.msrb.mxu3 %v4543_v8  ;;  %3476 = vmatpush.bf16.msrb.mxu1 %v5359_v13  ;;  %v2780_v8 = vpop.f32.mrf.mxu0  ;;  %v5941_v13 = vld [vmem:[#allocation4 + $0xb8c] sm:$0xf] }
 0x190   :  { %v5231_v19 = vor.u32 %v5941_v13, %v5228_v43  ;;  %v5929_v0 = vld [vmem:[#allocation4 + $0xb2c] sm:$0xf]  ;;  %v5164_v13 = vld [vmem:[#allocation4 + $0xb18] sm:$0xf0]  ;;  %v5972_v43 = vld [vmem:[#allocation7 + $0xc4] sm:$0xf] }
 0x191   :  { %3464 = vmatpush.bf16.msrb.mxu0 %v5287_v56  ;;  %v3060_v56 = vmul.f32 0.01, %v2740_v1  ;;  %v5893_v8 = vld [vmem:[#allocation4 + $0xa0c] sm:$0xf] }
 0x192   :  { %3021 = vmatpush.bf16.msrb.mxu2 %v4943_v22  ;;  %v5255_v22 = vor.u32 %v5949_v63, %v5254_v15  ;;  %v5352_v15 = vld [vmem:[#allocation7 + $0xc8] sm:$0xf0] }
 0x193   :  { %2984 = vmatpush.bf16.msrb.mxu3 %v4527_v16  ;;  %3477 = vmatpush.bf16.msrb.mxu1 %v5351_v25  ;;  %v5965_v16 = vld [vmem:[#allocation7 + $0x84] sm:$0xf0]  ;;  %v5084_v25 = vld [vmem:[#allocation4 + $0xa78] sm:$0xf0]  ;;  %v3064_v46 = vsel %vm3056_vm3, %v2740_v1, %v3060_v56  ;;  %v5438_v56 = vld [vmem:[#allocation7 + $0x170] sm:$0xf] }
 0x194   :  { %v5319_v32 = vor.u32 %v5965_v16, %v5318_v23  ;;  %v5087_v44 = vor.u32 %v5905_v21, %v5084_v25  ;;  %v6418_v55 = vpack.c.bf16 %v3064_v46, %v3064_v46  ;;  %v5180_v1 = vld [vmem:[#allocation4 + $0xb38] sm:$0xf0]  ;;  %v5355_v21 = vor.u32 %v5972_v43, %v5352_v15  ;;  %v5985_v43 = vld [vmem:[#allocation7 + $0x124] sm:$0xf0]  ;;  %v5390_v15 = vld [vmem:[#allocation7 + $0x110] sm:$0xf] }
 0x195   :  { %3465 = vmatpush.bf16.msrb.mxu0 %v5279_v30  ;;  %v5978_v30 = vld [vmem:[#allocation7 + $0xf4] sm:$0xf] }
 0x196   :  { %2985 = vmatmul.bf16.vlgmr.msrb.gmra.mxu3 %v6305_v34  ;;  %3022 = vmatpush.bf16.msrb.mxu2 %v4927_v47  ;;  %v5100_v34 = vld [vmem:[#allocation4 + $0xa98] sm:$0xf0]  ;;  %v5379_v47 = vor.u32 %v5978_v30, %v5376_v31  ;;  %v5430_v30 = vld [vmem:[#allocation7 + $0x160] sm:$0xf]  ;;  %v5993_v31 = vld [vmem:[#allocation7 + $0x164] sm:$0xf0] }
 0x197   :  { %3029 = vmatpush.bf16.msra.mxu3 %v5151_v29  ;;  %3478 = vmatpush.bf16.msrb.mxu1 %v5343_v49  ;;  %v5103_v39 = vor.u32 %v5909_v7, %v5100_v34  ;;  %v5315_v29 = vor.u32 %v5962_v18, %v5312_v9  ;;  %v5933_v49 = vld [vmem:[#allocation4 + $0xb4c] sm:$0xf]  ;;  %v5055_v7 = vor.u32 %v5897_v60, %v5052_v37  ;;  %v5954_v9 = vld [vmem:[#allocation7 + $0x34] sm:$0xf] }
 0x198   :  { %v5199_v58 = vor.u32 %v5933_v49, %v5196_v51  ;;  %v5183_v34 = vor.u32 %v5929_v0, %v5180_v1  ;;  %v5422_v49 = vld [vmem:[#allocation7 + $0x150] sm:$0xf]  ;;  %v5991_v51 = vld [vmem:[#allocation7 + $0x154] sm:$0xf0]  ;;  %v5328_v0 = vld [vmem:[#allocation7 + $0x98] sm:$0xf0] }
 0x199   :  { %3466 = vmatpush.bf16.msrb.mxu0 %v5271_v17  ;;  %v5368_v17 = vld [vmem:[#allocation7 + $0xe8] sm:$0xf0]  ;;  %v5414_v1 = vld [vmem:[#allocation7 + $0x140] sm:$0xf] }
 0x19a   :  { %3023 = vmatpush.bf16.msrb.mxu2 %v4911_v2  ;;  %v5371_v62 = vor.u32 %v5976_v53, %v5368_v17  ;;  %v5299_v2 = vor.u32 %v5958_v41, %v5296_v50  ;;  %v5264_v53 = vld [vmem:[#allocation7 + $0x18] sm:$0xf0] }
 0x19b   :  { %3030 = vmatpush.bf16.msra.mxu3 %v5135_v52  ;;  %3479 = vmatpush.bf16.msrb.mxu1 %v5335_v3  ;;  %v5307_v52 = vor.u32 %v5960_v33, %v5304_v40  ;;  %v5974_v3 = vld [vmem:[#allocation7 + $0xd4] sm:$0xf]  ;;  %v5272_v33 = vld [vmem:[#allocation7 + $0x28] sm:$0xf0]  ;;  %v6430_v40 = vld [vmem:[#allocation6] sm:$0xf] }
 0x19c   :  { %v532_v42 = vperm.slane %v6430_v40, 2 }
 0x19d   :  { %3467 = vmatpush.bf16.msrb.mxu0 %v5263_v12  ;;  %3024 = vmatmul.bf16.vlgmr.msrb.gmra.mxu2 %v6326_v28  ;;  %v5068_v28 = vld [vmem:[#allocation4 + $0xa58] sm:$0xf0]  ;;  %v5925_v12 = vld [vmem:[#allocation4 + $0xb0c] sm:$0xf] }
 0x19e   :  { %3044 = vmatpush.bf16.msra.mxu2 %v2429_v11  ;;  %v5071_v57 = vor.u32 %v5901_v45, %v5068_v28  ;;  %v5363_v11 = vor.u32 %v5974_v3, %v5360_v4  ;;  %v5167_v23 = vor.u32 %v5925_v12, %v5164_v13  ;;  %v5431_v45 = vor.u32 %v5993_v31, %v5430_v30  ;;  %v5256_v3 = vld [vmem:[#allocation7 + $0x8] sm:$0xf0]  ;;  %v5398_v13 = vld [vmem:[#allocation7 + $0x120] sm:$0xf]  ;;  %v5992_v30 = vld [vmem:[#allocation7 + $0x164] sm:$0xf] }
 0x19f   :  { %3031 = vmatpush.bf16.msra.mxu3 %v5119_v5  ;;  %3480 = vmatpush.bf16.msrb.mxu1 %v5327_v59  ;;  %v5956_v5 = vld [vmem:[#allocation7 + $0x44] sm:$0xf]  ;;  %v5995_v59 = vld [vmem:[#allocation7 + $0x174] sm:$0xf0] }
 0x1a0   :  { %v5291_v14 = vor.u32 %v5956_v5, %v5288_v6  ;;  %v6422_v63 = vpop.f32.mrf.mxu2  ;;  %v5439_v26 = vor.u32 %v5995_v59, %v5438_v56  ;;  %v5983_v56 = vld [vmem:[#allocation7 + $0x114] sm:$0xf0] }
 0x1a1   :  { %3468 = vmatpush.bf16.msrb.mxu0 %v5255_v22  ;;  %v6424_v18 = vpop.f32.mrf.mxu3  ;;  %v6426_v16 = vpop.f32.mrf.mxu0  ;;  %v5970_v22 = vld [vmem:[#allocation7 + $0xb4] sm:$0xf] }
 0x1a2   :  { %3045 = vmatpush.bf16.msra.mxu2 %v5231_v19  ;;  %v5039_v19 = vor.u32 %v5893_v8, %v5036_v10  ;;  %v5406_v8 = vld [vmem:[#allocation7 + $0x130] sm:$0xf]  ;;  %v5987_v10 = vld [vmem:[#allocation7 + $0x134] sm:$0xf0] }
 0x1a3   :  { %3032 = vmatpush.bf16.msra.mxu3 %v5103_v39  ;;  %3481 = vmatpush.bf16.msrb.mxu1 %v5319_v32  ;;  %v5280_v39 = vld [vmem:[#allocation7 + $0x38] sm:$0xf0]  ;;  %v6428_v25 = vpop.f32.mrf.mxu1  ;;  %v5952_v32 = vld [vmem:[#allocation7 + $0x24] sm:$0xf]  ;;  %v5407_v12 = vor.u32 %v5987_v10, %v5406_v8 }
 0x1a4   :  { %3469 = vmatmul.bf16.vlgmr.msrb.gmra.mxu0 %v6416_v54  ;;  %v5283_v27 = vor.u32 %v5954_v9, %v5280_v39  ;;  %v5275_v46 = vor.u32 %v5952_v32, %v5272_v33  ;;  %v5391_v9 = vor.u32 %v5983_v56, %v5390_v15  ;;  %v5981_v39 = vld [vmem:[#allocation7 + $0x104] sm:$0xf0]  ;;  %v5990_v33 = vld [vmem:[#allocation7 + $0x154] sm:$0xf] }
 0x1a5   :  { %3513 = vmatpush.bf16.msra.mxu0 %v5315_v29  ;;  %v5344_v29 = vld [vmem:[#allocation7 + $0xb8] sm:$0xf0] }
 0x1a6   :  { %3046 = vmatpush.bf16.msra.mxu2 %v5215_v48  ;;  %3482 = vmatmul.bf16.vlgmr.msrb.gmra.mxu1 %v6418_v55  ;;  %v5968_v48 = vld [vmem:[#allocation7 + $0xa4] sm:$0xf] }
 0x1a7   :  { %3033 = vmatpush.bf16.msra.mxu3 %v5087_v44  ;;  %3526 = vmatpush.bf16.msra.mxu1 %v5379_v47  ;;  %v5347_v44 = vor.u32 %v5970_v22, %v5344_v29  ;;  %v5336_v47 = vld [vmem:[#allocation7 + $0xa8] sm:$0xf0]  ;;  %v5440_v22 = vld [vmem:[#allocation7 + $0x178] sm:$0xf0] }
 0x1a8   :  { %v2806_v28 = vpop.f32.mrf.mxu2  ;;  %v5339_v50 = vor.u32 %v5968_v48, %v5336_v47 }
 0x1a9   :  { %3514 = vmatpush.bf16.msra.mxu0 %v5307_v52  ;;  %v5950_v52 = vld [vmem:[#allocation7 + $0x14] sm:$0xf]  ;;  %v2819_v17 = vpop.f32.mrf.mxu3  ;;  %v2832_v41 = vpop.f32.mrf.mxu0  ;;  %v5988_v28 = vld [vmem:[#allocation7 + $0x144] sm:$0xf] }
 0x1aa   :  { %3047 = vmatpush.bf16.msra.mxu2 %v5199_v58  ;;  %v5423_v58 = vor.u32 %v5991_v51, %v5422_v49  ;;  %v5267_v37 = vor.u32 %v5950_v52, %v5264_v53  ;;  %v5416_v49 = vld [vmem:[#allocation7 + $0x148] sm:$0xf0]  ;;  %v5408_v53 = vld [vmem:[#allocation7 + $0x138] sm:$0xf0] }
 0x1ab   :  { %3034 = vmatpush.bf16.msra.mxu3 %v5071_v57  ;;  %3527 = vmatpush.bf16.msra.mxu1 %v5371_v62  ;;  %v5966_v57 = vld [vmem:[#allocation7 + $0x94] sm:$0xf]  ;;  %v2845_v60 = vpop.f32.mrf.mxu1  ;;  %v2753_v62 = vadd.f32 %v6397_v38, %v532_v42  ;;  %v5424_v42 = vld [vmem:[#allocation7 + $0x158] sm:$0xf0]  ;;  %v5419_v51 = vor.u32 %v5988_v28, %v5416_v49 }
 0x1ac   :  { %v6010_v28 = vld [vmem:[#allocation7 + $0x1f4] sm:$0xf]  ;;  %v5504_v49 = vld [vmem:[#allocation7 + $0x1f8] sm:$0xf0] }
 0x1ad   :  { %3515 = vmatpush.bf16.msra.mxu0 %v5299_v2  ;;  %v5948_v2 = vld [vmem:[#allocation7 + $0x4] sm:$0xf]  ;;  %v2766_v5 = vadd.f32 %v6399_v20, %v2753_v62  ;;  %v5982_v62 = vld [vmem:[#allocation7 + $0x114] sm:$0xf] }
 0x1ae   :  { %3048 = vmatpush.bf16.msra.mxu2 %v5183_v34  ;;  %v5259_v6 = vor.u32 %v5948_v2, %v5256_v3  ;;  %v5320_v34 = vld [vmem:[#allocation7 + $0x88] sm:$0xf0]  ;;  %v5980_v3 = vld [vmem:[#allocation7 + $0x104] sm:$0xf] }
 0x1af   :  { %3035 = vmatpush.bf16.msra.mxu3 %v5055_v7  ;;  %3528 = vmatpush.bf16.msra.mxu1 %v5363_v11  ;;  %v5964_v7 = vld [vmem:[#allocation7 + $0x84] sm:$0xf]  ;;  %v2779_v11 = vadd.f32 %v6402_v35, %v2766_v5  ;;  %v5382_v35 = vld [vmem:[#allocation7 + $0x100] sm:$0xf] }
 0x1b0   :  { %v5323_v38 = vor.u32 %v5964_v7, %v5320_v34  ;;  %v6011_v7 = vld [vmem:[#allocation7 + $0x1f4] sm:$0xf0] }
 0x1b1   :  { %3516 = vmatpush.bf16.msra.mxu0 %v5291_v14  ;;  %v2792_v20 = vadd.f32 %v6404_v36, %v2779_v11  ;;  %v5399_v14 = vor.u32 %v5985_v43, %v5398_v13  ;;  %v5383_v36 = vor.u32 %v5981_v39, %v5382_v35  ;;  %v5494_v11 = vld [vmem:[#allocation7 + $0x1e0] sm:$0xf]  ;;  %v6007_v35 = vld [vmem:[#allocation7 + $0x1d4] sm:$0xf0] }
 0x1b2   :  { %3049 = vmatpush.bf16.msra.mxu2 %v5167_v23 }
 0x1b3   :  { %3036 = vmatpush.bf16.msra.mxu3 %v5039_v19  ;;  %3529 = vmatpush.bf16.msra.mxu1 %v5355_v21  ;;  %v2805_v59 = vadd.f32 %v6422_v63, %v2792_v20  ;;  %v5994_v21 = vld [vmem:[#allocation7 + $0x174] sm:$0xf] }
 0x1b5   :  { %3517 = vmatpush.bf16.msra.mxu0 %v5283_v27  ;;  %5251 = vmatmul.msk.bf16.vlgmr.msra.gmra.mxu2 %vm2414_vm1, %v6318_v61  ;;  %v5331_v61 = vor.u32 %v5966_v57, %v5328_v0  ;;  %v5443_v27 = vor.u32 %v5994_v21, %v5440_v22  ;;  %v5400_v57 = vld [vmem:[#allocation7 + $0x128] sm:$0xf0]  ;;  %v5392_v0 = vld [vmem:[#allocation7 + $0x118] sm:$0xf0]  ;;  %v6005_v21 = vld [vmem:[#allocation7 + $0x1c4] sm:$0xf0] }
 0x1b6   :  { %3487 = vmatpush.bf16.msrb.mxu2 %v5439_v26  ;;  %3037 = vmatmul.bf16.vlgmr.msra.gmra.mxu3 %v6324_v24  ;;  %v5989_v24 = vld [vmem:[#allocation7 + $0x144] sm:$0xf0]  ;;  %v5395_v2 = vor.u32 %v5982_v62, %v5392_v0  ;;  %v6004_v62 = vld [vmem:[#allocation7 + $0x1c4] sm:$0xf]  ;;  %v3135_v0 = vld [vmem:[#allocation9] sm:$0x3] }
 0x1b7   :  { %3530 = vmatpush.bf16.msra.mxu1 %v5347_v44  ;;  %v5415_v4 = vor.u32 %v5989_v24, %v5414_v1 }
 0x1b9   :  { %3518 = vmatpush.bf16.msra.mxu0 %v5275_v46 }
 0x1ba   :  { %3488 = vmatpush.bf16.msrb.mxu2 %v5431_v45  ;;  %v5427_v45 = vor.u32 %v5990_v33, %v5424_v42 }
 0x1bb   :  { %3531 = vmatpush.bf16.msra.mxu1 %v5339_v50  ;;  %v5984_v50 = vld [vmem:[#allocation7 + $0x124] sm:$0xf] }
 0x1bd   :  { %3519 = vmatpush.bf16.msra.mxu0 %v5267_v37 }
 0x1be   :  { %3489 = vmatpush.bf16.msrb.mxu2 %v5423_v58 }
 0x1bf   :  { %3532 = vmatpush.bf16.msra.mxu1 %v5331_v61  ;;  %v5384_v61 = vld [vmem:[#allocation7 + $0x108] sm:$0xf0] }
 0x1c0   :  { %v2856_v19 = vpop.f32.mrf.mxu2  ;;  %v5387_v34 = vor.u32 %v5980_v3, %v5384_v61  ;;  %v5472_v3 = vld [vmem:[#allocation7 + $0x1b8] sm:$0xf0] }
 0x1c1   :  { %3520 = vmatpush.bf16.msra.mxu0 %v5259_v6  ;;  %v2869_v23 = vpop.f32.mrf.mxu3  ;;  %v2882_v26 = vpop.f32.mrf.mxu0  ;;  %v5502_v6 = vld [vmem:[#allocation7 + $0x1f0] sm:$0xf] }
 0x1c2   :  { %3490 = vmatpush.bf16.msrb.mxu2 %v5415_v4  ;;  %v5503_v10 = vor.u32 %v6011_v7, %v5502_v6  ;;  %v6000_v7 = vld [vmem:[#allocation7 + $0x1a4] sm:$0xf] }
 0x1c3   :  { %3533 = vmatpush.bf16.msra.mxu1 %v5323_v38  ;;  %v6444_v29 = vpop.f32.mrf.mxu1 }
 0x1c4   :  { %3521 = vmatmul.bf16.vlgmr.msra.gmra.mxu0 %v6416_v54  ;;  %v2818_v54 = vadd.f32 %v6424_v18, %v2805_v59  ;;  %3500 = vmatpush.bf16.msrb.mxu3 %v5503_v10 }
 0x1c6   :  { %3491 = vmatpush.bf16.msrb.mxu2 %v5407_v12  ;;  %3534 = vmatmul.bf16.vlgmr.msra.gmra.mxu1 %v6418_v55  ;;  %v5432_v55 = vld [vmem:[#allocation7 + $0x168] sm:$0xf0]  ;;  %v2831_v63 = vadd.f32 %v6426_v16, %v2818_v54  ;;  %v5986_v16 = vld [vmem:[#allocation7 + $0x134] sm:$0xf]  ;;  %v6009_v12 = vld [vmem:[#allocation7 + $0x1e4] sm:$0xf0] }
 0x1c7   :  { %v5435_v31 = vor.u32 %v5992_v30, %v5432_v55  ;;  %v5411_v17 = vor.u32 %v5986_v16, %v5408_v53  ;;  %v5495_v13 = vor.u32 %v6009_v12, %v5494_v11  ;;  %v6003_v30 = vld [vmem:[#allocation7 + $0x1b4] sm:$0xf0]  ;;  %v5507_v53 = vor.u32 %v6010_v28, %v5504_v49  ;;  %v5998_v12 = vld [vmem:[#allocation7 + $0x194] sm:$0xf]  ;;  %v6017_v28 = vld [vmem:[#allocation10 + $0x28] sm:$0xff] }
 0x1c8   :  { %v2858_v44 = vpop.f32.mrf.mxu2  ;;  %v2844_v48 = vadd.f32 %v6428_v25, %v2831_v63  ;;  %v5403_v25 = vor.u32 %v5984_v50, %v5400_v57  ;;  %v6006_v57 = vld [vmem:[#allocation7 + $0x1d4] sm:$0xf] }
 0x1c9   :  { %v2871_v32 = vpop.f32.mrf.mxu3  ;;  %v2884_v18 = vpop.f32.mrf.mxu0  ;;  %3501 = vmatpush.bf16.msrb.mxu3 %v5495_v13  ;;  %v5454_v44 = vld [vmem:[#allocation7 + $0x190] sm:$0xf]  ;;  %v5456_v13 = vld [vmem:[#allocation7 + $0x198] sm:$0xf0] }
 0x1ca   :  { %3492 = vmatpush.bf16.msrb.mxu2 %v5399_v14  ;;  %v2857_v47 = vadd.f32 %v2856_v19, %v2844_v48  ;;  %v533_v14 = vperm.slane %v6430_v40, 3  ;;  %v5999_v48 = vld [vmem:[#allocation7 + $0x194] sm:$0xf0] }
 0x1cb   :  { %v2910_v46 = vpop.f32.mrf.mxu1 }
 0x1cc   :  { %v2870_v52 = vadd.f32 %v2869_v23, %v2857_v47  ;;  %v2909_v56 = vadd.f32 %v6444_v29, %v533_v14  ;;  %v5478_v23 = vld [vmem:[#allocation7 + $0x1c0] sm:$0xf]  ;;  %v5997_v47 = vld [vmem:[#allocation7 + $0x184] sm:$0xf0] }
 0x1cd   :  { %v5479_v54 = vor.u32 %v6005_v21, %v5478_v23  ;;  %v5462_v29 = vld [vmem:[#allocation7 + $0x1a0] sm:$0xf] }
 0x1ce   :  { %3493 = vmatpush.bf16.msrb.mxu2 %v5391_v9  ;;  %v2883_v41 = vadd.f32 %v2882_v26, %v2870_v52  ;;  %v5486_v9 = vld [vmem:[#allocation7 + $0x1d0] sm:$0xf]  ;;  %v5446_v46 = vld [vmem:[#allocation7 + $0x180] sm:$0xf] }
 0x1cf   :  { %v5487_v19 = vor.u32 %v6007_v35, %v5486_v9 }
 0x1d1   :  { %3502 = vmatpush.bf16.msrb.mxu3 %v5487_v19 }
 0x1d2   :  { %3494 = vmatpush.bf16.msrb.mxu2 %v5383_v36 }
 0x1d5   :  { %3503 = vmatpush.bf16.msrb.mxu3 %v5479_v54 }
 0x1d6   :  { %3539 = vmatpush.bf16.msra.mxu2 %v5443_v27  ;;  %v5470_v27 = vld [vmem:[#allocation7 + $0x1b0] sm:$0xf] }
 0x1d7   :  { %v5471_v63 = vor.u32 %v6003_v30, %v5470_v27 }
 0x1d9   :  { %v2895_v58 = vpop.f32.mrf.mxu3  ;;  %3504 = vmatpush.bf16.msrb.mxu3 %v5471_v63 }
 0x1da   :  { %3540 = vmatpush.bf16.msra.mxu2 %v5435_v31  ;;  %v2896_v60 = vadd.f32 %v2895_v58, %v2883_v41  ;;  %v6001_v31 = vld [vmem:[#allocation7 + $0x1a4] sm:$0xf0]  ;;  %v5496_v41 = vld [vmem:[#allocation7 + $0x1e8] sm:$0xf0]  ;;  %v5488_v58 = vld [vmem:[#allocation7 + $0x1d8] sm:$0xf0] }
 0x1db   :  { %v5463_v42 = vor.u32 %v6001_v31, %v5462_v29 }
 0x1dc   :  { %vm3057_vm4 = vcmp.ge.f32.partialorder %v2896_v60, 0.0  ;;  %v3061_v37 = vmul.f32 0.01, %v2896_v60 }
 0x1dd   :  { %3505 = vmatpush.bf16.msrb.mxu3 %v5463_v42 }
 0x1de   :  { %3541 = vmatpush.bf16.msra.mxu2 %v5427_v45  ;;  %v3065_v1 = vsel %vm3057_vm4, %v2896_v60, %v3061_v37  ;;  %v5455_v45 = vor.u32 %v5999_v48, %v5454_v44  ;;  %v5480_v37 = vld [vmem:[#allocation7 + $0x1c8] sm:$0xf0] }
 0x1df   :  { %v3069_v24 = vpack.c.bf16 %v3065_v1, %v3065_v1  ;;  %v5483_v1 = vor.u32 %v6004_v62, %v5480_v37  ;;  %v6024_v62 = vld [vmem:[#allocation10 + $0x60] sm:$0xff]  ;;  %v6023_v37 = vld [vmem:[#allocation10 + $0x58] sm:$0xff] }
 0x1e0   :  { %v2921_v5 = vpop.f32.mrf.mxu2 }
 0x1e1   :  { %3495 = vmatmul.bf16.vlgmr.msrb.gmra.mxu2 %v3069_v24  ;;  %v2897_v4 = vpop.f32.mrf.mxu3  ;;  %v2947_v8 = vpop.f32.mrf.mxu0  ;;  %v2922_v59 = vadd.f32 %v2921_v5, %v2909_v56  ;;  %3506 = vmatpush.bf16.msrb.mxu3 %v5455_v45  ;;  %v5448_v56 = vld [vmem:[#allocation7 + $0x188] sm:$0xf0]  ;;  %v6027_v45 = vld [vmem:[#allocation10 + $0x78] sm:$0xff] }
 0x1e2   :  { %3542 = vmatpush.bf16.msra.mxu2 %v5419_v51  ;;  %v5447_v51 = vor.u32 %v5997_v47, %v5446_v46  ;;  %v6018_v46 = vld [vmem:[#allocation10 + $0x30] sm:$0xff]  ;;  %3718 = vmatpush.bf16.msrb.mxu1 %v6027_v45 }
 0x1e3   :  { %v2960_v38 = vpop.f32.mrf.mxu1  ;;  %v6026_v47 = vld [vmem:[#allocation10 + $0x70] sm:$0xff] }
 0x1e5   :  { %3507 = vmatpush.bf16.msrb.mxu3 %v5447_v51 }
 0x1e6   :  { %3543 = vmatpush.bf16.msra.mxu2 %v5411_v17  ;;  %v6008_v17 = vld [vmem:[#allocation7 + $0x1e4] sm:$0xf]  ;;  %3719 = vmatpush.bf16.msrb.mxu1 %v6026_v47 }
 0x1e7   :  { %v5499_v50 = vor.u32 %v6008_v17, %v5496_v41  ;;  %v6014_v17 = vld [vmem:[#allocation10 + $0x10] sm:$0xff] }
 0x1e8   :  { %v2923_v43 = vpop.f32.mrf.mxu2 }
 0x1e9   :  { %v2949_v20 = vpop.f32.mrf.mxu0  ;;  %3552 = vmatpush.bf16.msra.mxu3 %v5507_v53  ;;  %v5459_v43 = vor.u32 %v5998_v12, %v5456_v13 }
 0x1ea   :  { %3544 = vmatpush.bf16.msra.mxu2 %v5403_v25  ;;  %v5491_v25 = vor.u32 %v6006_v57, %v5488_v58  ;;  %v6013_v58 = vld [vmem:[#allocation10 + $0x8] sm:$0xff] }
 0x1eb   :  { %v2962_v15 = vpop.f32.mrf.mxu1 }
 0x1ec   :  { %v5996_v15 = vld [vmem:[#allocation7 + $0x184] sm:$0xf] }
 0x1ed   :  { %3553 = vmatpush.bf16.msra.mxu3 %v5499_v50  ;;  %v5451_v9 = vor.u32 %v5996_v15, %v5448_v56 }
 0x1ee   :  { %3545 = vmatpush.bf16.msra.mxu2 %v5395_v2  ;;  %v6002_v2 = vld [vmem:[#allocation7 + $0x1b4] sm:$0xf] }
 0x1ef   :  { %v5475_v4 = vor.u32 %v6002_v2, %v5472_v3 }
 0x1f1   :  { %3554 = vmatpush.bf16.msra.mxu3 %v5491_v25  ;;  %v6012_v25 = vld [vmem:[#allocation10] sm:$0xff] }
 0x1f2   :  { %3546 = vmatpush.bf16.msra.mxu2 %v5387_v34  ;;  %v5464_v34 = vld [vmem:[#allocation7 + $0x1a8] sm:$0xf0] }
 0x1f5   :  { %3547 = vmatmul.bf16.vlgmr.msra.gmra.mxu2 %v3069_v24  ;;  %3555 = vmatpush.bf16.msra.mxu3 %v5483_v1  ;;  %v3137_v24 = vperm.slane %v3135_v0, 0  ;;  %v6021_v1 = vld [vmem:[#allocation10 + $0x48] sm:$0xff] }
 0x1f9   :  { %v2934_v39 = vpop.f32.mrf.mxu3  ;;  %3556 = vmatpush.bf16.msra.mxu3 %v5475_v4 }
 0x1fa   :  { %v2935_v22 = vadd.f32 %v2934_v39, %v2922_v59 }
 0x1fc   :  { %v2948_v26 = vadd.f32 %v2947_v8, %v2935_v22 }
 0x1fe   :  { %v2961_v36 = vadd.f32 %v2960_v38, %v2948_v26  ;;  %v5467_v38 = vor.u32 %v6000_v7, %v5464_v34 }
 0x200   :  { %v2973_v40 = vpop.f32.mrf.mxu2  ;;  %3557 = vmatpush.bf16.msra.mxu3 %v5467_v38 }
 0x201   :  { %v2936_v55 = vpop.f32.mrf.mxu3  ;;  %v2999_v32 = vpop.f32.mrf.mxu0  ;;  %v2974_v20 = vadd.f32 %v2973_v40, %v2961_v36 }
 0x202   :  { %v3138_v55 = vperm.slane %v3135_v0, 1  ;;  %v6022_v0 = vld [vmem:[#allocation10 + $0x50] sm:$0xff] }
 0x203   :  { %v3012_v33 = vpop.f32.mrf.mxu1 }
 0x204   :  { %3558 = vmatpush.bf16.msra.mxu3 %v5459_v43  ;;  %v6041_v43 = vld [vmem:[#allocation12] ss:$0 sm:$0xff] }
 0x208   :  { %v2975_v18 = vpop.f32.mrf.mxu2  ;;  %3559 = vmatpush.bf16.msra.mxu3 %v5451_v9 }
 0x209   :  { %v3001_v52 = vpop.f32.mrf.mxu0 }
 0x20a   :  { %v6016_v52 = vld [vmem:[#allocation10 + $0x20] sm:$0xff] }
 0x20b   :  { %v3014_v16 = vpop.f32.mrf.mxu1 }
 0x20c   :  { %v6015_v16 = vld [vmem:[#allocation10 + $0x18] sm:$0xff] }
 0x219   :  { %v2986_v60 = vpop.f32.mrf.mxu3 }
 0x21a   :  { %v2987_v35 = vadd.f32 %v2986_v60, %v2974_v20  ;;  %v6025_v60 = vld [vmem:[#allocation10 + $0x68] sm:$0xff] }
 0x21b   :  { %3720 = vmatpush.bf16.msrb.mxu1 %v6025_v60 }
 0x21c   :  { %v3000_v19 = vadd.f32 %v2999_v32, %v2987_v35 }
 0x21e   :  { %v3013_v23 = vadd.f32 %v3012_v33, %v3000_v19  ;;  %v6019_v33 = vld [vmem:[#allocation10 + $0x38] sm:$0xff] }
 0x21f   :  { %3705 = vmatpush.bf16.msrb.mxu0 %v6019_v33  ;;  %3721 = vmatpush.bf16.msrb.mxu1 %v6024_v62 }
 0x220   :  { %v3025_v5 = vpop.f32.mrf.mxu2 }
 0x221   :  { %v2988_v61 = vpop.f32.mrf.mxu3  ;;  %v3470_v6 = vpop.f32.mrf.mxu0  ;;  %v3026_v21 = vadd.f32 %v3025_v5, %v3013_v23 }
 0x222   :  { %v3471_v8 = vadd.f32 %v3470_v6, %v3137_v24  ;;  %v6020_v24 = vld [vmem:[#allocation10 + $0x40] sm:$0xff] }
 0x223   :  { %v3483_v10 = vpop.f32.mrf.mxu1  ;;  %3706 = vmatpush.bf16.msrb.mxu0 %v6018_v46  ;;  %3722 = vmatpush.bf16.msrb.mxu1 %v6023_v37 }
 0x224   :  { %v3484_v11 = vadd.f32 %v3483_v10, %v3471_v8 }
 0x227   :  { %3707 = vmatpush.bf16.msrb.mxu0 %v6017_v28  ;;  %3723 = vmatpush.bf16.msrb.mxu1 %v6022_v0 }
 0x228   :  { %v3027_v14 = vpop.f32.mrf.mxu2 }
 0x229   :  { %v3472_v59 = vpop.f32.mrf.mxu0 }
 0x22b   :  { %v3485_v39 = vpop.f32.mrf.mxu1  ;;  %3708 = vmatpush.bf16.msrb.mxu0 %v6016_v52  ;;  %3724 = vmatpush.bf16.msrb.mxu1 %v6021_v1 }
 0x22f   :  { %3709 = vmatpush.bf16.msrb.mxu0 %v6015_v16  ;;  %3725 = vmatpush.bf16.msrb.mxu1 %v6020_v24 }
 0x233   :  { %3710 = vmatpush.bf16.msrb.mxu0 %v6014_v17 }
 0x237   :  { %3711 = vmatpush.bf16.msrb.mxu0 %v6013_v58 }
 0x238   :  { %v3051_v54 = vpop.f32.mrf.mxu2 }
 0x239   :  { %v3038_v22 = vpop.f32.mrf.mxu3 }
 0x23a   :  { %v3039_v26 = vadd.f32 %v3038_v22, %v3026_v21 }
 0x23b   :  { %3712 = vmatpush.bf16.msrb.mxu0 %v6012_v25 }
 0x23c   :  { %v3052_v27 = vadd.f32 %v3051_v54, %v3039_v26 }
 0x23e   :  { %vm3058_vm5 = vcmp.ge.f32.partialorder %v3052_v27, 0.0  ;;  %v3062_v30 = vmul.f32 0.01, %v3052_v27 }
 0x240   :  { %v3066_v36 = vsel %vm3058_vm5, %v3052_v27, %v3062_v30  ;;  %v3053_v29 = vpop.f32.mrf.mxu2 }
 0x241   :  { %v3070_v40 = vpack.c.bf16 %v3066_v36, %v3066_v36  ;;  %v3040_v63 = vpop.f32.mrf.mxu3  ;;  %v3522_v31 = vpop.f32.mrf.mxu0 }
 0x242   :  { %v3523_v42 = vadd.f32 %v3522_v31, %v3138_v55 }
 0x243   :  { %3508 = vmatmul.bf16.vlgmr.msrb.gmra.mxu3 %v3070_v40  ;;  %v3535_v44 = vpop.f32.mrf.mxu1 }
 0x244   :  { %v3536_v48 = vadd.f32 %v3535_v44, %v3523_v42 }
 0x249   :  { %v3524_v18 = vpop.f32.mrf.mxu0 }
 0x24b   :  { %v3537_v32 = vpop.f32.mrf.mxu1 }
 0x253   :  { %3560 = vmatmul.bf16.vlgmr.msra.gmra.mxu3 %v3070_v40 }
 0x264   :  { %v3496_v49 = vpop.f32.mrf.mxu2 }
 0x265   :  { %v3497_v51 = vadd.f32 %v3496_v49, %v3484_v11 }
 0x26c   :  { %v3498_v53 = vpop.f32.mrf.mxu2 }
 0x278   :  { %v3548_v41 = vpop.f32.mrf.mxu2 }
 0x279   :  { %v3549_v50 = vadd.f32 %v3548_v41, %v3536_v48 }
 0x280   :  { %v3550_v57 = vpop.f32.mrf.mxu2 }
 0x2c6   :  { %v3509_v2 = vpop.f32.mrf.mxu3 }
 0x2c7   :  { %v3510_v3 = vadd.f32 %v3509_v2, %v3497_v51 }
 0x2c9   :  { %vm3565_vm6 = vcmp.ge.f32.partialorder %v3510_v3, 0.0  ;;  %v3567_v61 = vmul.f32 0.01, %v3510_v3 }
 0x2cb   :  { %v3569_v4 = vsel %vm3565_vm6, %v3510_v3, %v3567_v61 }
 0x2cc   :  { %v3571_v5 = vpack.c.bf16 %v3569_v4, %v3569_v4 }
 0x2ce   :  { %v3511_v6 = vpop.f32.mrf.mxu3  ;;  %3713 = vmatmul.bf16.vlgmr.msrb.gmra.mxu0 %v3571_v5 }
 0x2d6   :  { %v3561_v7 = vpop.f32.mrf.mxu3 }
 0x2d7   :  { %v3562_v34 = vadd.f32 %v3561_v7, %v3549_v50 }
 0x2d9   :  { %vm3566_vm7 = vcmp.ge.f32.partialorder %v3562_v34, 0.0  ;;  %v3568_v8 = vmul.f32 0.01, %v3562_v34 }
 0x2db   :  { %v3570_v10 = vsel %vm3566_vm7, %v3562_v34, %v3568_v8 }
 0x2dc   :  { %v3572_v38 = vpack.c.bf16 %v3570_v10, %v3570_v10 }
 0x2de   :  { %v3563_v11 = vpop.f32.mrf.mxu3  ;;  %3726 = vmatmul.bf16.vlgmr.msrb.gmra.mxu1 %v3572_v38 }
 0x34b   :  { %v3714_v12 = vpop.f32.mrf.mxu0 }
 0x34c   :  { %v3715_v20 = vadd.f32 %v6041_v43, %v3714_v12 }
 0x353   :  { %v3716_v13 = vpop.f32.mrf.mxu0 }
 0x35b   :  { %v3727_v14 = vpop.f32.mrf.mxu1 }
 0x35c   :  { %v3728_v15 = vadd.f32 %v3727_v14, %v3715_v20 }
 0x35e   :  { %vm3731_vm8 = vcmp.ge.f32.partialorder %v3728_v15, 0.0  ;;  %v3732_v56 = vmul.f32 0.01, %v3728_v15 }
 0x360   :  { %v3733_v59 = vsel %vm3731_vm8, %v3728_v15, %v3732_v56 }
 0x361   :  { %v3734_v9 = vpack.c.bf16 %v3733_v59, %v3733_v59 }
 0x363   :  { %3735 = vst [vmem:[%s6460_s7] sm:$0xf] %v3734_v9  ;;  %v3729_v35 = vpop.f32.mrf.mxu1 }
 0x364   :  { %3740 = vsyncpa [#allocation3], 1 }
 0x365   :  { %3741 = vsyncpa [#allocation5], 1 }
 0x366   :  { %3742 = vsyncpa [#allocation8], 1 }
 0x367   :  { %3743 = vsyncpa [#allocation11], 1 }

</bundles_post_ra>
